<compile_context>
chip_gen: v6e
topology: v6e:2x2x1
jax: 0.10.0
libtpu: 0.0.40
codegen_flags: <defaults>
</compile_context>

<pallas_src>
import math
import functools

import jax
import jax.numpy as jnp
from jax.experimental import pallas as pl
from jax.experimental.pallas import tpu as pltpu


# ----------------------------------------------------------------------------- kernel
def _nn_basis_kernel(x_ref, fe_ref, w1x_ref, w1s_ref, w1c_ref, b1_ref,
                     w2_ref, b2_ref, w3_ref, b3_ref, o_ref, *, activation):
    if activation == "relu":
        act = jax.nn.relu
    else:
        # exact (erf) gelu matches torch.nn.functional.gelu default.
        # TODO(synk): if gelu becomes the EUP bottleneck after the bf16 matmul
        # speedup, consider approximate=True (tanh) behind a flag.
        act = functools.partial(jax.nn.gelu, approximate=False)

    mm_dtype = w2_ref.dtype                      # bf16 fast path or f32 parity path
    x = x_ref[...]                               # (tm, D*P) f32

    # Fourier features (kept f32 so the sin/cos arguments stay exact):
    # packed scaled[m, p*F*D + f*D + d] = x[m, p*D + d] * freqs[f]
    scaled = jnp.dot(x, fe_ref[...], preferred_element_type=jnp.float32)   # (tm, F*D*P)
    s = jnp.sin(scaled).astype(mm_dtype)
    c = jnp.cos(scaled).astype(mm_dtype)
    xm = x.astype(mm_dtype)

    # fc1 over facets = cat([x, sin, cos], -1), as split (block-diagonal) matmuls.
    h = (jnp.dot(xm, w1x_ref[...], preferred_element_type=jnp.float32)
         + jnp.dot(s, w1s_ref[...], preferred_element_type=jnp.float32)
         + jnp.dot(c, w1c_ref[...], preferred_element_type=jnp.float32)
         + b1_ref[...])
    h = act(h).astype(mm_dtype)

    # fc2 + activation
    h = act(jnp.dot(h, w2_ref[...], preferred_element_type=jnp.float32) + b2_ref[...])
    h = h.astype(mm_dtype)

    # fc3 (no activation)
    o_ref[...] = (jnp.dot(h, w3_ref[...], preferred_element_type=jnp.float32)
                  + b3_ref[...]).astype(o_ref.dtype)


# ----------------------------------------------------------------------------- wrapper
def default_pack_factor():
    """P=4 for 128-wide-MXU generations (v5e and older), P=8 for v6e/v7x."""
    try:
        kind = jax.devices()[0].device_kind.lower()
    except Exception:
        return 8
    for tok in ("v2", "v3", "v4", "v5e", "v5 lite", "v5lite"):
        if tok in kind:
            return 4
    return 8


def nn_basis_functions(x, packed, *, activation="relu", tm=1024,
                       single_buffer_weights=True):
    """x: (M, D) float32. `packed` from pack_params(..., P). Returns (M, base)."""
    M, D = x.shape
    DP = packed["fe"].shape[0]
    assert DP % D == 0, "packed params built for a different input_features"
    P = DP // D
    FDP = packed["fe"].shape[1]
    baseP = packed["w2"].shape[1]
    base = baseP // P

    # Pad rows so M is a multiple of P (zero rows, dropped at the end), then lane-pack:
    # (Mp, D) row-major is byte-identical to (Mp/P, D*P) row-major -> free reshape.
    Mp = pl.cdiv(M, P) * P
    if Mp != M:
        x = jnp.pad(x, ((0, Mp - M), (0, 0)))
    rows = Mp // P
    xp = x.reshape(rows, DP)

    # Row tile: clamp to the (sublane-rounded) problem size, keep a multiple of 8,
    # then pad rows to a full grid.
    tm = min(tm, pl.cdiv(rows, 8) * 8)
    tm = max(8, (tm // 8) * 8)
    rows_p = pl.cdiv(rows, tm) * tm
    if rows_p != rows:
        xp = jnp.pad(xp, ((0, rows_p - rows), (0, 0)))

    # ---- cost estimate (per call) -------------------------------------------------
    flops = 2 * rows_p * (DP * FDP + DP * baseP + 2 * FDP * baseP + 2 * baseP * baseP)
    transcendentals = rows_p * 2 * FDP
    if activation == "gelu":
        transcendentals += rows_p * 2 * baseP
    weight_bytes = sum(int(v.size) * v.dtype.itemsize for v in packed.values())
    bytes_accessed = int(xp.size) * 4 + rows_p * baseP * 4 + weight_bytes
    cost = pl.CostEstimate(flops=int(flops), transcendentals=int(transcendentals),
                           bytes_accessed=int(bytes_accessed))

    # ---- VMEM budget: double-buffered x/out tiles + weights + intermediate slabs ---
    per_row = 4 * 2 * (DP + baseP) + 4 * (3 * FDP + 2 * baseP)
    vmem_limit = weight_bytes * 2 + tm * per_row + (8 << 20)
    vmem_limit = int(max(24 << 20, min(32 << 20, vmem_limit)))

    def run(single_buf):
        spec_kwargs = {"pipeline_mode": pl.Buffered(1)} if single_buf else {}

        def full(arr):  # resident, constant-index operand
            return pl.BlockSpec(arr.shape, lambda i: (0, 0), **spec_kwargs)

        return pl.pallas_call(
            functools.partial(_nn_basis_kernel, activation=activation),
            out_shape=jax.ShapeDtypeStruct((rows_p, baseP), x.dtype),
            grid_spec=pltpu.PrefetchScalarGridSpec(
                num_scalar_prefetch=0,
                grid=(rows_p // tm,),
                in_specs=[
                    pl.BlockSpec((tm, DP), lambda i: (i, 0)),   # packed x tile
                    full(packed["fe"]),                          # freq expansion (D*P, F*D*P)
                    full(packed["w1x"]),                         # W1 x-part   (D*P, base*P)
                    full(packed["w1s"]),                         # W1 sin-part (F*D*P, base*P)
                    full(packed["w1c"]),                         # W1 cos-part (F*D*P, base*P)
                    full(packed["b1"]),                          # b1 (1, base*P)
                    full(packed["w2"]),                          # W2 (base*P, base*P)
                    full(packed["b2"]),                          # b2 (1, base*P)
                    full(packed["w3"]),                          # W3 (base*P, base*P)
                    full(packed["b3"]),                          # b3 (1, base*P)
                ],
                out_specs=pl.BlockSpec((tm, baseP), lambda i: (i, 0)),
            ),
            compiler_params=pltpu.CompilerParams(
                dimension_semantics=("parallel",),   # megacore / v7x 2-TC sharding
                vmem_limit_bytes=vmem_limit,
            ),
            cost_estimate=cost,
        )(xp, packed["fe"], packed["w1x"], packed["w1s"], packed["w1c"], packed["b1"],
          packed["w2"], packed["b2"], packed["w3"], packed["b3"])

    if single_buffer_weights:
        try:
            out = run(True)
        except Exception:
            # Installed Pallas rejected pl.Buffered(1); fall back to default buffering.
            out = run(False)
    else:
        out = run(False)

    # (rows, base*P) row-major is byte-identical to (Mp, base) row-major -> free reshape.
    return out[:rows].reshape(Mp, base)[:M]


# ----------------------------------------------------------------------------- params
def make_params(key, input_features, num_modes, base_layer):
    """Deterministic synthetic parameters (shapes follow NNBasisFunctions.__init__)."""
    D, F, base = input_features, num_modes, base_layer
    in_calc = D + D * F * 2
    ks = jax.random.split(key, 6)

    def init(k, shape, fan_in):
        return jax.random.normal(k, shape, jnp.float32) / math.sqrt(fan_in)

    w1 = init(ks[0], (in_calc, base), in_calc)   # stored (in, out): x @ W1 == torch x @ W.T
    b1 = init(ks[1], (base,), in_calc)
    w2 = init(ks[2], (base, base), base)
    b2 = init(ks[3], (base,), base)
    w3 = init(ks[4], (base, base), base)
    b3 = init(ks[5], (base,), base)
    freqs = jnp.exp(jnp.linspace(0.0, math.pi, F)).astype(jnp.float32)
    return freqs, w1, b1, w2, b2, w3, b3


def pack_params(freqs, w1, b1, w2, b2, w3, b3, input_features, num_modes, P,
                weight_dtype=jnp.bfloat16):
    """Lane-packed (block-diagonal P-copy) parameters for the kernel.

    weight_dtype=jnp.bfloat16 -> bf16 MXU fast path (f32 accumulation in-kernel);
    weight_dtype=jnp.float32  -> exact f32 parity with the PyTorch reference.
    The frequency-expansion matrix and biases always stay f32.
    """
    D, F = input_features, num_modes
    FD = F * D

    # fe[d, f*D + d'] = freqs[f] * delta(d, d')  ->  x @ fe gives torch's `scaled` layout.
    eye = jnp.eye(D, dtype=jnp.float32)
    fe = (freqs[:, None, None] * eye[None, :, :]).transpose(1, 0, 2).reshape(D, FD)

    # fc1 weight split along the input axis into [x | sin | cos] blocks.
    w1x, w1s, w1c = w1[:D], w1[D:D + FD], w1[D + FD:]

    eye_p = jnp.eye(P, dtype=jnp.float32)
    bd = lambda w: jnp.kron(eye_p, w)                     # block-diagonal P-copy
    tile = lambda b: jnp.tile(b.reshape(1, -1), (1, P))   # bias replicated per packed point

    return dict(
        fe=bd(fe).astype(jnp.float32),
        w1x=bd(w1x).astype(weight_dtype),
        w1s=bd(w1s).astype(weight_dtype),
        w1c=bd(w1c).astype(weight_dtype),
        w2=bd(w2).astype(weight_dtype),
        w3=bd(w3).astype(weight_dtype),
        b1=tile(b1).astype(jnp.float32),
        b2=tile(b2).astype(jnp.float32),
        b3=tile(b3).astype(jnp.float32),
    )


# ----------------------------------------------------------------------------- reference
def reference_forward(x3d, freqs, w1, b1, w2, b2, w3, b3, activation="relu"):
    """Plain-JAX transcription of the PyTorch forward (fourier + fc1/fc2/fc3)."""
    act = jax.nn.relu if activation == "relu" else functools.partial(jax.nn.gelu, approximate=False)
    B, N, D = x3d.shape
    F = freqs.shape[0]
    scaled = (x3d[..., None, :] * freqs[None, None, :, None]).reshape(B, N, F * D)
    feats = jnp.concatenate([jnp.sin(scaled), jnp.cos(scaled)], axis=-1)
    facets = jnp.concatenate([x3d, feats], axis=-1)
    h = act(facets @ w1 + b1)
    h = act(h @ w2 + b2)
    return h @ w3 + b3


if __name__ == "__main__":
    # Small shapes consistent with the module: point-cloud coords (batch, num_points, 3)
    batch, num_points, input_features = 2, 128, 3
    num_modes, base_layer = 4, 32
    activation = "relu"
    P = default_pack_factor()   # 8 on v6e/v7x (256-wide MXU), 4 on v5e/older

    key = jax.random.PRNGKey(0)
    kx, kp = jax.random.split(key)
    x3d = jax.random.normal(kx, (batch, num_points, input_features), jnp.float32)

    freqs, w1, b1, w2, b2, w3, b3 = make_params(kp, input_features, num_modes, base_layer)
    ref = reference_forward(x3d, freqs, w1, b1, w2, b2, w3, b3, activation)
    x_flat = x3d.reshape(batch * num_points, input_features)

    # TODO(synk): only the fourier_features=True path is implemented; the plain-fc
    # path and the unused bn1/bn2/bn3 BatchNorm layers are not translated.

    # 1) bf16 fast path (default for perf) — validated at a looser tolerance.
    packed_bf16 = pack_params(freqs, w1, b1, w2, b2, w3, b3,
                              input_features, num_modes, P, weight_dtype=jnp.bfloat16)
    out_bf16 = nn_basis_functions(x_flat, packed_bf16, activation=activation, tm=1024)
    out_bf16 = out_bf16.reshape(batch, num_points, base_layer)
    jax.block_until_ready(out_bf16)
    assert jnp.allclose(out_bf16, ref, atol=5e-2, rtol=5e-2), "bf16 path mismatch vs reference"

    # 2) exact-f32 parity path — tight tolerance vs the PyTorch-equivalent reference.
    packed_f32 = pack_params(freqs, w1, b1, w2, b2, w3, b3,
                             input_features, num_modes, P, weight_dtype=jnp.float32)
    out_f32 = nn_basis_functions(x_flat, packed_f32, activation=activation, tm=1024)
    out_f32 = out_f32.reshape(batch, num_points, base_layer)
    jax.block_until_ready(out_f32)
    assert jnp.allclose(out_f32, ref, atol=1e-4, rtol=1e-4), "f32 path mismatch vs reference"

    print("KERNEL_OK")
</pallas_src>

<mosaic_0001>
module attributes {stable_mosaic.version = 11 : i64} {
  func.func @_nn_basis_kernel(%arg0: i32, %arg1: memref<32x24xf32, #tpu.memory_space<vmem>>, %arg2: memref<24x96xf32, #tpu.memory_space<vmem>>, %arg3: memref<24x256xbf16, #tpu.memory_space<vmem>>, %arg4: memref<96x256xbf16, #tpu.memory_space<vmem>>, %arg5: memref<96x256xbf16, #tpu.memory_space<vmem>>, %arg6: memref<1x256xf32, #tpu.memory_space<vmem>>, %arg7: memref<256x256xbf16, #tpu.memory_space<vmem>>, %arg8: memref<1x256xf32, #tpu.memory_space<vmem>>, %arg9: memref<256x256xbf16, #tpu.memory_space<vmem>>, %arg10: memref<1x256xf32, #tpu.memory_space<vmem>>, %arg11: memref<32x256xf32, #tpu.memory_space<vmem>>) attributes {dimension_semantics = [#tpu.dimension_semantics<parallel>], iteration_bounds = array<i64: 1>, scalar_prefetch = 0 : i64, scratch_operands = 0 : i64, tpu.core_type = #tpu.core_type<tc>, window_params = [{transform_indices = @transform_0, window_bounds = array<i64: 32, 24>}, {pipeline_mode = #tpu.pipeline_mode<synchronous>, transform_indices = @transform_1, window_bounds = array<i64: 24, 96>}, {pipeline_mode = #tpu.pipeline_mode<synchronous>, transform_indices = @transform_2, window_bounds = array<i64: 24, 256>}, {pipeline_mode = #tpu.pipeline_mode<synchronous>, transform_indices = @transform_3, window_bounds = array<i64: 96, 256>}, {pipeline_mode = #tpu.pipeline_mode<synchronous>, transform_indices = @transform_4, window_bounds = array<i64: 96, 256>}, {pipeline_mode = #tpu.pipeline_mode<synchronous>, transform_indices = @transform_5, window_bounds = array<i64: 1, 256>}, {pipeline_mode = #tpu.pipeline_mode<synchronous>, transform_indices = @transform_6, window_bounds = array<i64: 256, 256>}, {pipeline_mode = #tpu.pipeline_mode<synchronous>, transform_indices = @transform_7, window_bounds = array<i64: 1, 256>}, {pipeline_mode = #tpu.pipeline_mode<synchronous>, transform_indices = @transform_8, window_bounds = array<i64: 256, 256>}, {pipeline_mode = #tpu.pipeline_mode<synchronous>, transform_indices = @transform_9, window_bounds = array<i64: 1, 256>}, {transform_indices = @transform_10, window_bounds = array<i64: 32, 256>}]} {
    %c0 = arith.constant 0 : index
    %c0_0 = arith.constant 0 : index
    %0 = vector.load %arg1[%c0, %c0_0] : memref<32x24xf32, #tpu.memory_space<vmem>>, vector<32x24xf32>
    %c0_1 = arith.constant 0 : index
    %c0_2 = arith.constant 0 : index
    %1 = vector.load %arg2[%c0_1, %c0_2] : memref<24x96xf32, #tpu.memory_space<vmem>>, vector<24x96xf32>
    %cst = arith.constant dense<0.000000e+00> : vector<32x96xf32>
    %2 = tpu.matmul %0, %1, %cst {dimension_numbers = #tpu.dot_dimension_numbers<[1], [0], [0], [1], [0, 0, 1, 1], [], []>} : vector<32x24xf32>, vector<24x96xf32>, vector<32x96xf32> -> vector<32x96xf32>
    %3 = math.sin %2 : vector<32x96xf32>
    %4 = arith.truncf %3 : vector<32x96xf32> to vector<32x96xbf16>
    %5 = math.cos %2 : vector<32x96xf32>
    %6 = arith.truncf %5 : vector<32x96xf32> to vector<32x96xbf16>
    %7 = arith.truncf %0 : vector<32x24xf32> to vector<32x24xbf16>
    %c0_3 = arith.constant 0 : index
    %c0_4 = arith.constant 0 : index
    %8 = vector.load %arg3[%c0_3, %c0_4] : memref<24x256xbf16, #tpu.memory_space<vmem>>, vector<24x256xbf16>
    %cst_5 = arith.constant dense<0.000000e+00> : vector<32x256xf32>
    %9 = tpu.matmul %7, %8, %cst_5 {dimension_numbers = #tpu.dot_dimension_numbers<[1], [0], [0], [1], [0, 0, 1, 1], [], []>} : vector<32x24xbf16>, vector<24x256xbf16>, vector<32x256xf32> -> vector<32x256xf32>
    %c0_6 = arith.constant 0 : index
    %c0_7 = arith.constant 0 : index
    %10 = vector.load %arg4[%c0_6, %c0_7] : memref<96x256xbf16, #tpu.memory_space<vmem>>, vector<96x256xbf16>
    %cst_8 = arith.constant dense<0.000000e+00> : vector<32x256xf32>
    %11 = tpu.matmul %4, %10, %cst_8 {dimension_numbers = #tpu.dot_dimension_numbers<[1], [0], [0], [1], [0, 0, 1, 1], [], []>} : vector<32x96xbf16>, vector<96x256xbf16>, vector<32x256xf32> -> vector<32x256xf32>
    %12 = arith.addf %9, %11 : vector<32x256xf32>
    %c0_9 = arith.constant 0 : index
    %c0_10 = arith.constant 0 : index
    %13 = vector.load %arg5[%c0_9, %c0_10] : memref<96x256xbf16, #tpu.memory_space<vmem>>, vector<96x256xbf16>
    %cst_11 = arith.constant dense<0.000000e+00> : vector<32x256xf32>
    %14 = tpu.matmul %6, %13, %cst_11 {dimension_numbers = #tpu.dot_dimension_numbers<[1], [0], [0], [1], [0, 0, 1, 1], [], []>} : vector<32x96xbf16>, vector<96x256xbf16>, vector<32x256xf32> -> vector<32x256xf32>
    %15 = arith.addf %12, %14 : vector<32x256xf32>
    %c0_12 = arith.constant 0 : index
    %c0_13 = arith.constant 0 : index
    %16 = vector.load %arg6[%c0_12, %c0_13] : memref<1x256xf32, #tpu.memory_space<vmem>>, vector<1x256xf32>
    %17 = vector.broadcast %16 : vector<1x256xf32> to vector<32x256xf32>
    %18 = arith.addf %15, %17 : vector<32x256xf32>
    %cst_14 = arith.constant 0.000000e+00 : f32
    %19 = vector.broadcast %cst_14 : f32 to vector<32x256xf32>
    %20 = arith.maximumf %18, %19 : vector<32x256xf32>
    %21 = arith.truncf %20 : vector<32x256xf32> to vector<32x256xbf16>
    %c0_15 = arith.constant 0 : index
    %c0_16 = arith.constant 0 : index
    %22 = vector.load %arg7[%c0_15, %c0_16] : memref<256x256xbf16, #tpu.memory_space<vmem>>, vector<256x256xbf16>
    %cst_17 = arith.constant dense<0.000000e+00> : vector<32x256xf32>
    %23 = tpu.matmul %21, %22, %cst_17 {dimension_numbers = #tpu.dot_dimension_numbers<[1], [0], [0], [1], [0, 0, 1, 1], [], []>} : vector<32x256xbf16>, vector<256x256xbf16>, vector<32x256xf32> -> vector<32x256xf32>
    %c0_18 = arith.constant 0 : index
    %c0_19 = arith.constant 0 : index
    %24 = vector.load %arg8[%c0_18, %c0_19] : memref<1x256xf32, #tpu.memory_space<vmem>>, vector<1x256xf32>
    %25 = vector.broadcast %24 : vector<1x256xf32> to vector<32x256xf32>
    %26 = arith.addf %23, %25 : vector<32x256xf32>
    %cst_20 = arith.constant 0.000000e+00 : f32
    %27 = vector.broadcast %cst_20 : f32 to vector<32x256xf32>
    %28 = arith.maximumf %26, %27 : vector<32x256xf32>
    %29 = arith.truncf %28 : vector<32x256xf32> to vector<32x256xbf16>
    %c0_21 = arith.constant 0 : index
    %c0_22 = arith.constant 0 : index
    %30 = vector.load %arg9[%c0_21, %c0_22] : memref<256x256xbf16, #tpu.memory_space<vmem>>, vector<256x256xbf16>
    %cst_23 = arith.constant dense<0.000000e+00> : vector<32x256xf32>
    %31 = tpu.matmul %29, %30, %cst_23 {dimension_numbers = #tpu.dot_dimension_numbers<[1], [0], [0], [1], [0, 0, 1, 1], [], []>} : vector<32x256xbf16>, vector<256x256xbf16>, vector<32x256xf32> -> vector<32x256xf32>
    %c0_24 = arith.constant 0 : index
    %c0_25 = arith.constant 0 : index
    %32 = vector.load %arg10[%c0_24, %c0_25] : memref<1x256xf32, #tpu.memory_space<vmem>>, vector<1x256xf32>
    %33 = vector.broadcast %32 : vector<1x256xf32> to vector<32x256xf32>
    %34 = arith.addf %31, %33 : vector<32x256xf32>
    %c0_26 = arith.constant 0 : index
    %c0_27 = arith.constant 0 : index
    %35 = vector.load %arg11[%c0_26, %c0_27] : memref<32x256xf32, #tpu.memory_space<vmem>>, vector<32x256xf32>
    tpu.vector_store %arg11[%c0_26, %c0_27], %34 {strides = array<i32>} : memref<32x256xf32, #tpu.memory_space<vmem>>, vector<32x256xf32>,
    return
  }
  func.func @transform_0(%arg0: i32) -> (i32, i32) {
    %c0_i32 = arith.constant 0 : i32
    %c0_i32_0 = arith.constant 0 : i32
    return %arg0, %c0_i32 : i32, i32
  }
  func.func @transform_1(%arg0: i32) -> (i32, i32) {
    %c0_i32 = arith.constant 0 : i32
    %c0_i32_0 = arith.constant 0 : i32
    %c0_i32_1 = arith.constant 0 : i32
    return %c0_i32, %c0_i32_0 : i32, i32
  }
  func.func @transform_2(%arg0: i32) -> (i32, i32) {
    %c0_i32 = arith.constant 0 : i32
    %c0_i32_0 = arith.constant 0 : i32
    %c0_i32_1 = arith.constant 0 : i32
    return %c0_i32, %c0_i32_0 : i32, i32
  }
  func.func @transform_3(%arg0: i32) -> (i32, i32) {
    %c0_i32 = arith.constant 0 : i32
    %c0_i32_0 = arith.constant 0 : i32
    %c0_i32_1 = arith.constant 0 : i32
    return %c0_i32, %c0_i32_0 : i32, i32
  }
  func.func @transform_4(%arg0: i32) -> (i32, i32) {
    %c0_i32 = arith.constant 0 : i32
    %c0_i32_0 = arith.constant 0 : i32
    %c0_i32_1 = arith.constant 0 : i32
    return %c0_i32, %c0_i32_0 : i32, i32
  }
  func.func @transform_5(%arg0: i32) -> (i32, i32) {
    %c0_i32 = arith.constant 0 : i32
    %c0_i32_0 = arith.constant 0 : i32
    %c0_i32_1 = arith.constant 0 : i32
    return %c0_i32, %c0_i32_0 : i32, i32
  }
  func.func @transform_6(%arg0: i32) -> (i32, i32) {
    %c0_i32 = arith.constant 0 : i32
    %c0_i32_0 = arith.constant 0 : i32
    %c0_i32_1 = arith.constant 0 : i32
    return %c0_i32, %c0_i32_0 : i32, i32
  }
  func.func @transform_7(%arg0: i32) -> (i32, i32) {
    %c0_i32 = arith.constant 0 : i32
    %c0_i32_0 = arith.constant 0 : i32
    %c0_i32_1 = arith.constant 0 : i32
    return %c0_i32, %c0_i32_0 : i32, i32
  }
  func.func @transform_8(%arg0: i32) -> (i32, i32) {
    %c0_i32 = arith.constant 0 : i32
    %c0_i32_0 = arith.constant 0 : i32
    %c0_i32_1 = arith.constant 0 : i32
    return %c0_i32, %c0_i32_0 : i32, i32
  }
  func.func @transform_9(%arg0: i32) -> (i32, i32) {
    %c0_i32 = arith.constant 0 : i32
    %c0_i32_0 = arith.constant 0 : i32
    %c0_i32_1 = arith.constant 0 : i32
    return %c0_i32, %c0_i32_0 : i32, i32
  }
  func.func @transform_10(%arg0: i32) -> (i32, i32) {
    %c0_i32 = arith.constant 0 : i32
    %c0_i32_0 = arith.constant 0 : i32
    return %arg0, %c0_i32 : i32, i32
  }
}

module attributes {stable_mosaic.version = 11 : i64} {
  func.func @_nn_basis_kernel(%arg0: i32, %arg1: memref<32x24xf32, #tpu.memory_space<vmem>>, %arg2: memref<24x96xf32, #tpu.memory_space<vmem>>, %arg3: memref<24x256xbf16, #tpu.memory_space<vmem>>, %arg4: memref<96x256xbf16, #tpu.memory_space<vmem>>, %arg5: memref<96x256xbf16, #tpu.memory_space<vmem>>, %arg6: memref<1x256xf32, #tpu.memory_space<vmem>>, %arg7: memref<256x256xbf16, #tpu.memory_space<vmem>>, %arg8: memref<1x256xf32, #tpu.memory_space<vmem>>, %arg9: memref<256x256xbf16, #tpu.memory_space<vmem>>, %arg10: memref<1x256xf32, #tpu.memory_space<vmem>>, %arg11: memref<32x256xf32, #tpu.memory_space<vmem>>) attributes {dimension_semantics = [#tpu.dimension_semantics<parallel>], iteration_bounds = array<i64: 1>, scalar_prefetch = 0 : i64, scratch_operands = 0 : i64, tpu.core_type = #tpu.core_type<tc>, window_params = [{transform_indices = @transform_0, window_bounds = array<i64: 32, 24>}, {pipeline_mode = #tpu.pipeline_mode<synchronous>, transform_indices = @transform_1, window_bounds = array<i64: 24, 96>}, {pipeline_mode = #tpu.pipeline_mode<synchronous>, transform_indices = @transform_2, window_bounds = array<i64: 24, 256>}, {pipeline_mode = #tpu.pipeline_mode<synchronous>, transform_indices = @transform_3, window_bounds = array<i64: 96, 256>}, {pipeline_mode = #tpu.pipeline_mode<synchronous>, transform_indices = @transform_4, window_bounds = array<i64: 96, 256>}, {pipeline_mode = #tpu.pipeline_mode<synchronous>, transform_indices = @transform_5, window_bounds = array<i64: 1, 256>}, {pipeline_mode = #tpu.pipeline_mode<synchronous>, transform_indices = @transform_6, window_bounds = array<i64: 256, 256>}, {pipeline_mode = #tpu.pipeline_mode<synchronous>, transform_indices = @transform_7, window_bounds = array<i64: 1, 256>}, {pipeline_mode = #tpu.pipeline_mode<synchronous>, transform_indices = @transform_8, window_bounds = array<i64: 256, 256>}, {pipeline_mode = #tpu.pipeline_mode<synchronous>, transform_indices = @transform_9, window_bounds = array<i64: 1, 256>}, {transform_indices = @transform_10, window_bounds = array<i64: 32, 256>}]} {
    %c0 = arith.constant 0 : index
    %c0_0 = arith.constant 0 : index
    %0 = vector.load %arg1[%c0, %c0_0] : memref<32x24xf32, #tpu.memory_space<vmem>>, vector<32x24xf32>
    %c0_1 = arith.constant 0 : index
    %c0_2 = arith.constant 0 : index
    %1 = vector.load %arg2[%c0_1, %c0_2] : memref<24x96xf32, #tpu.memory_space<vmem>>, vector<24x96xf32>
    %cst = arith.constant dense<0.000000e+00> : vector<32x96xf32>
    %2 = tpu.matmul %0, %1, %cst {dimension_numbers = #tpu.dot_dimension_numbers<[1], [0], [0], [1], [0, 0, 1, 1], [], []>} : vector<32x24xf32>, vector<24x96xf32>, vector<32x96xf32> -> vector<32x96xf32>
    %3 = math.sin %2 : vector<32x96xf32>
    %4 = arith.truncf %3 : vector<32x96xf32> to vector<32x96xbf16>
    %5 = math.cos %2 : vector<32x96xf32>
    %6 = arith.truncf %5 : vector<32x96xf32> to vector<32x96xbf16>
    %7 = arith.truncf %0 : vector<32x24xf32> to vector<32x24xbf16>
    %c0_3 = arith.constant 0 : index
    %c0_4 = arith.constant 0 : index
    %8 = vector.load %arg3[%c0_3, %c0_4] : memref<24x256xbf16, #tpu.memory_space<vmem>>, vector<24x256xbf16>
    %cst_5 = arith.constant dense<0.000000e+00> : vector<32x256xf32>
    %9 = tpu.matmul %7, %8, %cst_5 {dimension_numbers = #tpu.dot_dimension_numbers<[1], [0], [0], [1], [0, 0, 1, 1], [], []>} : vector<32x24xbf16>, vector<24x256xbf16>, vector<32x256xf32> -> vector<32x256xf32>
    %c0_6 = arith.constant 0 : index
    %c0_7 = arith.constant 0 : index
    %10 = vector.load %arg4[%c0_6, %c0_7] : memref<96x256xbf16, #tpu.memory_space<vmem>>, vector<96x256xbf16>
    %cst_8 = arith.constant dense<0.000000e+00> : vector<32x256xf32>
    %11 = tpu.matmul %4, %10, %cst_8 {dimension_numbers = #tpu.dot_dimension_numbers<[1], [0], [0], [1], [0, 0, 1, 1], [], []>} : vector<32x96xbf16>, vector<96x256xbf16>, vector<32x256xf32> -> vector<32x256xf32>
    %12 = arith.addf %9, %11 : vector<32x256xf32>
    %c0_9 = arith.constant 0 : index
    %c0_10 = arith.constant 0 : index
    %13 = vector.load %arg5[%c0_9, %c0_10] : memref<96x256xbf16, #tpu.memory_space<vmem>>, vector<96x256xbf16>
    %cst_11 = arith.constant dense<0.000000e+00> : vector<32x256xf32>
    %14 = tpu.matmul %6, %13, %cst_11 {dimension_numbers = #tpu.dot_dimension_numbers<[1], [0], [0], [1], [0, 0, 1, 1], [], []>} : vector<32x96xbf16>, vector<96x256xbf16>, vector<32x256xf32> -> vector<32x256xf32>
    %15 = arith.addf %12, %14 : vector<32x256xf32>
    %c0_12 = arith.constant 0 : index
    %c0_13 = arith.constant 0 : index
    %16 = vector.load %arg6[%c0_12, %c0_13] : memref<1x256xf32, #tpu.memory_space<vmem>>, vector<1x256xf32>
    %17 = vector.broadcast %16 : vector<1x256xf32> to vector<32x256xf32>
    %18 = arith.addf %15, %17 : vector<32x256xf32>
    %cst_14 = arith.constant 0.000000e+00 : f32
    %19 = vector.broadcast %cst_14 : f32 to vector<32x256xf32>
    %20 = arith.maximumf %18, %19 : vector<32x256xf32>
    %21 = arith.truncf %20 : vector<32x256xf32> to vector<32x256xbf16>
    %c0_15 = arith.constant 0 : index
    %c0_16 = arith.constant 0 : index
    %22 = vector.load %arg7[%c0_15, %c0_16] : memref<256x256xbf16, #tpu.memory_space<vmem>>, vector<256x256xbf16>
    %cst_17 = arith.constant dense<0.000000e+00> : vector<32x256xf32>
    %23 = tpu.matmul %21, %22, %cst_17 {dimension_numbers = #tpu.dot_dimension_numbers<[1], [0], [0], [1], [0, 0, 1, 1], [], []>} : vector<32x256xbf16>, vector<256x256xbf16>, vector<32x256xf32> -> vector<32x256xf32>
    %c0_18 = arith.constant 0 : index
    %c0_19 = arith.constant 0 : index
    %24 = vector.load %arg8[%c0_18, %c0_19] : memref<1x256xf32, #tpu.memory_space<vmem>>, vector<1x256xf32>
    %25 = vector.broadcast %24 : vector<1x256xf32> to vector<32x256xf32>
    %26 = arith.addf %23, %25 : vector<32x256xf32>
    %cst_20 = arith.constant 0.000000e+00 : f32
    %27 = vector.broadcast %cst_20 : f32 to vector<32x256xf32>
    %28 = arith.maximumf %26, %27 : vector<32x256xf32>
    %29 = arith.truncf %28 : vector<32x256xf32> to vector<32x256xbf16>
    %c0_21 = arith.constant 0 : index
    %c0_22 = arith.constant 0 : index
    %30 = vector.load %arg9[%c0_21, %c0_22] : memref<256x256xbf16, #tpu.memory_space<vmem>>, vector<256x256xbf16>
    %cst_23 = arith.constant dense<0.000000e+00> : vector<32x256xf32>
    %31 = tpu.matmul %29, %30, %cst_23 {dimension_numbers = #tpu.dot_dimension_numbers<[1], [0], [0], [1], [0, 0, 1, 1], [], []>} : vector<32x256xbf16>, vector<256x256xbf16>, vector<32x256xf32> -> vector<32x256xf32>
    %c0_24 = arith.constant 0 : index
    %c0_25 = arith.constant 0 : index
    %32 = vector.load %arg10[%c0_24, %c0_25] : memref<1x256xf32, #tpu.memory_space<vmem>>, vector<1x256xf32>
    %33 = vector.broadcast %32 : vector<1x256xf32> to vector<32x256xf32>
    %34 = arith.addf %31, %33 : vector<32x256xf32>
    %c0_26 = arith.constant 0 : index
    %c0_27 = arith.constant 0 : index
    %35 = vector.load %arg11[%c0_26, %c0_27] : memref<32x256xf32, #tpu.memory_space<vmem>>, vector<32x256xf32>
    tpu.vector_store %arg11[%c0_26, %c0_27], %34 {strides = array<i32>} : memref<32x256xf32, #tpu.memory_space<vmem>>, vector<32x256xf32>,
    return
  }
  func.func @transform_0(%arg0: i32) -> (i32, i32) {
    %c0_i32 = arith.constant 0 : i32
    %c0_i32_0 = arith.constant 0 : i32
    return %arg0, %c0_i32 : i32, i32
  }
  func.func @transform_1(%arg0: i32) -> (i32, i32) {
    %c0_i32 = arith.constant 0 : i32
    %c0_i32_0 = arith.constant 0 : i32
    %c0_i32_1 = arith.constant 0 : i32
    return %c0_i32, %c0_i32_0 : i32, i32
  }
  func.func @transform_2(%arg0: i32) -> (i32, i32) {
    %c0_i32 = arith.constant 0 : i32
    %c0_i32_0 = arith.constant 0 : i32
    %c0_i32_1 = arith.constant 0 : i32
    return %c0_i32, %c0_i32_0 : i32, i32
  }
  func.func @transform_3(%arg0: i32) -> (i32, i32) {
    %c0_i32 = arith.constant 0 : i32
    %c0_i32_0 = arith.constant 0 : i32
    %c0_i32_1 = arith.constant 0 : i32
    return %c0_i32, %c0_i32_0 : i32, i32
  }
  func.func @transform_4(%arg0: i32) -> (i32, i32) {
    %c0_i32 = arith.constant 0 : i32
    %c0_i32_0 = arith.constant 0 : i32
    %c0_i32_1 = arith.constant 0 : i32
    return %c0_i32, %c0_i32_0 : i32, i32
  }
  func.func @transform_5(%arg0: i32) -> (i32, i32) {
    %c0_i32 = arith.constant 0 : i32
    %c0_i32_0 = arith.constant 0 : i32
    %c0_i32_1 = arith.constant 0 : i32
    return %c0_i32, %c0_i32_0 : i32, i32
  }
  func.func @transform_6(%arg0: i32) -> (i32, i32) {
    %c0_i32 = arith.constant 0 : i32
    %c0_i32_0 = arith.constant 0 : i32
    %c0_i32_1 = arith.constant 0 : i32
    return %c0_i32, %c0_i32_0 : i32, i32
  }
  func.func @transform_7(%arg0: i32) -> (i32, i32) {
    %c0_i32 = arith.constant 0 : i32
    %c0_i32_0 = arith.constant 0 : i32
    %c0_i32_1 = arith.constant 0 : i32
    return %c0_i32, %c0_i32_0 : i32, i32
  }
  func.func @transform_8(%arg0: i32) -> (i32, i32) {
    %c0_i32 = arith.constant 0 : i32
    %c0_i32_0 = arith.constant 0 : i32
    %c0_i32_1 = arith.constant 0 : i32
    return %c0_i32, %c0_i32_0 : i32, i32
  }
  func.func @transform_9(%arg0: i32) -> (i32, i32) {
    %c0_i32 = arith.constant 0 : i32
    %c0_i32_0 = arith.constant 0 : i32
    %c0_i32_1 = arith.constant 0 : i32
    return %c0_i32, %c0_i32_0 : i32, i32
  }
  func.func @transform_10(%arg0: i32) -> (i32, i32) {
    %c0_i32 = arith.constant 0 : i32
    %c0_i32_0 = arith.constant 0 : i32
    return %arg0, %c0_i32 : i32, i32
  }
}

</mosaic_0001>

<bundles_post_ra>
// kernel: tpu_custom_call.1
= control target key start
LH: loop header
LB: loop body
LE: loop exit
PB: predicated region body
PF: predicated region fallthrough
CT: control target
= control target key end

     0   :  { %15 = vsyncpa [#allocation3], 0  ;;  %s2864_s0 = inlined_call_operand.vmem [shape: f32[32,24], index: 0, kind: input, shape index: {}]   ;;  %s2865_s1 = inlined_call_operand.vmem [shape: f32[24,96], index: 1, kind: input, shape index: {}]   ;;  %s2866_s2 = inlined_call_operand.vmem [shape: bf16[24,256], index: 2, kind: input, shape index: {}]   ;;  %s2867_s3 = inlined_call_operand.hbm [shape: bf16[96,256], index: 3, kind: input, shape index: {}]   ;;  %s2868_s4 = inlined_call_operand.hbm [shape: bf16[96,256], index: 4, kind: input, shape index: {}]   ;;  %s2869_s5 = inlined_call_operand.vmem [shape: f32[1,256], index: 5, kind: input, shape index: {}]   ;;  %s2870_s6 = inlined_call_operand.hbm [shape: bf16[256,256], index: 6, kind: input, shape index: {}]   ;;  %s2871_s7 = inlined_call_operand.vmem [shape: f32[1,256], index: 7, kind: input, shape index: {}]   ;;  %s2872_s8 = inlined_call_operand.hbm [shape: bf16[256,256], index: 8, kind: input, shape index: {}]   ;;  %s2873_s9 = inlined_call_operand.vmem [shape: f32[1,256], index: 9, kind: input, shape index: {}]   ;;  %s2874_s10 = inlined_call_operand.hbm [shape: f32[32,256], index: 10, kind: output, shape index: {}]  }
   0x1   :  { %16 = vsyncpa [#allocation6], 0 }
   0x2   :  { %17 = vsyncpa [#allocation9], 0 }
   0x3   :  { %18 = vsyncpa [#allocation4], 0  ;;  %s2418_s13 = smov [#allocation5]   ;;  %s2419_s15 = smov [#allocation2]  }
   0x4   :  { %s42_s14 = sshll.u32 %s2418_s13, 4  ;;  %s30_s16 = sshll.u32 %s2419_s15, 4  ;;  %s43_s14 = int_to_ptr.vmem [resolvable:$true] %s42_s14  ;;  %s31_s16 = int_to_ptr.vmem [resolvable:$true] %s30_s16 }
   0x5   :  { %s2318_s17 = scalar_lea.vmem %s43_s14, 1536  ;;  %p2323_p1 = scmp.lt.s32.totalorder %s43_s14, %s43_s14 }
   0x6   :  { %p2319_p0 = scmp.ne.s32.totalorder %s43_s14, %s2318_s17  ;;  %p2324_p2 = scmp.lt.s32.totalorder %s2318_s17, %s2318_s17 }
   0x8   :  { %p2325_p3 = por %p2324_p2, %p2323_p1 }
   0xa   :  { %p2326_p4 = pnand %p2325_p3, %p2319_p0 }
   0xc   :  { %2329 = shalt.err (!%p2326_p4)
}
   0xd   :  { %s2420_s18 = smov 128   ;;  %s2421_s19 = smov 8  }
   0xe   :  { %48 = dma.hbm_to_vmem [thread:$0]  %s2868_s4, 1536, %s43_s14, [#allocation6], %s2420_s18, %s2420_s18, %s2421_s19  }
   0xf   :  { %s2338_s22 = scalar_lea.vmem %s31_s16, 1536  ;;  %p2343_p6 = scmp.lt.s32.totalorder %s31_s16, %s31_s16 }
  0x10   :  { %p2339_p5 = scmp.ne.s32.totalorder %s31_s16, %s2338_s22  ;;  %p2344_p7 = scmp.lt.s32.totalorder %s2338_s22, %s2338_s22 }
  0x12   :  { %p2345_p8 = por %p2344_p7, %p2343_p6 }
  0x14   :  { %p2346_p9 = pnand %p2345_p8, %p2339_p5 }
  0x16   :  { %2349 = shalt.err (!%p2346_p9)
}
  0x17   :  { %36 = dma.hbm_to_vmem [thread:$0]  %s2867_s3, 1536, %s31_s16, [#allocation3], %s2420_s18, %s2420_s18, %s2421_s19  }
  0x18   :  { %s2422_s25 = smov [#allocation7]   ;;  %s2423_s27 = smov [#allocation8]  }
  0x19   :  { %s56_s26 = sshll.u32 %s2422_s25, 4  ;;  %s70_s28 = sshll.u32 %s2423_s27, 4  ;;  %s57_s26 = int_to_ptr.vmem [resolvable:$true] %s56_s26  ;;  %s71_s28 = int_to_ptr.vmem [resolvable:$true] %s70_s28 }
  0x1a   :  { %s2358_s4 = scalar_lea.vmem %s57_s26, 4096  ;;  %p2363_p11 = scmp.lt.s32.totalorder %s57_s26, %s57_s26 }
  0x1b   :  { %p2359_p10 = scmp.ne.s32.totalorder %s57_s26, %s2358_s4  ;;  %p2364_p12 = scmp.lt.s32.totalorder %s2358_s4, %s2358_s4 }
  0x1d   :  { %p2365_p13 = por %p2364_p12, %p2363_p11 }
  0x1f   :  { %p2366_p0 = pnand %p2365_p13, %p2359_p10 }
  0x21   :  { %2369 = shalt.err (!%p2366_p0)
}
  0x22   :  { %62 = dma.hbm_to_vmem [thread:$0]  %s2870_s6, 4096, %s57_s26, [#allocation6], %s2420_s18, %s2420_s18, %s2421_s19  }
  0x23   :  { %s2378_s3 = scalar_lea.vmem %s71_s28, 4096  ;;  %p2383_p2 = scmp.lt.s32.totalorder %s71_s28, %s71_s28 }
  0x24   :  { %p2379_p1 = scmp.ne.s32.totalorder %s71_s28, %s2378_s3  ;;  %p2384_p3 = scmp.lt.s32.totalorder %s2378_s3, %s2378_s3 }
  0x26   :  { %p2385_p4 = por %p2384_p3, %p2383_p2 }
  0x28   :  { %p2386_p5 = pnand %p2385_p4, %p2379_p1 }
  0x2a   :  { %2389 = shalt.err (!%p2386_p5)
}
  0x2b   :  { %76 = dma.hbm_to_vmem [thread:$0]  %s2872_s8, 4096, %s71_s28, [#allocation9], %s2420_s18, %s2420_s18, %s2421_s19  }
  0x2c   :  { %2410 = dma.done.wait [#allocation3], 1536  }
  0x2d   :  { %2411 = vsyncadd [#allocation3], 4294965760 }
  0x2e   :  { %2412 = dma.done.wait [#allocation6], 5632  }
  0x2f   :  { %2413 = vsyncadd [#allocation6], 4294961664 }
  0x30   :  { %2414 = dma.done.wait [#allocation9], 4096  }
  0x31   :  { %2415 = vsyncadd [#allocation9], 4294963200  ;;  %vm99_vm0 = vcmask 195584   ;;  %v98_v0 = vld [vmem:[%s2865_s1 + $0x10] sm:$0xff]  ;;  %v97_v1 = vld [vmem:[%s2865_s1 + $0x8] sm:$0xff]  ;;  %vm1187_vm1 = vcmask 1043456  }
  0x32   :  { %v96_v2 = vld [vmem:[%s2865_s1] sm:$0xff]  ;;  %2113 = vmatprep.subr.mxu1 %v98_v0  ;;  %v93_v4 = vld [vmem:[%s2864_s0 + $0x8] sm:$0xff]  ;;  %v94_v5 = vld [vmem:[%s2864_s0 + $0x10] sm:$0xff]  ;;  %v2424_v15 = vmov 0   ;;  %v2425_v55 = vmov 683565275  }
  0x33   :  { %v92_v3 = vld [vmem:[%s2864_s0] sm:$0xff]  ;;  %2114 = vmatpush3.msra.mxu1 %v98_v0  ;;  %v95_v7 = vld [vmem:[%s2864_s0 + $0x18] sm:$0xff]  ;;  %v1033_v9 = vld [vmem:[%s2866_s2 + $0x10] sm:$0xff]  ;;  %1226 = vmatprep.mubr.bf16.mxu0 %v2424_v15  ;;  %v2426_v57 = vmov 2475754826  }
  0x34   :  { %2119 = vmatprep.mubr.msk.f32.mxu1 %vm99_vm0, %v92_v3  ;;  %v1029_v6 = vpack.c.bf16 %v93_v4, %v92_v3  ;;  %2115 = vmatprep.subr.mxu1 %v97_v1  ;;  %v1030_v8 = vpack.c.bf16 %v95_v7, %v94_v5  ;;  %v2024_v10 = vcombine.high %v1033_v9, %v1033_v9  ;;  %v2159_v13 = vld [vmem:[%s2866_s2 + $0x4] ss:$8 sps:$4 sm:$0xff]   ;;  %v2161_v14 = vld [vmem:[%s2866_s2] ss:$8 sps:$4 sm:$0xff]   ;;  %v2164_v16 = vld [vmem:[#allocation2 + $0x54] ss:$8 sps:$4 sm:$0xff]  }
  0x35   :  { %2116 = vmatpush3.msra.mxu1 %v97_v1  ;;  %v2023_v11 = vcombine.low %v1033_v9, %v1033_v9  ;;  %v2167_v17 = vld [vmem:[#allocation5 + $0x54] ss:$8 sps:$4 sm:$0xff]   ;;  %v2162_v18 = vld [vmem:[#allocation2 + $0x50] ss:$8 sps:$4 sm:$0xff]   ;;  %v2170_v20 = vld [vmem:[#allocation2 + $0x44] ss:$8 sps:$4 sm:$0xff]  }
  0x36   :  { %2117 = vmatprep.subr.mxu1 %v96_v2  ;;  %2025 = vmatprep.subr.msk.bf16.mxu0 %vm1187_vm1, %v2024_v10  ;;  %v2165_v19 = vld [vmem:[#allocation5 + $0x50] ss:$8 sps:$4 sm:$0xff]   ;;  %v2173_v21 = vld [vmem:[#allocation5 + $0x44] ss:$8 sps:$4 sm:$0xff]   ;;  %v2168_v22 = vld [vmem:[#allocation2 + $0x40] ss:$8 sps:$4 sm:$0xff]  }
  0x37   :  { %2118 = vmatpush3.msra.mxu1 %v96_v2  ;;  %v1189_v12 = vsel %vm1187_vm1, %v2023_v11, 0  ;;  %v2171_v23 = vld [vmem:[#allocation5 + $0x40] ss:$8 sps:$4 sm:$0xff]   ;;  %v2176_v28 = vld [vmem:[#allocation2 + $0x34] ss:$8 sps:$4 sm:$0xff]  }
  0x38   :  { %2120 = vmatmul.mubr.msk.f32.vlgmr.msra.gmra.mxu1 %vm99_vm0, %v93_v4  ;;  %1207 = vmatpush1.bf16.msra.mxu0 %v1189_v12  ;;  %v2179_v29 = vld [vmem:[#allocation5 + $0x34] ss:$8 sps:$4 sm:$0xff]   ;;  %v2174_v35 = vld [vmem:[#allocation2 + $0x30] ss:$8 sps:$4 sm:$0xff]   ;;  %v2180_v53 = vld [vmem:[#allocation2 + $0x20] ss:$8 sps:$4 sm:$0xff]  }
  0x39   :  { %2122 = vmatprep.mubr.msk.f32.mxu1 %vm99_vm0, %v94_v5  ;;  %1208 = vmatprep.subr.bf16.mxu0 %v2159_v13  ;;  %v2177_v45 = vld [vmem:[#allocation5 + $0x30] ss:$8 sps:$4 sm:$0xff]   ;;  %v2182_v59 = vld [vmem:[#allocation2 + $0x24] ss:$8 sps:$4 sm:$0xff]   ;;  %v2183_v60 = vld [vmem:[#allocation5 + $0x20] ss:$8 sps:$4 sm:$0xff]  }
  0x3a   :  { %1117 = vmatprep.subr.bf16.mxu1 %v2164_v16  ;;  %v2427_v61 = vmov 2131351028   ;;  %v2428_v63 = vmov 2102212464   ;;  %v2429_v1 = vmov 920167782  }
  0x3b   :  { %1118 = vmatpush1.bf16.msra.mxu1 %v2162_v18  ;;  %v2185_v3 = vld [vmem:[#allocation5 + $0x24] ss:$8 sps:$4 sm:$0xff]   ;;  %v2430_v11 = vmov 1326507024   ;;  %v2186_v13 = vld [vmem:[#allocation2 + $0x10] ss:$8 sps:$4 sm:$0xff]  }
  0x3c   :  { %2123 = vmatmul.mubr.msk.f32.gmra.mxu1 %vm99_vm0, %v95_v7  ;;  %1209 = vmatpush1.bf16.msra.mxu0 %v2161_v14  ;;  %v2188_v7 = vld [vmem:[#allocation2 + $0x14] ss:$8 sps:$4 sm:$0xff]  }
  0x3d   :  { %1145 = vmatprep.mubr.bf16.mxu1 %v2424_v15  ;;  %1329 = vmatprep.subr.bf16.mxu0 %v2167_v17 }
  0x3e   :  { %1119 = vmatprep.subr.bf16.mxu1 %v2170_v20 }
  0x3f   :  { %2026 = vmatmul.mubr.msk.bf16.vlgmr.msra.gmra.mxu0 %vm99_vm0, %v1029_v6  ;;  %1120 = vmatpush1.bf16.msra.mxu1 %v2168_v22 }
  0x40   :  { %1236 = vmatprep.mubr.bf16.mxu0 %v2424_v15  ;;  %1330 = vmatpush1.bf16.msra.mxu0 %v2165_v19  ;;  %v2189_v19 = vld [vmem:[#allocation5 + $0x10] ss:$8 sps:$4 sm:$0xff]  }
  0x41   :  { %1331 = vmatprep.subr.bf16.mxu0 %v2173_v21  ;;  %1121 = vmatprep.subr.bf16.mxu1 %v2176_v28 }
  0x43   :  { %1122 = vmatpush1.bf16.msra.mxu1 %v2174_v35 }
  0x44   :  { %1332 = vmatpush1.bf16.msra.mxu0 %v2171_v23  ;;  %1123 = vmatprep.subr.bf16.mxu1 %v2182_v59  ;;  %v2194_v23 = vld [vmem:[#allocation2 + $0x4] ss:$8 sps:$4 sm:$0xff]  }
  0x45   :  { %1333 = vmatprep.subr.bf16.mxu0 %v2179_v29 }
  0x47   :  { %2027 = vmatmul.mubr.msk.bf16.gmra.mxu0 %vm99_vm0, %v1030_v8  ;;  %v2191_v8 = vld [vmem:[#allocation5 + $0x14] ss:$8 sps:$4 sm:$0xff]   ;;  %1124 = vmatpush1.bf16.msra.mxu1 %v2180_v53 }
  0x48   :  { %1357 = vmatprep.mubr.bf16.mxu0 %v2424_v15  ;;  %1334 = vmatpush1.bf16.msra.mxu0 %v2177_v45 }
  0x49   :  { %1335 = vmatprep.subr.bf16.mxu0 %v2185_v3  ;;  %1125 = vmatprep.subr.bf16.mxu1 %v2188_v7 }
  0x4b   :  { %1126 = vmatpush1.bf16.msra.mxu1 %v2186_v13 }
  0x4c   :  { %1336 = vmatpush1.bf16.msra.mxu0 %v2183_v60  ;;  %1127 = vmatprep.subr.bf16.mxu1 %v2194_v23  ;;  %v2200_v60 = vld [vmem:[#allocation7 + $0x74] ss:$8 sps:$4 sm:$0xff]  }
  0x4d   :  { %1337 = vmatprep.subr.bf16.mxu0 %v2191_v8 }
  0x50   :  { %1338 = vmatpush1.bf16.msra.mxu0 %v2189_v19 }
  0xf8   :  { %v2551_v24 = vpop.f32.mrf.mxu1 }
  0xf9   :  { %v301_v25 = vand.u32 2147483647, %v2551_v24  ;;  %v304_v26 = vand.u32 2139095040, %v2551_v24 }
  0xfa   :  { %v2555_v27 = vpop.f32.mrf.mxu1 }
  0xfb   :  { %v305_v30 = vshrl.u32 %v304_v26, 23  ;;  %v308_v31 = vand.u32 8388607, %v301_v25  ;;  %v197_v32 = vand.u32 2147483647, %v2555_v27  ;;  %v200_v33 = vand.u32 2139095040, %v2555_v27 }
  0xfc   :  { %v2563_v34 = vpop.f32.mrf.mxu1 }
  0xfd   :  { %v1979_v36 = vadd.s32 4294967169, %v305_v30  ;;  %v201_v37 = vshrl.u32 %v200_v33, 23  ;;  %v204_v38 = vand.u32 8388607, %v197_v32  ;;  %v512_v39 = vand.u32 2139095040, %v2563_v34 }
  0xfe   :  { %v309_v41 = vor.u32 8388608, %v308_v31  ;;  %v2192_v31 = vld [vmem:[#allocation2] ss:$8 sps:$4 sm:$0xff]   ;;  %v2197_v33 = vld [vmem:[#allocation5 + $0x4] ss:$8 sps:$4 sm:$0xff]  }
  0xff   :  { %v311_v40 = vadd.s32 1, %v1979_v36  ;;  %v1975_v42 = vadd.s32 4294967169, %v201_v37  ;;  %v205_v43 = vor.u32 8388608, %v204_v38  ;;  %v513_v44 = vshrl.u32 %v512_v39, 23  ;;  %1339 = vmatprep.subr.bf16.mxu0 %v2197_v33  ;;  %1128 = vmatpush1.bf16.msra.mxu1 %v2192_v31 }
 0x100   :  { %v2570_v50 = vshll.u32 %v309_v41, 8  ;;  %1622 = vmatprep.subr.bf16.mxu1 %v2200_v60 }
 0x101   :  { %vm312_vm2 = vcmp.gt.s32.totalorder %v311_v40, 0  ;;  %v207_v47 = vadd.s32 1, %v1975_v42  ;;  %v2572_v51 = vshll.u32 %v205_v43, 8  ;;  %v1987_v52 = vadd.s32 4294967169, %v513_v44  ;;  %v2195_v43 = vld [vmem:[#allocation5] ss:$8 sps:$4 sm:$0xff]  }
 0x102   :  { %v313_v46 = vsel %vm312_vm2, %v311_v40, 0  ;;  %1340 = vmatpush1.bf16.msra.mxu0 %v2195_v43  ;;  %vm303_vm2 = vcmp.lt.s32.totalorder %v2551_v24, 0 }
 0x103   :  { %v2568_v48 = vshrl.u32 %v313_v46, 5  ;;  %v315_v49 = vand.u32 31, %v313_v46  ;;  %vm208_vm3 = vcmp.gt.s32.totalorder %v207_v47, 0  ;;  %v519_v42 = vadd.s32 1, %v1987_v52 }
 0x104   :  { %v209_v18 = vsel %vm208_vm3, %v207_v47, 0 }
 0x105   :  { %v316_v54 = vsub.s32 32, %v315_v49  ;;  %v318_v56 = vshll.u32 %v2425_v55, %v315_v49  ;;  %v321_v58 = vshll.u32 %v2426_v57, %v315_v49  ;;  %v324_v62 = vshll.u32 %v2427_v61, %v315_v49 }
 0x106   :  { %v327_v0 = vshll.u32 %v2428_v63, %v315_v49  ;;  %v330_v2 = vshll.u32 %v2429_v1, %v315_v49  ;;  %vm333_vm4 = vcmp.lt.s32.totalorder %v2568_v48, 1  ;;  %vm334_vm5 = vcmp.lt.s32.totalorder %v2568_v48, 2 }
 0x107   :  { %v319_v4 = vshrl.u32 %v2426_v57, %v316_v54  ;;  %v322_v5 = vshrl.u32 %v2427_v61, %v316_v54  ;;  %v325_v6 = vshrl.u32 %v2428_v63, %v316_v54  ;;  %v317_v9 = vshrl.u32 %v2425_v55, %v316_v54 }
 0x108   :  { %v328_v10 = vshrl.u32 %v2429_v1, %v316_v54  ;;  %v331_v12 = vshrl.u32 %v2430_v11, %v316_v54  ;;  %vm335_vm6 = vcmp.lt.s32.totalorder %v2568_v48, 3  ;;  %vm336_vm7 = vcmp.lt.s32.totalorder %v2568_v48, 4 }
 0x109   :  { %v320_v14 = vor.u32 %v319_v4, %v318_v56  ;;  %v323_v16 = vor.u32 %v322_v5, %v321_v58  ;;  %v326_v17 = vor.u32 %v325_v6, %v324_v62  ;;  %v211_v22 = vand.u32 31, %v209_v18 }
 0x10a   :  { %v329_v20 = vor.u32 %v328_v10, %v327_v0  ;;  %v332_v21 = vor.u32 %v331_v12, %v330_v2  ;;  %v210_v46 = vshrl.u32 %v209_v18, 5  ;;  %vm520_vm13 = vcmp.gt.s32.totalorder %v519_v42, 0 }
 0x10b   :  { %v337_v26 = vsel %vm333_vm4, %v317_v9, %v320_v14  ;;  %v338_v28 = vsel %vm336_vm7, %v326_v17, 2102212464  ;;  %v341_v29 = vsel %vm333_vm4, %v320_v14, %v323_v16  ;;  %v345_v30 = vsel %vm333_vm4, %v323_v16, %v326_v17 }
 0x10c   :  { %v339_v35 = vsel %vm335_vm6, %v323_v16, %v338_v28  ;;  %v342_v36 = vsel %vm336_vm7, %v329_v20, 920167782  ;;  %v346_v37 = vsel %vm336_vm7, %v332_v21, 1326507024  ;;  %v212_v38 = vsub.s32 32, %v211_v22 }
 0x10d   :  { %v340_v39 = vsel %vm334_vm5, %v337_v26, %v339_v35  ;;  %v343_v40 = vsel %vm335_vm6, %v326_v17, %v342_v36  ;;  %v347_v41 = vsel %vm335_vm6, %v329_v20, %v346_v37  ;;  %v214_v47 = vshll.u32 %v2425_v55, %v211_v22 }
 0x10e   :  { %v344_v44 = vsel %vm334_vm5, %v341_v29, %v343_v40  ;;  %v348_v45 = vsel %vm334_vm5, %v345_v30, %v347_v41  ;;  %v356_v52 = vmul.u32 %v2570_v50, %v340_v39  ;;  %v215_v58 = vshrl.u32 %v2426_v57, %v212_v38 }
 0x10f   :  { %v2610_v49 = vmul.u32.u64.low %v2570_v50, %v348_v45  ;;  %v2611_v53 = vmul.u32.u64.high %v2570_v50, %v348_v45, %v2610_v49  ;;  %v2614_v54 = vmul.u32.u64.low %v2570_v50, %v344_v44  ;;  %v2615_v56 = vmul.u32.u64.high %v2570_v50, %v344_v44, %v2614_v54 }
 0x110   :  { %v217_v48 = vshll.u32 %v2426_v57, %v211_v22  ;;  %v218_v59 = vshrl.u32 %v2427_v61, %v212_v38  ;;  %v220_v62 = vshll.u32 %v2427_v61, %v211_v22  ;;  %v221_v0 = vshrl.u32 %v2428_v63, %v212_v38 }
 0x111   :  { %v223_v2 = vshll.u32 %v2428_v63, %v211_v22  ;;  %v224_v3 = vshrl.u32 %v2429_v1, %v212_v38  ;;  %v216_v4 = vor.u32 %v215_v58, %v214_v47  ;;  %v226_v50 = vshll.u32 %v2429_v1, %v211_v22 }
 0x112   :  { %v219_v5 = vor.u32 %v218_v59, %v217_v48  ;;  %v227_v6 = vshrl.u32 %v2430_v11, %v212_v38  ;;  %vm358_vm8 = vc.u32 %v2611_v53, %v2614_v54  ;;  %v359_v7 = vadd.s32 1, %v2615_v56 }
 0x113   :  { %v213_v8 = vshrl.u32 %v2425_v55, %v212_v38  ;;  %v222_v9 = vor.u32 %v221_v0, %v220_v62  ;;  %v225_v10 = vor.u32 %v224_v3, %v223_v2  ;;  %vm229_vm9 = vcmp.lt.s32.totalorder %v210_v46, 1  ;;  %v2660_v2 = vpop.f32.mrf.mxu1 }
 0x114   :  { %v228_v12 = vor.u32 %v227_v6, %v226_v50  ;;  %vm230_vm10 = vcmp.lt.s32.totalorder %v210_v46, 2  ;;  %v360_v13 = vsel %vm358_vm8, %v359_v7, %v2615_v56  ;;  %vm231_vm11 = vcmp.lt.s32.totalorder %v210_v46, 3 }
 0x115   :  { %vm232_vm12 = vcmp.lt.s32.totalorder %v210_v46, 4  ;;  %v237_v14 = vsel %vm229_vm9, %v216_v4, %v219_v5  ;;  %v361_v16 = vadd.s32 %v360_v13, %v356_v52  ;;  %v241_v19 = vsel %vm229_vm9, %v219_v5, %v222_v9 }
 0x116   :  { %v234_v17 = vsel %vm232_vm12, %v222_v9, 2102212464  ;;  %v238_v18 = vsel %vm232_vm12, %v225_v10, 920167782  ;;  %v233_v20 = vsel %vm229_vm9, %v213_v8, %v216_v4  ;;  %v242_v22 = vsel %vm232_vm12, %v228_v12, 1326507024 }
 0x117   :  { %v239_v21 = vsel %vm231_vm11, %v222_v9, %v238_v18  ;;  %v362_v23 = vadd.s32 536870912, %v361_v16  ;;  %v235_v26 = vsel %vm231_vm11, %v219_v5, %v234_v17  ;;  %v243_v29 = vsel %vm231_vm11, %v225_v10, %v242_v22 }
 0x118   :  { %v240_v28 = vsel %vm230_vm10, %v237_v14, %v239_v21  ;;  %v244_v30 = vsel %vm230_vm10, %v241_v19, %v243_v29  ;;  %v521_v38 = vsel %vm520_vm13, %v519_v42, 0  ;;  %v236_v39 = vsel %vm230_vm10, %v233_v20, %v235_v26 }
 0x119   :  { %v2636_v31 = vmul.u32.u64.low %v2572_v51, %v240_v28  ;;  %v2637_v33 = vmul.u32.u64.high %v2572_v51, %v240_v28, %v2636_v31  ;;  %v2640_v35 = vshrl.u32 %v362_v23, 30  ;;  %v523_v41 = vand.u32 31, %v521_v38 }
 0x11a   :  { %v2643_v36 = vmul.u32.u64.low %v2572_v51, %v244_v30  ;;  %v2644_v37 = vmul.u32.u64.high %v2572_v51, %v244_v30, %v2643_v36  ;;  %v252_v45 = vmul.u32 %v2572_v51, %v236_v39  ;;  %v509_v49 = vand.u32 2147483647, %v2563_v34 }
 0x11b   :  { %v364_v40 = vshll.u32 %v2640_v35, 30  ;;  %v255_v43 = vadd.s32 1, %v2637_v33  ;;  %v524_v42 = vsub.s32 32, %v523_v41  ;;  %v526_v59 = vshll.u32 %v2425_v55, %v523_v41 }
 0x11c   :  { %vm254_vm14 = vc.u32 %v2644_v37, %v2636_v31  ;;  %v516_v48 = vand.u32 8388607, %v509_v49  ;;  %v532_v62 = vshll.u32 %v2427_v61, %v523_v41  ;;  %v529_v4 = vshll.u32 %v2426_v57, %v523_v41 }
 0x11d   :  { %v365_v44 = vsub.s32 %v361_v16, %v364_v40  ;;  %v256_v47 = vsel %vm254_vm14, %v255_v43, %v2637_v33  ;;  %v527_v51 = vshrl.u32 %v2426_v57, %v524_v42  ;;  %v533_v0 = vshrl.u32 %v2428_v63, %v524_v42 }
 0x11e   :  { %v257_v52 = vadd.s32 %v256_v47, %v252_v45  ;;  %v530_v50 = vshrl.u32 %v2427_v61, %v524_v42  ;;  %v535_v6 = vshll.u32 %v2428_v63, %v523_v41  ;;  %v536_v7 = vshrl.u32 %v2429_v1, %v524_v42 }
 0x11f   :  { %v367_v56 = vsub.s32 0, %v365_v44  ;;  %v357_v8 = vadd.s32 %v2614_v54, %v2611_v53  ;;  %v517_v10 = vor.u32 8388608, %v516_v48  ;;  %v408_v12 = vand.u32 2139095040, %v2660_v2 }
 0x120   :  { %v258_v58 = vadd.s32 536870912, %v257_v52  ;;  %v522_v13 = vshrl.u32 %v521_v38, 5  ;;  %v528_v14 = vor.u32 %v527_v51, %v526_v59  ;;  %v534_v16 = vor.u32 %v533_v0, %v532_v62 }
 0x121   :  { %v1980_v46 = vmin.u32 %v367_v56, %v365_v44  ;;  %v538_v19 = vshll.u32 %v2429_v1, %v523_v41  ;;  %v539_v20 = vshrl.u32 %v2430_v11, %v524_v42  ;;  %v531_v23 = vor.u32 %v530_v50, %v529_v4 }
 0x122   :  { %v2662_v3 = vshrl.u32 %v258_v58, 30  ;;  %v537_v53 = vor.u32 %v536_v7, %v535_v6  ;;  %v525_v26 = vshrl.u32 %v2425_v55, %v524_v42  ;;  %v557_v28 = vshll.u32 %v517_v10, 8 }
 0x123   :  { %v369_v60 = vclz %v1980_v46  ;;  %v409_v29 = vshrl.u32 %v408_v12, 23  ;;  %vm544_vm0 = vcmp.lt.s32.totalorder %v522_v13, 4  ;;  %v540_v39 = vor.u32 %v539_v20, %v538_v19 }
 0x124   :  { %v260_v9 = vshll.u32 %v2662_v3, 30  ;;  %vm541_vm1 = vcmp.lt.s32.totalorder %v522_v13, 1  ;;  %v546_v40 = vsel %vm544_vm0, %v534_v16, 2102212464  ;;  %v550_v47 = vsel %vm544_vm0, %v537_v53, 920167782 }
 0x125   :  { %v1981_v5 = vadd.s32 4294967294, %v369_v60  ;;  %v549_v45 = vsel %vm541_vm1, %v528_v14, %v531_v23  ;;  %vm542_vm3 = vcmp.lt.s32.totalorder %v522_v13, 2  ;;  %vm543_vm4 = vcmp.lt.s32.totalorder %v522_v13, 3 }
 0x126   :  { %v2672_v18 = vsub.s32 %v257_v52, %v260_v9  ;;  %v547_v42 = vsel %vm543_vm4, %v531_v23, %v546_v40  ;;  %v551_v46 = vsel %vm543_vm4, %v534_v16, %v550_v47  ;;  %v553_v58 = vsel %vm541_vm1, %v531_v23, %v534_v16 }
 0x127   :  { %vm1982_vm15 = vcmp.lt.s32.totalorder %v1981_v5, 0  ;;  %v552_v60 = vsel %vm542_vm3, %v549_v45, %v551_v46  ;;  %v554_v51 = vsel %vm544_vm0, %v540_v39, 1326507024  ;;  %v253_v50 = vadd.s32 %v2636_v31, %v2644_v37 }
 0x128   :  { %v372_v17 = vsel %vm1982_vm15, 0, %v1981_v5  ;;  %v263_v54 = vsub.s32 0, %v2672_v18  ;;  %v555_v0 = vsel %vm543_vm4, %v537_v53, %v554_v51  ;;  %v1983_v7 = vadd.s32 4294967169, %v409_v29 }
 0x129   :  { %v373_v21 = vsub.s32 32, %v372_v17  ;;  %v377_v22 = vsub.s32 4294967266, %v372_v17  ;;  %v374_v30 = vshll.u32 %v365_v44, %v372_v17  ;;  %v545_v44 = vsel %vm541_vm1, %v525_v26, %v528_v14 }
 0x12a   :  { %v1976_v38 = vmin.u32 %v263_v54, %v2672_v18  ;;  %v2684_v4 = vmul.u32.u64.low %v557_v28, %v552_v60  ;;  %v2685_v5 = vmul.u32.u64.high %v557_v28, %v552_v60, %v2684_v4  ;;  %v556_v6 = vsel %vm542_vm3, %v553_v58, %v555_v0 }
 0x12b   :  { %v375_v33 = vshrl.u32 %v357_v8, %v373_v21  ;;  %v378_v36 = vadd.s32 127, %v377_v22  ;;  %v2691_v10 = vmul.u32.u64.low %v557_v28, %v556_v6  ;;  %v2692_v12 = vmul.u32.u64.high %v557_v28, %v556_v6, %v2691_v10 }
 0x12c   :  { %v265_v56 = vclz %v1976_v38  ;;  %v548_v17 = vsel %vm542_vm3, %v545_v44, %v547_v42  ;;  %v415_v19 = vadd.s32 1, %v1983_v7  ;;  %vm2697_vm6 = vcmp.le.f32.partialorder %v301_v25, 0.7853982 }
 0x12d   :  { %v376_v41 = vor.u32 %v375_v33, %v374_v30  ;;  %v379_v43 = vshll.u32 %v378_v36, 23  ;;  %v387_v37 = vsub.s32 4, %v2640_v35  ;;  %v567_v21 = vadd.s32 1, %v2685_v5 }
 0x12e   :  { %v1977_v59 = vadd.s32 4294967294, %v265_v56  ;;  %vm416_vm7 = vcmp.gt.s32.totalorder %v415_v19, 0  ;;  %v564_v54 = vmul.u32 %v557_v28, %v548_v17  ;;  %vm566_vm8 = vc.u32 %v2692_v12, %v2684_v4 }
 0x12f   :  { %v380_v52 = vor.u32 4788187, %v379_v43  ;;  %v383_v48 = vcvt.s32.f32 %v376_v41  ;;  %v417_v25 = vsel %vm416_vm7, %v415_v19, 0  ;;  %v568_v33 = vsel %vm566_vm8, %v567_v21, %v2685_v5 }
 0x130   :  { %vm1978_vm5 = vcmp.lt.s32.totalorder %v1977_v59, 0  ;;  %v419_v36 = vand.u32 31, %v417_v25  ;;  %v388_v38 = vsel %vm303_vm2, %v387_v37, %v2640_v35  ;;  %v405_v39 = vand.u32 2147483647, %v2660_v2 }
 0x131   :  { %v381_v62 = vand.u32 2147483647, %v380_v52  ;;  %v268_v9 = vsel %vm1978_vm5, 0, %v1977_v59  ;;  %v283_v40 = vsub.s32 4, %v2662_v3  ;;  %vm2729_vm9 = vcmp.le.f32.partialorder %v197_v32, 0.7853982 }
 0x132   :  { %v269_v14 = vsub.s32 32, %v268_v9  ;;  %v273_v16 = vsub.s32 4294967266, %v268_v9  ;;  %v270_v22 = vshll.u32 %v2672_v18, %v268_v9  ;;  %v569_v18 = vadd.s32 %v568_v33, %v564_v54 }
 0x133   :  { %v384_v8 = vmul.f32 %v383_v48, %v381_v62  ;;  %v420_v43 = vsub.s32 32, %v419_v36  ;;  %v425_v56 = vshll.u32 %v2426_v57, %v419_v36  ;;  %v428_v44 = vshll.u32 %v2427_v61, %v419_v36 }
 0x134   :  { %v271_v23 = vshrl.u32 %v253_v50, %v269_v14  ;;  %v274_v53 = vadd.s32 127, %v273_v16  ;;  %v570_v41 = vadd.s32 536870912, %v569_v18  ;;  %v431_v35 = vshll.u32 %v2428_v63, %v419_v36 }
 0x135   :  { %v385_v31 = vxor.u32 2147483648, %v384_v8  ;;  %v426_v42 = vshrl.u32 %v2427_v61, %v420_v43  ;;  %v434_v46 = vshll.u32 %v2429_v1, %v419_v36  ;;  %v429_v48 = vshrl.u32 %v2428_v63, %v420_v43 }
 0x136   :  { %v272_v29 = vor.u32 %v271_v23, %v270_v22  ;;  %v275_v30 = vshll.u32 %v274_v53, 23  ;;  %v2719_v52 = vshrl.u32 %v570_v41, 30  ;;  %v432_v59 = vshrl.u32 %v2429_v1, %v420_v43 }
 0x137   :  { %v386_v13 = vsel %vm303_vm2, %v385_v31, %v384_v8  ;;  %v435_v60 = vshrl.u32 %v2430_v11, %v420_v43  ;;  %vm199_vm10 = vcmp.lt.s32.totalorder %v2555_v27, 0  ;;  %v412_v62 = vand.u32 8388607, %v405_v39 }
 0x138   :  { %v389_v26 = vsel %vm2697_vm6, %v2551_v24, %v386_v13  ;;  %v276_v28 = vor.u32 4788187, %v275_v30  ;;  %v279_v47 = vcvt.s32.f32 %v272_v29  ;;  %v572_v61 = vshll.u32 %v2719_v52, 30 }
 0x139   :  { %2294 = vcosq.f32 %v389_v26  ;;  %v390_v63 = vsel %vm2697_vm6, 0, %v388_v38  ;;  %v422_v1 = vshll.u32 %v2425_v55, %v419_v36  ;;  %v423_v11 = vshrl.u32 %v2426_v57, %v420_v43 }
 0x13a   :  { %2296 = vsinq.f32 %v389_v26  ;;  %v277_v45 = vand.u32 2147483647, %v276_v28  ;;  %v284_v32 = vsel %vm199_vm10, %v283_v40, %v2662_v3  ;;  %v2742_v5 = vsub.s32 %v569_v18, %v572_v61 }
 0x13b   :  { %v418_v50 = vshrl.u32 %v417_v25, 5  ;;  %v427_v6 = vor.u32 %v426_v42, %v425_v56  ;;  %v430_v8 = vor.u32 %v429_v48, %v428_v44  ;;  %v433_v9 = vor.u32 %v432_v59, %v431_v35 }
 0x13c   :  { %v280_v58 = vmul.f32 %v279_v47, %v277_v45  ;;  %v436_v10 = vor.u32 %v435_v60, %v434_v46  ;;  %v394_v14 = vadd.s32 3, %v390_v63  ;;  %v575_v17 = vsub.s32 0, %v2742_v5 }
 0x13d   :  { %v413_v19 = vor.u32 8388608, %v412_v62  ;;  %v2748_v20 = vand.u32 3, %v390_v63  ;;  %v286_v57 = vsel %vm2729_vm9, 0, %v284_v32  ;;  %v424_v3 = vor.u32 %v423_v11, %v422_v1 }
 0x13e   :  { %v281_v0 = vxor.u32 2147483648, %v280_v58  ;;  %v1988_v31 = vmin.u32 %v575_v17, %v2742_v5  ;;  %vm437_vm11 = vcmp.lt.s32.totalorder %v418_v50, 1  ;;  %vm440_vm12 = vcmp.lt.s32.totalorder %v418_v50, 4 }
 0x13f   :  { %vm439_vm13 = vcmp.lt.s32.totalorder %v418_v50, 3  ;;  %v446_v37 = vsel %vm440_vm12, %v433_v9, 920167782  ;;  %v449_v21 = vsel %vm437_vm11, %v427_v6, %v430_v8  ;;  %v450_v22 = vsel %vm440_vm12, %v436_v10, 1326507024 }
 0x140   :  { %v282_v7 = vsel %vm199_vm10, %v281_v0, %v280_v58  ;;  %v577_v53 = vclz %v1988_v31  ;;  %v421_v13 = vshrl.u32 %v2425_v55, %v420_v43  ;;  %vm438_vm14 = vcmp.lt.s32.totalorder %v418_v50, 2 }
 0x141   :  { %v285_v16 = vsel %vm2729_vm9, %v2555_v27, %v282_v7  ;;  %v451_v54 = vsel %vm439_vm13, %v433_v9, %v450_v22  ;;  %v445_v26 = vsel %vm437_vm11, %v424_v3, %v427_v6  ;;  %v447_v29 = vsel %vm439_vm13, %v430_v8, %v446_v37 }
 0x142   :  { %2298 = vcosq.f32 %v285_v16  ;;  %v452_v30 = vsel %vm438_vm14, %v449_v21, %v451_v54  ;;  %v453_v33 = vshll.u32 %v413_v19, 8  ;;  %v395_v18 = vand.u32 3, %v394_v14  ;;  %v2198_v54 = vld [vmem:[#allocation7 + $0x70] ss:$8 sps:$4 sm:$0xff]  }
 0x143   :  { %2300 = vsinq.f32 %v285_v16  ;;  %v290_v36 = vadd.s32 3, %v286_v57  ;;  %v1989_v38 = vadd.s32 4294967294, %v577_v53  ;;  %v442_v28 = vsel %vm440_vm12, %v430_v8, 2102212464 }
 0x144   :  { %vm812_vm15 = vcmp.lt.s32.totalorder %v2748_v20, 2  ;;  %v2763_v40 = vmul.u32.u64.low %v453_v33, %v452_v30  ;;  %v2764_v55 = vmul.u32.u64.high %v453_v33, %v452_v30, %v2763_v40  ;;  %v708_v41 = vand.u32 3, %v286_v57 }
 0x145   :  { %vm1990_vm0 = vcmp.lt.s32.totalorder %v1989_v38, 0  ;;  %v441_v43 = vsel %vm437_vm11, %v421_v13, %v424_v3  ;;  %v448_v45 = vsel %vm438_vm14, %v445_v26, %v447_v29  ;;  %v443_v42 = vsel %vm439_vm13, %v427_v6, %v442_v28 }
 0x146   :  { %v2295_v23 = vpop.eup %2294  ;;  %v2768_v44 = vsel %vm1990_vm0, 0, %v1989_v38  ;;  %vm393_vm1 = vweird.f32 %v2551_v24  ;;  %vm396_vm2 = vcmp.lt.s32.totalorder %v395_v18, 2  ;;  %vm813_vm3 = vcmp.eq.s32.totalorder %v2748_v20, 0  ;;  %v2203_v24 = vld [vmem:[#allocation7 + $0x64] ss:$8 sps:$4 sm:$0xff]  }
 0x147   :  { %v2297_v25 = vpop.eup %2296  ;;  %v401_v56 = vxor.u32 2147483648, %v2295_v23  ;;  %vm816_vm4 = vcmp.eq.s32.totalorder %v2748_v20, 2  ;;  %v291_v35 = vand.u32 3, %v290_v36  ;;  %vm397_vm5 = vcmp.eq.s32.totalorder %v395_v18, 0  ;;  %v2206_v38 = vld [vmem:[#allocation7 + $0x54] ss:$8 sps:$4 sm:$0xff]  }
 0x148   :  { %v398_v47 = vxor.u32 2147483648, %v2297_v25  ;;  %vm400_vm6 = vcmp.eq.s32.totalorder %v395_v18, 2  ;;  %v2775_v46 = vmul.u32.u64.low %v453_v33, %v448_v45  ;;  %v2776_v58 = vmul.u32.u64.high %v453_v33, %v448_v45, %v2775_v46 }
 0x149   :  { %vm709_vm8 = vcmp.lt.s32.totalorder %v708_v41, 2  ;;  %vm710_vm9 = vcmp.eq.s32.totalorder %v708_v41, 0  ;;  %v585_v48 = vsub.s32 4294967266, %v2768_v44  ;;  %v444_v59 = vsel %vm438_vm14, %v441_v43, %v443_v42 }
 0x14a   :  { %vm1106_vm10 = vcmask 785408   ;;  %v399_v60 = vsel %vm397_vm5, %v2295_v23, %v398_v47  ;;  %v402_v51 = vsel %vm400_vm6, %v401_v56, %v2297_v25  ;;  %v815_v61 = vsel %vm813_vm3, %v2295_v23, %v398_v47 }
 0x14b   :  { %v818_v62 = vsel %vm816_vm4, %v401_v56, %v2297_v25  ;;  %vm292_vm11 = vcmp.lt.s32.totalorder %v291_v35, 2  ;;  %vm293_vm12 = vcmp.eq.s32.totalorder %v291_v35, 0  ;;  %vm713_vm13 = vcmp.eq.s32.totalorder %v708_v41, 2  ;;  %v2204_v41 = vld [vmem:[#allocation7 + $0x50] ss:$8 sps:$4 sm:$0xff]  }
 0x14c   :  { %vm462_vm0 = vc.u32 %v2764_v55, %v2775_v46  ;;  %vm296_vm7 = vcmp.eq.s32.totalorder %v291_v35, 2  ;;  %v460_v11 = vmul.u32 %v453_v33, %v444_v59  ;;  %v463_v32 = vadd.s32 1, %v2776_v58  ;;  %v2201_v33 = vld [vmem:[#allocation7 + $0x60] ss:$8 sps:$4 sm:$0xff]  }
 0x14d   :  { %v403_v50 = vsel %vm396_vm2, %v399_v60, %v402_v51  ;;  %v819_v6 = vsel %vm812_vm15, %v815_v61, %v818_v62  ;;  %v586_v8 = vadd.s32 127, %v585_v48  ;;  %v565_v14 = vadd.s32 %v2684_v4, %v2692_v12  ;;  %v2210_v48 = vld [vmem:[#allocation7 + $0x30] ss:$8 sps:$4 sm:$0xff]   ;;  %v2215_v61 = vld [vmem:[#allocation7 + $0x24] ss:$8 sps:$4 sm:$0xff]  }
 0x14e   :  { %v464_v16 = vsel %vm462_vm0, %v463_v32, %v2776_v58  ;;  %v581_v57 = vsub.s32 32, %v2768_v44  ;;  %v404_v20 = vsel %vm393_vm1, nan, %v403_v50  ;;  %v820_v31 = vsel %vm393_vm1, nan, %v819_v6  ;;  %v2218_v50 = vld [vmem:[#allocation7 + $0x14] ss:$8 sps:$4 sm:$0xff]  }
 0x14f   :  { %v2299_v63 = vpop.eup %2298  ;;  %v465_v3 = vadd.s32 %v464_v16, %v460_v11  ;;  %vm2879_vm14 = vweird.f32 %v2555_v27  ;;  %v587_v22 = vshll.u32 %v586_v8, 23  ;;  %v582_v29 = vshll.u32 %v2742_v5, %v2768_v44  ;;  %v2209_v5 = vld [vmem:[#allocation7 + $0x44] ss:$8 sps:$4 sm:$0xff]   ;;  %v2207_v44 = vld [vmem:[#allocation7 + $0x40] ss:$8 sps:$4 sm:$0xff]  }
 0x150   :  { %v2301_v0 = vpop.eup %2300  ;;  %v297_v1 = vxor.u32 2147483648, %v2299_v63  ;;  %vm2880_vm15 = vmmov %vm2879_vm14  ;;  %v583_v25 = vshrl.u32 %v565_v14, %v581_v57  ;;  %v461_v59 = vadd.s32 %v2775_v46, %v2764_v55  ;;  %vm511_vm2 = vcmp.lt.s32.totalorder %v2563_v34, 0  ;;  %v2213_v11 = vld [vmem:[#allocation7 + $0x20] ss:$8 sps:$4 sm:$0xff]   ;;  %v2216_v8 = vld [vmem:[#allocation7 + $0x10] ss:$8 sps:$4 sm:$0xff]  }
 0x151   :  { %v294_v7 = vxor.u32 2147483648, %v2301_v0  ;;  %v466_v23 = vadd.s32 536870912, %v465_v3  ;;  %v588_v30 = vor.u32 4788187, %v587_v22  ;;  %vm2819_vm3 = vcmp.le.f32.partialorder %v509_v49, 0.7853982 }
 0x152   :  { %v298_v9 = vsel %vm296_vm7, %v297_v1, %v2301_v0  ;;  %v715_v10 = vsel %vm713_vm13, %v297_v1, %v2301_v0  ;;  %v584_v18 = vor.u32 %v583_v25, %v582_v29  ;;  %v2221_v14 = vld [vmem:[#allocation7 + $0x4] ss:$8 sps:$4 sm:$0xff]   ;;  %v595_v49 = vsub.s32 4, %v2719_v52  ;;  %v2224_v57 = vld [vmem:[#allocation7 + $0xf4] ss:$8 sps:$4 sm:$0xff]  }
 0x153   :  { %v295_v17 = vsel %vm293_vm12, %v2299_v63, %v294_v7  ;;  %v712_v19 = vsel %vm710_vm9, %v2299_v63, %v294_v7  ;;  %v2803_v26 = vshrl.u32 %v466_v23, 30  ;;  %v589_v28 = vand.u32 2147483647, %v588_v30  ;;  %v2225_v23 = vld [vmem:[#allocation7 + $0xe0] ss:$8 sps:$4 sm:$0xff]  }
 0x154   :  { %v299_v37 = vsel %vm292_vm11, %v295_v17, %v298_v9  ;;  %v716_v21 = vsel %vm709_vm8, %v712_v19, %v715_v10  ;;  %v591_v43 = vcvt.s32.f32 %v584_v18  ;;  %v2219_v17 = vld [vmem:[#allocation7] ss:$8 sps:$4 sm:$0xff]   ;;  %vm407_vm4 = vcmp.lt.s32.totalorder %v2660_v2, 0  ;;  %v2236_v32 = vld [vmem:[#allocation7 + $0xb4] ss:$8 sps:$4 sm:$0xff]  }
 0x155   :  { %v300_v4 = vsel %vm2879_vm14, nan, %v299_v37  ;;  %v717_v12 = vsel %vm2880_vm15, nan, %v716_v21  ;;  %v468_v27 = vshll.u32 %v2803_v26, 30  ;;  %vm406_vm5 = vcmp.le.f32.partialorder %v405_v39, 0.7853982 }
 0x156   :  { %v613_v53 = vpack.c.bf16 %v404_v20, %v300_v4  ;;  %v1027_v13 = vpack.c.bf16 %v820_v31, %v717_v12  ;;  %v592_v47 = vmul.f32 %v591_v43, %v589_v28  ;;  %v596_v20 = vsel %vm511_vm2, %v595_v49, %v2719_v52  ;;  %v2222_v21 = vld [vmem:[#allocation7 + $0xf0] ss:$8 sps:$4 sm:$0xff]   ;;  %v2227_v4 = vld [vmem:[#allocation7 + $0xe4] ss:$8 sps:$4 sm:$0xff]   ;;  %v2230_v39 = vld [vmem:[#allocation7 + $0xd4] ss:$8 sps:$4 sm:$0xff]  }
 0x157   :  { %v469_v36 = vsub.s32 %v465_v3, %v468_v27  ;;  %v491_v3 = vsub.s32 4, %v2803_v26  ;;  %v598_v12 = vsel %vm2819_vm3, 0, %v596_v20  ;;  %v2233_v27 = vld [vmem:[#allocation7 + $0xc4] ss:$8 sps:$4 sm:$0xff]   ;;  %v2252_v49 = vld [vmem:[#allocation8 + $0x50] ss:$8 sps:$4 sm:$0xff]  }
 0x158   :  { %2019 = vmatmul.mubr.msk.bf16.vlgmr.msra.gmra.mxu1 %vm1106_vm10, %v613_v53  ;;  %2040 = vmatmul.mubr.msk.bf16.vlgmr.msra.gmra.mxu0 %vm1106_vm10, %v1027_v13  ;;  %v593_v35 = vxor.u32 2147483648, %v592_v47  ;;  %v602_v52 = vadd.s32 3, %v598_v12  ;;  %v1017_v30 = vand.u32 3, %v598_v12  ;;  %v2261_v20 = vld [vmem:[#allocation8 + $0x20] ss:$8 sps:$4 sm:$0xff]  }
 0x159   :  { %1155 = vmatprep.mubr.bf16.mxu1 %v2424_v15  ;;  %1367 = vmatprep.mubr.bf16.mxu0 %v2424_v15  ;;  %v471_v40 = vsub.s32 0, %v469_v36  ;;  %v2212_v15 = vld [vmem:[#allocation7 + $0x34] ss:$8 sps:$4 sm:$0xff]   ;;  %v492_v22 = vsel %vm407_vm4, %v491_v3, %v2803_v26  ;;  %v2263_v3 = vld [vmem:[#allocation8 + $0x24] ss:$8 sps:$4 sm:$0xff]  }
 0x15a   :  { %1623 = vmatpush1.bf16.msra.mxu1 %v2198_v54  ;;  %v594_v62 = vsel %vm511_vm2, %v593_v35, %v592_v47  ;;  %v494_v53 = vsel %vm406_vm5, 0, %v492_v22  ;;  %v603_v29 = vand.u32 3, %v602_v52  ;;  %vm1019_vm8 = vcmp.eq.s32.totalorder %v1017_v30, 0  ;;  %v2272_v12 = vld [vmem:[#allocation8 + $0xf4] ss:$8 sps:$4 sm:$0xff]   ;;  %v1228_v22 = vpop.f32.mrf.mxu0 }
 0x15b   :  { %1624 = vmatprep.subr.bf16.mxu1 %v2203_v24  ;;  %v1984_v45 = vmin.u32 %v471_v40, %v469_v36  ;;  %v597_v6 = vsel %vm2819_vm3, %v2563_v34, %v594_v62  ;;  %v498_v25 = vadd.s32 3, %v494_v53  ;;  %v2228_v24 = vld [vmem:[#allocation7 + $0xd0] ss:$8 sps:$4 sm:$0xff]   ;;  %vm1022_vm9 = vcmp.eq.s32.totalorder %v1017_v30, 2  ;;  %v2275_v52 = vld [vmem:[#allocation8 + $0xe4] ss:$8 sps:$4 sm:$0xff]  }
 0x15c   :  { %2302 = vcosq.f32 %v597_v6  ;;  %vm605_vm6 = vcmp.eq.s32.totalorder %v603_v29, 0  ;;  %vm608_vm7 = vcmp.eq.s32.totalorder %v603_v29, 2  ;;  %vm604_vm11 = vcmp.lt.s32.totalorder %v603_v29, 2 }
 0x15d   :  { %v473_v56 = vclz %v1984_v45  ;;  %2304 = vsinq.f32 %v597_v6  ;;  %v499_v26 = vand.u32 3, %v498_v25  ;;  %vm1018_vm13 = vcmp.lt.s32.totalorder %v1017_v30, 2  ;;  %v2243_v6 = vld [vmem:[#allocation7 + $0x80] ss:$8 sps:$4 sm:$0xff]   ;;  %v2276_v25 = vld [vmem:[#allocation8 + $0xd0] ss:$8 sps:$4 sm:$0xff]  }
 0x15e   :  { %1625 = vmatpush1.bf16.msra.mxu1 %v2201_v33  ;;  %vm601_vm3 = vweird.f32 %v2563_v34  ;;  %v2239_v34 = vld [vmem:[#allocation7 + $0xa4] ss:$8 sps:$4 sm:$0xff]  }
 0x15f   :  { %1626 = vmatprep.subr.bf16.mxu1 %v2206_v38  ;;  %v1985_v42 = vadd.s32 4294967294, %v473_v56  ;;  %v2231_v38 = vld [vmem:[#allocation7 + $0xc0] ss:$8 sps:$4 sm:$0xff]   ;;  %vm501_vm0 = vcmp.eq.s32.totalorder %v499_v26, 0  ;;  %vm504_vm14 = vcmp.eq.s32.totalorder %v499_v26, 2 }
 0x161   :  { %vm1986_vm1 = vcmp.lt.s32.totalorder %v1985_v42, 0 }
 0x162   :  { %1627 = vmatpush1.bf16.msra.mxu1 %v2204_v41  ;;  %v476_v58 = vsel %vm1986_vm1, 0, %v1985_v42  ;;  %vm500_vm1 = vcmp.lt.s32.totalorder %v499_v26, 2 }
 0x163   :  { %1628 = vmatprep.subr.bf16.mxu1 %v2209_v5  ;;  %v477_v60 = vsub.s32 32, %v476_v58  ;;  %v481_v51 = vsub.s32 4294967266, %v476_v58  ;;  %v478_v63 = vshll.u32 %v469_v36, %v476_v58  ;;  %v914_v36 = vand.u32 3, %v494_v53  ;;  %v1230_v53 = vpop.f32.mrf.mxu0 }
 0x165   :  { %v479_v0 = vshrl.u32 %v461_v59, %v477_v60  ;;  %v482_v1 = vadd.s32 127, %v481_v51  ;;  %vm916_vm12 = vcmp.eq.s32.totalorder %v914_v36, 0  ;;  %vm919_vm15 = vcmp.eq.s32.totalorder %v914_v36, 2 }
 0x166   :  { %1629 = vmatpush1.bf16.msra.mxu1 %v2207_v44  ;;  %vm915_vm2 = vcmp.lt.s32.totalorder %v914_v36, 2  ;;  %v2282_v36 = vld [vmem:[#allocation8 + $0xb0] ss:$8 sps:$4 sm:$0xff]  }
 0x167   :  { %1630 = vmatprep.subr.bf16.mxu1 %v2212_v15  ;;  %v480_v55 = vor.u32 %v479_v0, %v478_v63  ;;  %v483_v46 = vshll.u32 %v482_v1, 23 }
 0x169   :  { %v484_v7 = vor.u32 4788187, %v483_v46  ;;  %v487_v10 = vcvt.s32.f32 %v480_v55  ;;  %v2303_v13 = vpop.eup %2302  ;;  %v2237_v55 = vld [vmem:[#allocation7 + $0xa0] ss:$8 sps:$4 sm:$0xff]   ;;  %v2240_v46 = vld [vmem:[#allocation7 + $0x90] ss:$8 sps:$4 sm:$0xff]  }
 0x16a   :  { %1631 = vmatpush1.bf16.msra.mxu1 %v2210_v48  ;;  %v2305_v54 = vpop.eup %2304  ;;  %v609_v18 = vxor.u32 2147483648, %v2303_v13 }
 0x16b   :  { %1632 = vmatprep.subr.bf16.mxu1 %v2215_v61  ;;  %v485_v9 = vand.u32 2147483647, %v484_v7  ;;  %v606_v33 = vxor.u32 2147483648, %v2305_v54  ;;  %v2246_v7 = vld [vmem:[#allocation8 + $0x70] ss:$8 sps:$4 sm:$0xff]  }
 0x16c   :  { %v610_v41 = vsel %vm608_vm7, %v609_v18, %v2305_v54  ;;  %v1024_v45 = vsel %vm1022_vm9, %v609_v18, %v2305_v54  ;;  %v1232_v54 = vpop.f32.mrf.mxu0 }
 0x16d   :  { %v488_v16 = vmul.f32 %v487_v10, %v485_v9  ;;  %v607_v40 = vsel %vm605_vm6, %v2303_v13, %v606_v33  ;;  %v1021_v43 = vsel %vm1019_vm8, %v2303_v13, %v606_v33  ;;  %v2251_v9 = vld [vmem:[#allocation8 + $0x64] ss:$8 sps:$4 sm:$0xff]   ;;  %v2249_v10 = vld [vmem:[#allocation8 + $0x60] ss:$8 sps:$4 sm:$0xff]   ;;  %v2278_v13 = vld [vmem:[#allocation8 + $0xd4] ss:$8 sps:$4 sm:$0xff]  }
 0x16e   :  { %1633 = vmatpush1.bf16.msra.mxu1 %v2213_v11  ;;  %v611_v42 = vsel %vm604_vm11, %v607_v40, %v610_v41  ;;  %v1025_v35 = vsel %vm1018_vm13, %v1021_v43, %v1024_v45  ;;  %v2234_v11 = vld [vmem:[#allocation7 + $0xb0] ss:$8 sps:$4 sm:$0xff]   ;;  %v1234_v29 = vpop.f32.mrf.mxu0  ;;  %v2284_v33 = vld [vmem:[#allocation8 + $0xb4] ss:$8 sps:$4 sm:$0xff]  }
 0x16f   :  { %1634 = vmatprep.subr.bf16.mxu1 %v2218_v50  ;;  %v489_v19 = vxor.u32 2147483648, %v488_v16  ;;  %v612_v61 = vsel %vm601_vm3, nan, %v611_v42  ;;  %v1026_v63 = vsel %vm601_vm3, nan, %v1025_v35  ;;  %v2245_v50 = vld [vmem:[#allocation7 + $0x84] ss:$8 sps:$4 sm:$0xff]  }
 0x170   :  { %v1238_v30 = vpop.f32.mrf.mxu0  ;;  %v1386_v42 = vld [vmem:[%s2869_s5] sm:$0x3] }
 0x171   :  { %v490_v31 = vsel %vm407_vm4, %v489_v19, %v488_v16  ;;  %vm497_vm4 = vweird.f32 %v2660_v2  ;;  %v2257_v16 = vld [vmem:[#allocation8 + $0x44] ss:$8 sps:$4 sm:$0xff]   ;;  %v2260_v19 = vld [vmem:[#allocation8 + $0x34] ss:$8 sps:$4 sm:$0xff]  }
 0x172   :  { %1635 = vmatpush1.bf16.msra.mxu1 %v2216_v8  ;;  %v493_v37 = vsel %vm406_vm5, %v2660_v2, %v490_v31  ;;  %v2242_v2 = vld [vmem:[#allocation7 + $0x94] ss:$8 sps:$4 sm:$0xff]   ;;  %v1240_v18 = vpop.f32.mrf.mxu0 }
 0x173   :  { %1636 = vmatprep.subr.bf16.mxu1 %v2221_v14  ;;  %2306 = vcosq.f32 %v493_v37  ;;  %v2248_v8 = vld [vmem:[#allocation8 + $0x74] ss:$8 sps:$4 sm:$0xff]  }
 0x174   :  { %2308 = vsinq.f32 %v493_v37  ;;  %1891 = vmatprep.subr.bf16.mxu0 %v2248_v8  ;;  %v2254_v14 = vld [vmem:[#allocation8 + $0x54] ss:$8 sps:$4 sm:$0xff]   ;;  %v2264_v37 = vld [vmem:[#allocation8 + $0x10] ss:$8 sps:$4 sm:$0xff]   ;;  %v1242_v26 = vpop.f32.mrf.mxu0 }
 0x175   :  { %1892 = vmatpush1.bf16.msra.mxu0 %v2246_v7  ;;  %v2266_v31 = vld [vmem:[#allocation8 + $0x14] ss:$8 sps:$4 sm:$0xff]  }
 0x176   :  { %1637 = vmatpush1.bf16.msra.mxu1 %v2219_v17  ;;  %1893 = vmatprep.subr.bf16.mxu0 %v2251_v9  ;;  %v2255_v17 = vld [vmem:[#allocation8 + $0x40] ss:$8 sps:$4 sm:$0xff]  }
 0x177   :  { %1638 = vmatprep.subr.bf16.mxu1 %v2224_v57  ;;  %v2258_v57 = vld [vmem:[#allocation8 + $0x30] ss:$8 sps:$4 sm:$0xff]  }
 0x179   :  { %1894 = vmatpush1.bf16.msra.mxu0 %v2249_v10 }
 0x17a   :  { %1639 = vmatpush2.bf16.msra.mxu1 %v2222_v21  ;;  %1895 = vmatprep.subr.bf16.mxu0 %v2254_v14  ;;  %v2269_v21 = vld [vmem:[#allocation8 + $0x4] ss:$8 sps:$4 sm:$0xff]  }
 0x17b   :  { %1640 = vmatprep.subr.bf16.mxu1 %v2227_v4  ;;  %v2267_v4 = vld [vmem:[#allocation8] ss:$8 sps:$4 sm:$0xff]  }
 0x17d   :  { %1896 = vmatpush1.bf16.msra.mxu0 %v2252_v49 }
 0x17e   :  { %1641 = vmatpush2.bf16.msra.mxu1 %v2225_v23  ;;  %1897 = vmatprep.subr.bf16.mxu0 %v2257_v16  ;;  %v2270_v23 = vld [vmem:[#allocation8 + $0xf0] ss:$8 sps:$4 sm:$0xff]  }
 0x17f   :  { %1642 = vmatprep.subr.bf16.mxu1 %v2230_v39  ;;  %v2273_v39 = vld [vmem:[#allocation8 + $0xe0] ss:$8 sps:$4 sm:$0xff]  }
 0x180   :  { %v2307_v28 = vpop.eup %2306 }
 0x181   :  { %v2309_v5 = vpop.eup %2308  ;;  %v505_v47 = vxor.u32 2147483648, %v2307_v28  ;;  %1898 = vmatpush1.bf16.msra.mxu0 %v2255_v17 }
 0x182   :  { %1643 = vmatpush2.bf16.msra.mxu1 %v2228_v24  ;;  %v502_v56 = vxor.u32 2147483648, %v2309_v5  ;;  %1899 = vmatprep.subr.bf16.mxu0 %v2260_v19  ;;  %v2281_v24 = vld [vmem:[#allocation8 + $0xc4] ss:$8 sps:$4 sm:$0xff]  }
 0x183   :  { %1644 = vmatprep.subr.bf16.mxu1 %v2233_v27  ;;  %v506_v44 = vsel %vm504_vm14, %v505_v47, %v2309_v5  ;;  %v921_v15 = vsel %vm919_vm15, %v505_v47, %v2309_v5  ;;  %v2279_v27 = vld [vmem:[#allocation8 + $0xc0] ss:$8 sps:$4 sm:$0xff]  }
 0x184   :  { %v503_v58 = vsel %vm501_vm0, %v2307_v28, %v502_v56  ;;  %v918_v48 = vsel %vm916_vm12, %v2307_v28, %v502_v56  ;;  %v1244_v28 = vpop.f32.mrf.mxu0 }
 0x185   :  { %v507_v59 = vsel %vm500_vm1, %v503_v58, %v506_v44  ;;  %v922_v60 = vsel %vm915_vm2, %v918_v48, %v921_v15  ;;  %1900 = vmatpush1.bf16.msra.mxu0 %v2258_v57 }
 0x186   :  { %1645 = vmatpush2.bf16.msra.mxu1 %v2231_v38  ;;  %v508_v51 = vsel %vm497_vm4, nan, %v507_v59  ;;  %v923_v62 = vsel %vm497_vm4, nan, %v922_v60  ;;  %1901 = vmatprep.subr.bf16.mxu0 %v2263_v3  ;;  %v1388_v38 = vlaneseq }
 0x187   :  { %v614_v0 = vpack.c.bf16 %v612_v61, %v508_v51  ;;  %v1028_v1 = vpack.c.bf16 %v1026_v63, %v923_v62  ;;  %1646 = vmatprep.subr.bf16.mxu1 %v2236_v32 }
 0x188   :  { %v1389_v40 = vshrl.u32 %v1388_v38, 7  ;;  %v2293_v38 = vld [vmem:[#allocation8 + $0x84] ss:$8 sps:$4 sm:$0xff]  }
 0x189   :  { %2020 = vmatmul.mubr.msk.bf16.gmra.mxu1 %vm1106_vm10, %v614_v0  ;;  %2041 = vmatmul.mubr.msk.bf16.gmra.mxu0 %vm1106_vm10, %v1028_v1 }
 0x18a   :  { %1647 = vmatpush2.bf16.msra.mxu1 %v2234_v11  ;;  %1902 = vmatpush1.bf16.msra.mxu0 %v2261_v20  ;;  %v2842_v45 = vsub.s32 1, %v1389_v40  ;;  %v2844_v47 = vsub.s32 0, %v1389_v40  ;;  %v1450_v40 = vld [vmem:[%s2871_s7] sm:$0x3] }
 0x18b   :  { %1648 = vmatprep.subr.bf16.mxu1 %v2239_v34  ;;  %1903 = vmatprep.subr.bf16.mxu0 %v2266_v31 }
 0x18c   :  { %v1395_v59 = vrot.slane %v1386_v42, %v2842_v45  ;;  %v1391_v61 = vrot.slane %v1386_v42, %v2844_v47 }
 0x18e   :  { %1649 = vmatpush2.bf16.msra.mxu1 %v2237_v55  ;;  %1904 = vmatpush1.bf16.msra.mxu0 %v2264_v37 }
 0x18f   :  { %1650 = vmatprep.subr.bf16.mxu1 %v2242_v2  ;;  %1905 = vmatprep.subr.bf16.mxu0 %v2269_v21 }
 0x192   :  { %1651 = vmatpush2.bf16.msra.mxu1 %v2240_v46  ;;  %1906 = vmatpush1.bf16.msra.mxu0 %v2267_v4 }
 0x193   :  { %1652 = vmatprep.subr.bf16.mxu1 %v2245_v50  ;;  %1907 = vmatprep.subr.bf16.mxu0 %v2272_v12 }
 0x196   :  { %1653 = vmatpush2.bf16.msra.mxu1 %v2243_v6  ;;  %1908 = vmatpush2.bf16.msra.mxu0 %v2270_v23 }
 0x197   :  { %1909 = vmatprep.subr.bf16.mxu0 %v2275_v52 }
 0x19a   :  { %1910 = vmatpush2.bf16.msra.mxu0 %v2273_v39 }
 0x19b   :  { %1911 = vmatprep.subr.bf16.mxu0 %v2278_v13 }
 0x19e   :  { %1912 = vmatpush2.bf16.msra.mxu0 %v2276_v25 }
 0x19f   :  { %1913 = vmatprep.subr.bf16.mxu0 %v2281_v24 }
 0x1a2   :  { %1914 = vmatpush2.bf16.msra.mxu0 %v2279_v27 }
 0x1a3   :  { %1915 = vmatprep.subr.bf16.mxu0 %v2284_v33  ;;  %v2285_v33 = vld [vmem:[#allocation8 + $0xa0] ss:$8 sps:$4 sm:$0xff]  }
 0x1a6   :  { %1916 = vmatpush2.bf16.msra.mxu0 %v2282_v36  ;;  %v2288_v36 = vld [vmem:[#allocation8 + $0x90] ss:$8 sps:$4 sm:$0xff]  }
 0x218   :  { %v1147_v41 = vpop.f32.mrf.mxu1  ;;  %v1359_v43 = vpop.f32.mrf.mxu0 }
 0x219   :  { %v1229_v5 = vadd.f32 %v1228_v22, %v1147_v41 }
 0x21a   :  { %v1149_v56 = vpop.f32.mrf.mxu1  ;;  %v1361_v44 = vpop.f32.mrf.mxu0 }
 0x21b   :  { %v1231_v15 = vadd.f32 %v1230_v53, %v1149_v56  ;;  %v1378_v51 = vadd.f32 %v1359_v43, %v1229_v5  ;;  %v1459_v43 = vrot.slane %v1450_v40, %v2842_v45  ;;  %v1455_v5 = vrot.slane %v1450_v40, %v2844_v47 }
 0x21c   :  { %v1151_v35 = vpop.f32.mrf.mxu1  ;;  %v1363_v58 = vpop.f32.mrf.mxu0 }
 0x21d   :  { %v1379_v48 = vadd.f32 %v1361_v44, %v1231_v15  ;;  %v1233_v60 = vadd.f32 %v1232_v54, %v1151_v35  ;;  %v1398_v34 = vadd.f32 %v1391_v61, %v1378_v51 }
 0x21e   :  { %v1153_v62 = vpop.f32.mrf.mxu1  ;;  %v1365_v1 = vpop.f32.mrf.mxu0 }
 0x21f   :  { %v1380_v63 = vadd.f32 %v1363_v58, %v1233_v60  ;;  %v1235_v0 = vadd.f32 %v1234_v29, %v1153_v62  ;;  %v1399_v11 = vadd.f32 %v1395_v59, %v1379_v48  ;;  %v1406_v7 = vmax.f32 %v1398_v34, 0.0 }
 0x221   :  { %v1400_v32 = vadd.f32 %v1391_v61, %v1380_v63  ;;  %v1381_v55 = vadd.f32 %v1365_v1, %v1235_v0  ;;  %v1407_v50 = vmax.f32 %v1399_v11, 0.0 }
 0x223   :  { %v1401_v2 = vadd.f32 %v1395_v59, %v1381_v55  ;;  %v1408_v46 = vmax.f32 %v1400_v32, 0.0 }
 0x225   :  { %v1409_v6 = vmax.f32 %v1401_v2, 0.0  ;;  %v1414_v9 = vpack.c.bf16 %v1408_v46, %v1406_v7 }
 0x227   :  { %v1415_v8 = vpack.c.bf16 %v1409_v6, %v1407_v50 }
 0x229   :  { %1654 = vmatprep.mubr.bf16.mxu1 %v1415_v8 }
 0x22a   :  { %1655 = vmatmul.mubr.bf16.vlgmr.msra.gmra.mxu1 %v1414_v9 }
 0x249   :  { %v1157_v10 = vpop.f32.mrf.mxu1  ;;  %v1369_v14 = vpop.f32.mrf.mxu0 }
 0x24a   :  { %v1239_v49 = vadd.f32 %v1238_v30, %v1157_v10 }
 0x24b   :  { %v1159_v16 = vpop.f32.mrf.mxu1  ;;  %v1371_v17 = vpop.f32.mrf.mxu0 }
 0x24c   :  { %v1241_v19 = vadd.f32 %v1240_v18, %v1159_v16  ;;  %v1382_v37 = vadd.f32 %v1369_v14, %v1239_v49  ;;  %v2287_v18 = vld [vmem:[#allocation8 + $0xa4] ss:$8 sps:$4 sm:$0xff]   ;;  %v1719_v14 = vld [vmem:[%s2873_s9] sm:$0x3]  ;;  %s2431_s9 = smov [#allocation10]  }
 0x24d   :  { %v1161_v57 = vpop.f32.mrf.mxu1  ;;  %v1373_v3 = vpop.f32.mrf.mxu0  ;;  %1917 = vmatprep.subr.bf16.mxu0 %v2287_v18  ;;  %v1724_v49 = vrot.slane %v1719_v14, %v2844_v47  ;;  %v1728_v16 = vrot.slane %v1719_v14, %v2842_v45  ;;  %s1957_s3 = sshll.u32 %s2431_s9, 4  ;;  %s1958_s3 = int_to_ptr.vmem [resolvable:$true] %s1957_s3 }
 0x24e   :  { %v1383_v20 = vadd.f32 %v1371_v17, %v1241_v19  ;;  %v1243_v31 = vadd.f32 %v1242_v26, %v1161_v57  ;;  %v1402_v39 = vadd.f32 %v1391_v61, %v1382_v37  ;;  %1918 = vmatpush2.bf16.msra.mxu0 %v2285_v33  ;;  %v2290_v26 = vld [vmem:[#allocation8 + $0x94] ss:$8 sps:$4 sm:$0xff]   ;;  %s2390_s11 = scalar_lea.vmem %s1958_s3, 1024  ;;  %p2395_p7 = scmp.lt.s32.totalorder %s1958_s3, %s1958_s3 }
 0x24f   :  { %v1163_v21 = vpop.f32.mrf.mxu1  ;;  %v1375_v22 = vpop.f32.mrf.mxu0  ;;  %1919 = vmatprep.subr.bf16.mxu0 %v2290_v26  ;;  %p2391_p6 = scmp.ne.s32.totalorder %s1958_s3, %s2390_s11  ;;  %p2396_p8 = scmp.lt.s32.totalorder %s2390_s11, %s2390_s11 }
 0x250   :  { %v1384_v4 = vadd.f32 %v1373_v3, %v1243_v31  ;;  %v1245_v12 = vadd.f32 %v1244_v28, %v1163_v21  ;;  %v1403_v23 = vadd.f32 %v1395_v59, %v1383_v20  ;;  %v1410_v29 = vmax.f32 %v1402_v39, 0.0  ;;  %v2291_v28 = vld [vmem:[#allocation8 + $0x80] ss:$8 sps:$4 sm:$0xff]  }
 0x251   :  { %p2397_p9 = por %p2396_p8, %p2395_p7 }
 0x252   :  { %v1404_v52 = vadd.f32 %v1391_v61, %v1384_v4  ;;  %v1385_v53 = vadd.f32 %v1375_v22, %v1245_v12  ;;  %v1411_v25 = vmax.f32 %v1403_v23, 0.0  ;;  %1920 = vmatpush2.bf16.msra.mxu0 %v2288_v36 }
 0x253   :  { %1921 = vmatprep.subr.bf16.mxu0 %v2293_v38  ;;  %p2398_p10 = pnand %p2397_p9, %p2391_p6 }
 0x254   :  { %v1405_v13 = vadd.f32 %v1395_v59, %v1385_v53  ;;  %v1412_v54 = vmax.f32 %v1404_v52, 0.0 }
 0x256   :  { %v1413_v24 = vmax.f32 %v1405_v13, 0.0  ;;  %v1416_v27 = vpack.c.bf16 %v1412_v54, %v1410_v29  ;;  %1922 = vmatpush2.bf16.msra.mxu0 %v2291_v28 }
 0x258   :  { %v1417_v30 = vpack.c.bf16 %v1413_v24, %v1411_v25 }
 0x25a   :  { %1664 = vmatprep.mubr.bf16.mxu1 %v1417_v30 }
 0x25b   :  { %1665 = vmatmul.mubr.bf16.gmra.mxu1 %v1416_v27 }
 0x2ea   :  { %v1656_v41 = vpop.f32.mrf.mxu1 }
 0x2eb   :  { %v1657_v35 = vadd.f32 %v1656_v41, %v1455_v5 }
 0x2ec   :  { %v1658_v56 = vpop.f32.mrf.mxu1 }
 0x2ed   :  { %v1659_v42 = vadd.f32 %v1658_v56, %v1459_v43  ;;  %v1675_v61 = vmax.f32 %v1657_v35, 0.0 }
 0x2ee   :  { %v1660_v44 = vpop.f32.mrf.mxu1 }
 0x2ef   :  { %v1661_v15 = vadd.f32 %v1660_v44, %v1455_v5  ;;  %v1676_v60 = vmax.f32 %v1659_v42, 0.0 }
 0x2f0   :  { %v1662_v58 = vpop.f32.mrf.mxu1 }
 0x2f1   :  { %v1663_v48 = vadd.f32 %v1662_v58, %v1459_v43  ;;  %v1677_v59 = vmax.f32 %v1661_v15, 0.0 }
 0x2f3   :  { %v1678_v51 = vmax.f32 %v1663_v48, 0.0  ;;  %v1683_v63 = vpack.c.bf16 %v1677_v59, %v1675_v61 }
 0x2f5   :  { %v1684_v62 = vpack.c.bf16 %v1678_v51, %v1676_v60 }
 0x2f7   :  { %1923 = vmatprep.mubr.bf16.mxu0 %v1684_v62 }
 0x2f8   :  { %1924 = vmatmul.mubr.bf16.vlgmr.msra.gmra.mxu0 %v1683_v63 }
 0x31b   :  { %v1666_v0 = vpop.f32.mrf.mxu1 }
 0x31c   :  { %v1667_v34 = vadd.f32 %v1666_v0, %v1455_v5 }
 0x31d   :  { %v1668_v1 = vpop.f32.mrf.mxu1 }
 0x31e   :  { %v1669_v32 = vadd.f32 %v1668_v1, %v1459_v43  ;;  %v1679_v8 = vmax.f32 %v1667_v34, 0.0 }
 0x31f   :  { %v1670_v11 = vpop.f32.mrf.mxu1 }
 0x320   :  { %v1671_v55 = vadd.f32 %v1670_v11, %v1455_v5  ;;  %v1680_v6 = vmax.f32 %v1669_v32, 0.0 }
 0x321   :  { %v1672_v2 = vpop.f32.mrf.mxu1 }
 0x322   :  { %v1673_v46 = vadd.f32 %v1672_v2, %v1459_v43  ;;  %v1681_v50 = vmax.f32 %v1671_v55, 0.0 }
 0x324   :  { %v1682_v7 = vmax.f32 %v1673_v46, 0.0  ;;  %v1685_v10 = vpack.c.bf16 %v1681_v50, %v1679_v8 }
 0x326   :  { %v1686_v9 = vpack.c.bf16 %v1682_v7, %v1680_v6 }
 0x328   :  { %1933 = vmatprep.mubr.bf16.mxu0 %v1686_v9 }
 0x329   :  { %1934 = vmatmul.mubr.bf16.gmra.mxu0 %v1685_v10 }
 0x3b8   :  { %v1925_v17 = vpop.f32.mrf.mxu0 }
 0x3b9   :  { %v1926_v19 = vadd.f32 %v1925_v17, %v1724_v49 }
 0x3ba   :  { %v1927_v57 = vpop.f32.mrf.mxu0 }
 0x3bb   :  { %1944 = vst [vmem:[#allocation10] sm:$0xff] %v1926_v19  ;;  %v1928_v3 = vadd.f32 %v1927_v57, %v1728_v16 }
 0x3bc   :  { %v1929_v20 = vpop.f32.mrf.mxu0 }
 0x3bd   :  { %1945 = vst [vmem:[#allocation10 + $0x8] sm:$0xff] %v1928_v3  ;;  %v1930_v31 = vadd.f32 %v1929_v20, %v1724_v49 }
 0x3be   :  { %v1931_v37 = vpop.f32.mrf.mxu0 }
 0x3bf   :  { %1946 = vst [vmem:[#allocation10 + $0x10] sm:$0xff] %v1930_v31  ;;  %v1932_v21 = vadd.f32 %v1931_v37, %v1728_v16 }
 0x3c1   :  { %1947 = vst [vmem:[#allocation10 + $0x18] sm:$0xff] %v1932_v21 }
 0x3e9   :  { %v1935_v4 = vpop.f32.mrf.mxu0 }
 0x3ea   :  { %v1936_v12 = vadd.f32 %v1935_v4, %v1724_v49 }
 0x3eb   :  { %v1937_v22 = vpop.f32.mrf.mxu0 }
 0x3ec   :  { %1948 = vst [vmem:[#allocation10 + $0x20] sm:$0xff] %v1936_v12  ;;  %v1938_v23 = vadd.f32 %v1937_v22, %v1728_v16 }
 0x3ed   :  { %v1939_v47 = vpop.f32.mrf.mxu0 }
 0x3ee   :  { %1949 = vst [vmem:[#allocation10 + $0x28] sm:$0xff] %v1938_v23  ;;  %v1940_v45 = vadd.f32 %v1939_v47, %v1724_v49 }
 0x3ef   :  { %v1941_v52 = vpop.f32.mrf.mxu0 }
 0x3f0   :  { %1950 = vst [vmem:[#allocation10 + $0x30] sm:$0xff] %v1940_v45  ;;  %v1942_v53 = vadd.f32 %v1941_v52, %v1728_v16 }
 0x3f2   :  { %1951 = vst [vmem:[#allocation10 + $0x38] sm:$0xff] %v1942_v53 }
 0x3f3   :  { %2401 = shalt.err (!%p2398_p10)
}
 0x3f4   :  { %s2432_s12 = smov 256   ;;  %s2433_s6 = smov 16  }
 0x3f5   :  { %1963 = dma.vmem_to_hbm [thread:$0]  %s1958_s3, 1024, %s2874_s10, [#allocation4], %s2432_s12, %s2432_s12, %s2433_s6  }
 0x3f6   :  { %2416 = dma.done.wait [#allocation4], 1024  }
 0x3f7   :  { %2417 = vsyncadd [#allocation4], 4294966272 }
 0x3f8   :  { %1967 = vsyncpa [#allocation3], 1 }
 0x3f9   :  { %1968 = vsyncpa [#allocation6], 1 }
 0x3fa   :  { %1969 = vsyncpa [#allocation9], 1 }
 0x3fb   :  { %1970 = vsyncpa [#allocation4], 1 }

// kernel: tpu_custom_call.1
= control target key start
LH: loop header
LB: loop body
LE: loop exit
PB: predicated region body
PF: predicated region fallthrough
CT: control target
= control target key end

     0   :  { %15 = vsyncpa [#allocation3], 0  ;;  %s2864_s0 = inlined_call_operand.vmem [shape: f32[32,24], index: 0, kind: input, shape index: {}]   ;;  %s2865_s1 = inlined_call_operand.vmem [shape: f32[24,96], index: 1, kind: input, shape index: {}]   ;;  %s2866_s2 = inlined_call_operand.vmem [shape: bf16[24,256], index: 2, kind: input, shape index: {}]   ;;  %s2867_s3 = inlined_call_operand.hbm [shape: bf16[96,256], index: 3, kind: input, shape index: {}]   ;;  %s2868_s4 = inlined_call_operand.hbm [shape: bf16[96,256], index: 4, kind: input, shape index: {}]   ;;  %s2869_s5 = inlined_call_operand.vmem [shape: f32[1,256], index: 5, kind: input, shape index: {}]   ;;  %s2870_s6 = inlined_call_operand.hbm [shape: bf16[256,256], index: 6, kind: input, shape index: {}]   ;;  %s2871_s7 = inlined_call_operand.vmem [shape: f32[1,256], index: 7, kind: input, shape index: {}]   ;;  %s2872_s8 = inlined_call_operand.hbm [shape: bf16[256,256], index: 8, kind: input, shape index: {}]   ;;  %s2873_s9 = inlined_call_operand.vmem [shape: f32[1,256], index: 9, kind: input, shape index: {}]   ;;  %s2874_s10 = inlined_call_operand.hbm [shape: f32[32,256], index: 10, kind: output, shape index: {}]  }
   0x1   :  { %16 = vsyncpa [#allocation6], 0 }
   0x2   :  { %17 = vsyncpa [#allocation9], 0 }
   0x3   :  { %18 = vsyncpa [#allocation4], 0  ;;  %s2418_s13 = smov [#allocation5]   ;;  %s2419_s15 = smov [#allocation2]  }
   0x4   :  { %s42_s14 = sshll.u32 %s2418_s13, 4  ;;  %s30_s16 = sshll.u32 %s2419_s15, 4  ;;  %s43_s14 = int_to_ptr.vmem [resolvable:$true] %s42_s14  ;;  %s31_s16 = int_to_ptr.vmem [resolvable:$true] %s30_s16 }
   0x5   :  { %s2318_s17 = scalar_lea.vmem %s43_s14, 1536  ;;  %p2323_p1 = scmp.lt.s32.totalorder %s43_s14, %s43_s14 }
   0x6   :  { %p2319_p0 = scmp.ne.s32.totalorder %s43_s14, %s2318_s17  ;;  %p2324_p2 = scmp.lt.s32.totalorder %s2318_s17, %s2318_s17 }
   0x8   :  { %p2325_p3 = por %p2324_p2, %p2323_p1 }
   0xa   :  { %p2326_p4 = pnand %p2325_p3, %p2319_p0 }
   0xc   :  { %2329 = shalt.err (!%p2326_p4)
}
   0xd   :  { %s2420_s18 = smov 128   ;;  %s2421_s19 = smov 8  }
   0xe   :  { %48 = dma.hbm_to_vmem [thread:$0]  %s2868_s4, 1536, %s43_s14, [#allocation6], %s2420_s18, %s2420_s18, %s2421_s19  }
   0xf   :  { %s2338_s22 = scalar_lea.vmem %s31_s16, 1536  ;;  %p2343_p6 = scmp.lt.s32.totalorder %s31_s16, %s31_s16 }
  0x10   :  { %p2339_p5 = scmp.ne.s32.totalorder %s31_s16, %s2338_s22  ;;  %p2344_p7 = scmp.lt.s32.totalorder %s2338_s22, %s2338_s22 }
  0x12   :  { %p2345_p8 = por %p2344_p7, %p2343_p6 }
  0x14   :  { %p2346_p9 = pnand %p2345_p8, %p2339_p5 }
  0x16   :  { %2349 = shalt.err (!%p2346_p9)
}
  0x17   :  { %36 = dma.hbm_to_vmem [thread:$0]  %s2867_s3, 1536, %s31_s16, [#allocation3], %s2420_s18, %s2420_s18, %s2421_s19  }
  0x18   :  { %s2422_s25 = smov [#allocation7]   ;;  %s2423_s27 = smov [#allocation8]  }
  0x19   :  { %s56_s26 = sshll.u32 %s2422_s25, 4  ;;  %s70_s28 = sshll.u32 %s2423_s27, 4  ;;  %s57_s26 = int_to_ptr.vmem [resolvable:$true] %s56_s26  ;;  %s71_s28 = int_to_ptr.vmem [resolvable:$true] %s70_s28 }
  0x1a   :  { %s2358_s4 = scalar_lea.vmem %s57_s26, 4096  ;;  %p2363_p11 = scmp.lt.s32.totalorder %s57_s26, %s57_s26 }
  0x1b   :  { %p2359_p10 = scmp.ne.s32.totalorder %s57_s26, %s2358_s4  ;;  %p2364_p12 = scmp.lt.s32.totalorder %s2358_s4, %s2358_s4 }
  0x1d   :  { %p2365_p13 = por %p2364_p12, %p2363_p11 }
  0x1f   :  { %p2366_p0 = pnand %p2365_p13, %p2359_p10 }
  0x21   :  { %2369 = shalt.err (!%p2366_p0)
}
  0x22   :  { %62 = dma.hbm_to_vmem [thread:$0]  %s2870_s6, 4096, %s57_s26, [#allocation6], %s2420_s18, %s2420_s18, %s2421_s19  }
  0x23   :  { %s2378_s3 = scalar_lea.vmem %s71_s28, 4096  ;;  %p2383_p2 = scmp.lt.s32.totalorder %s71_s28, %s71_s28 }
  0x24   :  { %p2379_p1 = scmp.ne.s32.totalorder %s71_s28, %s2378_s3  ;;  %p2384_p3 = scmp.lt.s32.totalorder %s2378_s3, %s2378_s3 }
  0x26   :  { %p2385_p4 = por %p2384_p3, %p2383_p2 }
  0x28   :  { %p2386_p5 = pnand %p2385_p4, %p2379_p1 }
  0x2a   :  { %2389 = shalt.err (!%p2386_p5)
}
  0x2b   :  { %76 = dma.hbm_to_vmem [thread:$0]  %s2872_s8, 4096, %s71_s28, [#allocation9], %s2420_s18, %s2420_s18, %s2421_s19  }
  0x2c   :  { %2410 = dma.done.wait [#allocation3], 1536  }
  0x2d   :  { %2411 = vsyncadd [#allocation3], 4294965760 }
  0x2e   :  { %2412 = dma.done.wait [#allocation6], 5632  }
  0x2f   :  { %2413 = vsyncadd [#allocation6], 4294961664 }
  0x30   :  { %2414 = dma.done.wait [#allocation9], 4096  }
  0x31   :  { %2415 = vsyncadd [#allocation9], 4294963200  ;;  %vm99_vm0 = vcmask 195584   ;;  %v98_v0 = vld [vmem:[%s2865_s1 + $0x10] sm:$0xff]  ;;  %v97_v1 = vld [vmem:[%s2865_s1 + $0x8] sm:$0xff]  ;;  %vm1187_vm1 = vcmask 1043456  }
  0x32   :  { %v96_v2 = vld [vmem:[%s2865_s1] sm:$0xff]  ;;  %2113 = vmatprep.subr.mxu1 %v98_v0  ;;  %v93_v4 = vld [vmem:[%s2864_s0 + $0x8] sm:$0xff]  ;;  %v94_v5 = vld [vmem:[%s2864_s0 + $0x10] sm:$0xff]  ;;  %v2424_v15 = vmov 0   ;;  %v2425_v55 = vmov 683565275  }
  0x33   :  { %v92_v3 = vld [vmem:[%s2864_s0] sm:$0xff]  ;;  %2114 = vmatpush3.msra.mxu1 %v98_v0  ;;  %v95_v7 = vld [vmem:[%s2864_s0 + $0x18] sm:$0xff]  ;;  %v1033_v9 = vld [vmem:[%s2866_s2 + $0x10] sm:$0xff]  ;;  %1226 = vmatprep.mubr.bf16.mxu0 %v2424_v15  ;;  %v2426_v57 = vmov 2475754826  }
  0x34   :  { %2119 = vmatprep.mubr.msk.f32.mxu1 %vm99_vm0, %v92_v3  ;;  %v1029_v6 = vpack.c.bf16 %v93_v4, %v92_v3  ;;  %2115 = vmatprep.subr.mxu1 %v97_v1  ;;  %v1030_v8 = vpack.c.bf16 %v95_v7, %v94_v5  ;;  %v2024_v10 = vcombine.high %v1033_v9, %v1033_v9  ;;  %v2159_v13 = vld [vmem:[%s2866_s2 + $0x4] ss:$8 sps:$4 sm:$0xff]   ;;  %v2161_v14 = vld [vmem:[%s2866_s2] ss:$8 sps:$4 sm:$0xff]   ;;  %v2164_v16 = vld [vmem:[#allocation2 + $0x54] ss:$8 sps:$4 sm:$0xff]  }
  0x35   :  { %2116 = vmatpush3.msra.mxu1 %v97_v1  ;;  %v2023_v11 = vcombine.low %v1033_v9, %v1033_v9  ;;  %v2167_v17 = vld [vmem:[#allocation5 + $0x54] ss:$8 sps:$4 sm:$0xff]   ;;  %v2162_v18 = vld [vmem:[#allocation2 + $0x50] ss:$8 sps:$4 sm:$0xff]   ;;  %v2170_v20 = vld [vmem:[#allocation2 + $0x44] ss:$8 sps:$4 sm:$0xff]  }
  0x36   :  { %2117 = vmatprep.subr.mxu1 %v96_v2  ;;  %2025 = vmatprep.subr.msk.bf16.mxu0 %vm1187_vm1, %v2024_v10  ;;  %v2165_v19 = vld [vmem:[#allocation5 + $0x50] ss:$8 sps:$4 sm:$0xff]   ;;  %v2173_v21 = vld [vmem:[#allocation5 + $0x44] ss:$8 sps:$4 sm:$0xff]   ;;  %v2168_v22 = vld [vmem:[#allocation2 + $0x40] ss:$8 sps:$4 sm:$0xff]  }
  0x37   :  { %2118 = vmatpush3.msra.mxu1 %v96_v2  ;;  %v1189_v12 = vsel %vm1187_vm1, %v2023_v11, 0  ;;  %v2171_v23 = vld [vmem:[#allocation5 + $0x40] ss:$8 sps:$4 sm:$0xff]   ;;  %v2176_v28 = vld [vmem:[#allocation2 + $0x34] ss:$8 sps:$4 sm:$0xff]  }
  0x38   :  { %2120 = vmatmul.mubr.msk.f32.vlgmr.msra.gmra.mxu1 %vm99_vm0, %v93_v4  ;;  %1207 = vmatpush1.bf16.msra.mxu0 %v1189_v12  ;;  %v2179_v29 = vld [vmem:[#allocation5 + $0x34] ss:$8 sps:$4 sm:$0xff]   ;;  %v2174_v35 = vld [vmem:[#allocation2 + $0x30] ss:$8 sps:$4 sm:$0xff]   ;;  %v2180_v53 = vld [vmem:[#allocation2 + $0x20] ss:$8 sps:$4 sm:$0xff]  }
  0x39   :  { %2122 = vmatprep.mubr.msk.f32.mxu1 %vm99_vm0, %v94_v5  ;;  %1208 = vmatprep.subr.bf16.mxu0 %v2159_v13  ;;  %v2177_v45 = vld [vmem:[#allocation5 + $0x30] ss:$8 sps:$4 sm:$0xff]   ;;  %v2182_v59 = vld [vmem:[#allocation2 + $0x24] ss:$8 sps:$4 sm:$0xff]   ;;  %v2183_v60 = vld [vmem:[#allocation5 + $0x20] ss:$8 sps:$4 sm:$0xff]  }
  0x3a   :  { %1117 = vmatprep.subr.bf16.mxu1 %v2164_v16  ;;  %v2427_v61 = vmov 2131351028   ;;  %v2428_v63 = vmov 2102212464   ;;  %v2429_v1 = vmov 920167782  }
  0x3b   :  { %1118 = vmatpush1.bf16.msra.mxu1 %v2162_v18  ;;  %v2185_v3 = vld [vmem:[#allocation5 + $0x24] ss:$8 sps:$4 sm:$0xff]   ;;  %v2430_v11 = vmov 1326507024   ;;  %v2186_v13 = vld [vmem:[#allocation2 + $0x10] ss:$8 sps:$4 sm:$0xff]  }
  0x3c   :  { %2123 = vmatmul.mubr.msk.f32.gmra.mxu1 %vm99_vm0, %v95_v7  ;;  %1209 = vmatpush1.bf16.msra.mxu0 %v2161_v14  ;;  %v2188_v7 = vld [vmem:[#allocation2 + $0x14] ss:$8 sps:$4 sm:$0xff]  }
  0x3d   :  { %1145 = vmatprep.mubr.bf16.mxu1 %v2424_v15  ;;  %1329 = vmatprep.subr.bf16.mxu0 %v2167_v17 }
  0x3e   :  { %1119 = vmatprep.subr.bf16.mxu1 %v2170_v20 }
  0x3f   :  { %2026 = vmatmul.mubr.msk.bf16.vlgmr.msra.gmra.mxu0 %vm99_vm0, %v1029_v6  ;;  %1120 = vmatpush1.bf16.msra.mxu1 %v2168_v22 }
  0x40   :  { %1236 = vmatprep.mubr.bf16.mxu0 %v2424_v15  ;;  %1330 = vmatpush1.bf16.msra.mxu0 %v2165_v19  ;;  %v2189_v19 = vld [vmem:[#allocation5 + $0x10] ss:$8 sps:$4 sm:$0xff]  }
  0x41   :  { %1331 = vmatprep.subr.bf16.mxu0 %v2173_v21  ;;  %1121 = vmatprep.subr.bf16.mxu1 %v2176_v28 }
  0x43   :  { %1122 = vmatpush1.bf16.msra.mxu1 %v2174_v35 }
  0x44   :  { %1332 = vmatpush1.bf16.msra.mxu0 %v2171_v23  ;;  %1123 = vmatprep.subr.bf16.mxu1 %v2182_v59  ;;  %v2194_v23 = vld [vmem:[#allocation2 + $0x4] ss:$8 sps:$4 sm:$0xff]  }
  0x45   :  { %1333 = vmatprep.subr.bf16.mxu0 %v2179_v29 }
  0x47   :  { %2027 = vmatmul.mubr.msk.bf16.gmra.mxu0 %vm99_vm0, %v1030_v8  ;;  %v2191_v8 = vld [vmem:[#allocation5 + $0x14] ss:$8 sps:$4 sm:$0xff]   ;;  %1124 = vmatpush1.bf16.msra.mxu1 %v2180_v53 }
  0x48   :  { %1357 = vmatprep.mubr.bf16.mxu0 %v2424_v15  ;;  %1334 = vmatpush1.bf16.msra.mxu0 %v2177_v45 }
  0x49   :  { %1335 = vmatprep.subr.bf16.mxu0 %v2185_v3  ;;  %1125 = vmatprep.subr.bf16.mxu1 %v2188_v7 }
  0x4b   :  { %1126 = vmatpush1.bf16.msra.mxu1 %v2186_v13 }
  0x4c   :  { %1336 = vmatpush1.bf16.msra.mxu0 %v2183_v60  ;;  %1127 = vmatprep.subr.bf16.mxu1 %v2194_v23  ;;  %v2200_v60 = vld [vmem:[#allocation7 + $0x74] ss:$8 sps:$4 sm:$0xff]  }
  0x4d   :  { %1337 = vmatprep.subr.bf16.mxu0 %v2191_v8 }
  0x50   :  { %1338 = vmatpush1.bf16.msra.mxu0 %v2189_v19 }
  0xf8   :  { %v2551_v24 = vpop.f32.mrf.mxu1 }
  0xf9   :  { %v301_v25 = vand.u32 2147483647, %v2551_v24  ;;  %v304_v26 = vand.u32 2139095040, %v2551_v24 }
  0xfa   :  { %v2555_v27 = vpop.f32.mrf.mxu1 }
  0xfb   :  { %v305_v30 = vshrl.u32 %v304_v26, 23  ;;  %v308_v31 = vand.u32 8388607, %v301_v25  ;;  %v197_v32 = vand.u32 2147483647, %v2555_v27  ;;  %v200_v33 = vand.u32 2139095040, %v2555_v27 }
  0xfc   :  { %v2563_v34 = vpop.f32.mrf.mxu1 }
  0xfd   :  { %v1979_v36 = vadd.s32 4294967169, %v305_v30  ;;  %v201_v37 = vshrl.u32 %v200_v33, 23  ;;  %v204_v38 = vand.u32 8388607, %v197_v32  ;;  %v512_v39 = vand.u32 2139095040, %v2563_v34 }
  0xfe   :  { %v309_v41 = vor.u32 8388608, %v308_v31  ;;  %v2192_v31 = vld [vmem:[#allocation2] ss:$8 sps:$4 sm:$0xff]   ;;  %v2197_v33 = vld [vmem:[#allocation5 + $0x4] ss:$8 sps:$4 sm:$0xff]  }
  0xff   :  { %v311_v40 = vadd.s32 1, %v1979_v36  ;;  %v1975_v42 = vadd.s32 4294967169, %v201_v37  ;;  %v205_v43 = vor.u32 8388608, %v204_v38  ;;  %v513_v44 = vshrl.u32 %v512_v39, 23  ;;  %1339 = vmatprep.subr.bf16.mxu0 %v2197_v33  ;;  %1128 = vmatpush1.bf16.msra.mxu1 %v2192_v31 }
 0x100   :  { %v2570_v50 = vshll.u32 %v309_v41, 8  ;;  %1622 = vmatprep.subr.bf16.mxu1 %v2200_v60 }
 0x101   :  { %vm312_vm2 = vcmp.gt.s32.totalorder %v311_v40, 0  ;;  %v207_v47 = vadd.s32 1, %v1975_v42  ;;  %v2572_v51 = vshll.u32 %v205_v43, 8  ;;  %v1987_v52 = vadd.s32 4294967169, %v513_v44  ;;  %v2195_v43 = vld [vmem:[#allocation5] ss:$8 sps:$4 sm:$0xff]  }
 0x102   :  { %v313_v46 = vsel %vm312_vm2, %v311_v40, 0  ;;  %1340 = vmatpush1.bf16.msra.mxu0 %v2195_v43  ;;  %vm303_vm2 = vcmp.lt.s32.totalorder %v2551_v24, 0 }
 0x103   :  { %v2568_v48 = vshrl.u32 %v313_v46, 5  ;;  %v315_v49 = vand.u32 31, %v313_v46  ;;  %vm208_vm3 = vcmp.gt.s32.totalorder %v207_v47, 0  ;;  %v519_v42 = vadd.s32 1, %v1987_v52 }
 0x104   :  { %v209_v18 = vsel %vm208_vm3, %v207_v47, 0 }
 0x105   :  { %v316_v54 = vsub.s32 32, %v315_v49  ;;  %v318_v56 = vshll.u32 %v2425_v55, %v315_v49  ;;  %v321_v58 = vshll.u32 %v2426_v57, %v315_v49  ;;  %v324_v62 = vshll.u32 %v2427_v61, %v315_v49 }
 0x106   :  { %v327_v0 = vshll.u32 %v2428_v63, %v315_v49  ;;  %v330_v2 = vshll.u32 %v2429_v1, %v315_v49  ;;  %vm333_vm4 = vcmp.lt.s32.totalorder %v2568_v48, 1  ;;  %vm334_vm5 = vcmp.lt.s32.totalorder %v2568_v48, 2 }
 0x107   :  { %v319_v4 = vshrl.u32 %v2426_v57, %v316_v54  ;;  %v322_v5 = vshrl.u32 %v2427_v61, %v316_v54  ;;  %v325_v6 = vshrl.u32 %v2428_v63, %v316_v54  ;;  %v317_v9 = vshrl.u32 %v2425_v55, %v316_v54 }
 0x108   :  { %v328_v10 = vshrl.u32 %v2429_v1, %v316_v54  ;;  %v331_v12 = vshrl.u32 %v2430_v11, %v316_v54  ;;  %vm335_vm6 = vcmp.lt.s32.totalorder %v2568_v48, 3  ;;  %vm336_vm7 = vcmp.lt.s32.totalorder %v2568_v48, 4 }
 0x109   :  { %v320_v14 = vor.u32 %v319_v4, %v318_v56  ;;  %v323_v16 = vor.u32 %v322_v5, %v321_v58  ;;  %v326_v17 = vor.u32 %v325_v6, %v324_v62  ;;  %v211_v22 = vand.u32 31, %v209_v18 }
 0x10a   :  { %v329_v20 = vor.u32 %v328_v10, %v327_v0  ;;  %v332_v21 = vor.u32 %v331_v12, %v330_v2  ;;  %v210_v46 = vshrl.u32 %v209_v18, 5  ;;  %vm520_vm13 = vcmp.gt.s32.totalorder %v519_v42, 0 }
 0x10b   :  { %v337_v26 = vsel %vm333_vm4, %v317_v9, %v320_v14  ;;  %v338_v28 = vsel %vm336_vm7, %v326_v17, 2102212464  ;;  %v341_v29 = vsel %vm333_vm4, %v320_v14, %v323_v16  ;;  %v345_v30 = vsel %vm333_vm4, %v323_v16, %v326_v17 }
 0x10c   :  { %v339_v35 = vsel %vm335_vm6, %v323_v16, %v338_v28  ;;  %v342_v36 = vsel %vm336_vm7, %v329_v20, 920167782  ;;  %v346_v37 = vsel %vm336_vm7, %v332_v21, 1326507024  ;;  %v212_v38 = vsub.s32 32, %v211_v22 }
 0x10d   :  { %v340_v39 = vsel %vm334_vm5, %v337_v26, %v339_v35  ;;  %v343_v40 = vsel %vm335_vm6, %v326_v17, %v342_v36  ;;  %v347_v41 = vsel %vm335_vm6, %v329_v20, %v346_v37  ;;  %v214_v47 = vshll.u32 %v2425_v55, %v211_v22 }
 0x10e   :  { %v344_v44 = vsel %vm334_vm5, %v341_v29, %v343_v40  ;;  %v348_v45 = vsel %vm334_vm5, %v345_v30, %v347_v41  ;;  %v356_v52 = vmul.u32 %v2570_v50, %v340_v39  ;;  %v215_v58 = vshrl.u32 %v2426_v57, %v212_v38 }
 0x10f   :  { %v2610_v49 = vmul.u32.u64.low %v2570_v50, %v348_v45  ;;  %v2611_v53 = vmul.u32.u64.high %v2570_v50, %v348_v45, %v2610_v49  ;;  %v2614_v54 = vmul.u32.u64.low %v2570_v50, %v344_v44  ;;  %v2615_v56 = vmul.u32.u64.high %v2570_v50, %v344_v44, %v2614_v54 }
 0x110   :  { %v217_v48 = vshll.u32 %v2426_v57, %v211_v22  ;;  %v218_v59 = vshrl.u32 %v2427_v61, %v212_v38  ;;  %v220_v62 = vshll.u32 %v2427_v61, %v211_v22  ;;  %v221_v0 = vshrl.u32 %v2428_v63, %v212_v38 }
 0x111   :  { %v223_v2 = vshll.u32 %v2428_v63, %v211_v22  ;;  %v224_v3 = vshrl.u32 %v2429_v1, %v212_v38  ;;  %v216_v4 = vor.u32 %v215_v58, %v214_v47  ;;  %v226_v50 = vshll.u32 %v2429_v1, %v211_v22 }
 0x112   :  { %v219_v5 = vor.u32 %v218_v59, %v217_v48  ;;  %v227_v6 = vshrl.u32 %v2430_v11, %v212_v38  ;;  %vm358_vm8 = vc.u32 %v2611_v53, %v2614_v54  ;;  %v359_v7 = vadd.s32 1, %v2615_v56 }
 0x113   :  { %v213_v8 = vshrl.u32 %v2425_v55, %v212_v38  ;;  %v222_v9 = vor.u32 %v221_v0, %v220_v62  ;;  %v225_v10 = vor.u32 %v224_v3, %v223_v2  ;;  %vm229_vm9 = vcmp.lt.s32.totalorder %v210_v46, 1  ;;  %v2660_v2 = vpop.f32.mrf.mxu1 }
 0x114   :  { %v228_v12 = vor.u32 %v227_v6, %v226_v50  ;;  %vm230_vm10 = vcmp.lt.s32.totalorder %v210_v46, 2  ;;  %v360_v13 = vsel %vm358_vm8, %v359_v7, %v2615_v56  ;;  %vm231_vm11 = vcmp.lt.s32.totalorder %v210_v46, 3 }
 0x115   :  { %vm232_vm12 = vcmp.lt.s32.totalorder %v210_v46, 4  ;;  %v237_v14 = vsel %vm229_vm9, %v216_v4, %v219_v5  ;;  %v361_v16 = vadd.s32 %v360_v13, %v356_v52  ;;  %v241_v19 = vsel %vm229_vm9, %v219_v5, %v222_v9 }
 0x116   :  { %v234_v17 = vsel %vm232_vm12, %v222_v9, 2102212464  ;;  %v238_v18 = vsel %vm232_vm12, %v225_v10, 920167782  ;;  %v233_v20 = vsel %vm229_vm9, %v213_v8, %v216_v4  ;;  %v242_v22 = vsel %vm232_vm12, %v228_v12, 1326507024 }
 0x117   :  { %v239_v21 = vsel %vm231_vm11, %v222_v9, %v238_v18  ;;  %v362_v23 = vadd.s32 536870912, %v361_v16  ;;  %v235_v26 = vsel %vm231_vm11, %v219_v5, %v234_v17  ;;  %v243_v29 = vsel %vm231_vm11, %v225_v10, %v242_v22 }
 0x118   :  { %v240_v28 = vsel %vm230_vm10, %v237_v14, %v239_v21  ;;  %v244_v30 = vsel %vm230_vm10, %v241_v19, %v243_v29  ;;  %v521_v38 = vsel %vm520_vm13, %v519_v42, 0  ;;  %v236_v39 = vsel %vm230_vm10, %v233_v20, %v235_v26 }
 0x119   :  { %v2636_v31 = vmul.u32.u64.low %v2572_v51, %v240_v28  ;;  %v2637_v33 = vmul.u32.u64.high %v2572_v51, %v240_v28, %v2636_v31  ;;  %v2640_v35 = vshrl.u32 %v362_v23, 30  ;;  %v523_v41 = vand.u32 31, %v521_v38 }
 0x11a   :  { %v2643_v36 = vmul.u32.u64.low %v2572_v51, %v244_v30  ;;  %v2644_v37 = vmul.u32.u64.high %v2572_v51, %v244_v30, %v2643_v36  ;;  %v252_v45 = vmul.u32 %v2572_v51, %v236_v39  ;;  %v509_v49 = vand.u32 2147483647, %v2563_v34 }
 0x11b   :  { %v364_v40 = vshll.u32 %v2640_v35, 30  ;;  %v255_v43 = vadd.s32 1, %v2637_v33  ;;  %v524_v42 = vsub.s32 32, %v523_v41  ;;  %v526_v59 = vshll.u32 %v2425_v55, %v523_v41 }
 0x11c   :  { %vm254_vm14 = vc.u32 %v2644_v37, %v2636_v31  ;;  %v516_v48 = vand.u32 8388607, %v509_v49  ;;  %v532_v62 = vshll.u32 %v2427_v61, %v523_v41  ;;  %v529_v4 = vshll.u32 %v2426_v57, %v523_v41 }
 0x11d   :  { %v365_v44 = vsub.s32 %v361_v16, %v364_v40  ;;  %v256_v47 = vsel %vm254_vm14, %v255_v43, %v2637_v33  ;;  %v527_v51 = vshrl.u32 %v2426_v57, %v524_v42  ;;  %v533_v0 = vshrl.u32 %v2428_v63, %v524_v42 }
 0x11e   :  { %v257_v52 = vadd.s32 %v256_v47, %v252_v45  ;;  %v530_v50 = vshrl.u32 %v2427_v61, %v524_v42  ;;  %v535_v6 = vshll.u32 %v2428_v63, %v523_v41  ;;  %v536_v7 = vshrl.u32 %v2429_v1, %v524_v42 }
 0x11f   :  { %v367_v56 = vsub.s32 0, %v365_v44  ;;  %v357_v8 = vadd.s32 %v2614_v54, %v2611_v53  ;;  %v517_v10 = vor.u32 8388608, %v516_v48  ;;  %v408_v12 = vand.u32 2139095040, %v2660_v2 }
 0x120   :  { %v258_v58 = vadd.s32 536870912, %v257_v52  ;;  %v522_v13 = vshrl.u32 %v521_v38, 5  ;;  %v528_v14 = vor.u32 %v527_v51, %v526_v59  ;;  %v534_v16 = vor.u32 %v533_v0, %v532_v62 }
 0x121   :  { %v1980_v46 = vmin.u32 %v367_v56, %v365_v44  ;;  %v538_v19 = vshll.u32 %v2429_v1, %v523_v41  ;;  %v539_v20 = vshrl.u32 %v2430_v11, %v524_v42  ;;  %v531_v23 = vor.u32 %v530_v50, %v529_v4 }
 0x122   :  { %v2662_v3 = vshrl.u32 %v258_v58, 30  ;;  %v537_v53 = vor.u32 %v536_v7, %v535_v6  ;;  %v525_v26 = vshrl.u32 %v2425_v55, %v524_v42  ;;  %v557_v28 = vshll.u32 %v517_v10, 8 }
 0x123   :  { %v369_v60 = vclz %v1980_v46  ;;  %v409_v29 = vshrl.u32 %v408_v12, 23  ;;  %vm544_vm0 = vcmp.lt.s32.totalorder %v522_v13, 4  ;;  %v540_v39 = vor.u32 %v539_v20, %v538_v19 }
 0x124   :  { %v260_v9 = vshll.u32 %v2662_v3, 30  ;;  %vm541_vm1 = vcmp.lt.s32.totalorder %v522_v13, 1  ;;  %v546_v40 = vsel %vm544_vm0, %v534_v16, 2102212464  ;;  %v550_v47 = vsel %vm544_vm0, %v537_v53, 920167782 }
 0x125   :  { %v1981_v5 = vadd.s32 4294967294, %v369_v60  ;;  %v549_v45 = vsel %vm541_vm1, %v528_v14, %v531_v23  ;;  %vm542_vm3 = vcmp.lt.s32.totalorder %v522_v13, 2  ;;  %vm543_vm4 = vcmp.lt.s32.totalorder %v522_v13, 3 }
 0x126   :  { %v2672_v18 = vsub.s32 %v257_v52, %v260_v9  ;;  %v547_v42 = vsel %vm543_vm4, %v531_v23, %v546_v40  ;;  %v551_v46 = vsel %vm543_vm4, %v534_v16, %v550_v47  ;;  %v553_v58 = vsel %vm541_vm1, %v531_v23, %v534_v16 }
 0x127   :  { %vm1982_vm15 = vcmp.lt.s32.totalorder %v1981_v5, 0  ;;  %v552_v60 = vsel %vm542_vm3, %v549_v45, %v551_v46  ;;  %v554_v51 = vsel %vm544_vm0, %v540_v39, 1326507024  ;;  %v253_v50 = vadd.s32 %v2636_v31, %v2644_v37 }
 0x128   :  { %v372_v17 = vsel %vm1982_vm15, 0, %v1981_v5  ;;  %v263_v54 = vsub.s32 0, %v2672_v18  ;;  %v555_v0 = vsel %vm543_vm4, %v537_v53, %v554_v51  ;;  %v1983_v7 = vadd.s32 4294967169, %v409_v29 }
 0x129   :  { %v373_v21 = vsub.s32 32, %v372_v17  ;;  %v377_v22 = vsub.s32 4294967266, %v372_v17  ;;  %v374_v30 = vshll.u32 %v365_v44, %v372_v17  ;;  %v545_v44 = vsel %vm541_vm1, %v525_v26, %v528_v14 }
 0x12a   :  { %v1976_v38 = vmin.u32 %v263_v54, %v2672_v18  ;;  %v2684_v4 = vmul.u32.u64.low %v557_v28, %v552_v60  ;;  %v2685_v5 = vmul.u32.u64.high %v557_v28, %v552_v60, %v2684_v4  ;;  %v556_v6 = vsel %vm542_vm3, %v553_v58, %v555_v0 }
 0x12b   :  { %v375_v33 = vshrl.u32 %v357_v8, %v373_v21  ;;  %v378_v36 = vadd.s32 127, %v377_v22  ;;  %v2691_v10 = vmul.u32.u64.low %v557_v28, %v556_v6  ;;  %v2692_v12 = vmul.u32.u64.high %v557_v28, %v556_v6, %v2691_v10 }
 0x12c   :  { %v265_v56 = vclz %v1976_v38  ;;  %v548_v17 = vsel %vm542_vm3, %v545_v44, %v547_v42  ;;  %v415_v19 = vadd.s32 1, %v1983_v7  ;;  %vm2697_vm6 = vcmp.le.f32.partialorder %v301_v25, 0.7853982 }
 0x12d   :  { %v376_v41 = vor.u32 %v375_v33, %v374_v30  ;;  %v379_v43 = vshll.u32 %v378_v36, 23  ;;  %v387_v37 = vsub.s32 4, %v2640_v35  ;;  %v567_v21 = vadd.s32 1, %v2685_v5 }
 0x12e   :  { %v1977_v59 = vadd.s32 4294967294, %v265_v56  ;;  %vm416_vm7 = vcmp.gt.s32.totalorder %v415_v19, 0  ;;  %v564_v54 = vmul.u32 %v557_v28, %v548_v17  ;;  %vm566_vm8 = vc.u32 %v2692_v12, %v2684_v4 }
 0x12f   :  { %v380_v52 = vor.u32 4788187, %v379_v43  ;;  %v383_v48 = vcvt.s32.f32 %v376_v41  ;;  %v417_v25 = vsel %vm416_vm7, %v415_v19, 0  ;;  %v568_v33 = vsel %vm566_vm8, %v567_v21, %v2685_v5 }
 0x130   :  { %vm1978_vm5 = vcmp.lt.s32.totalorder %v1977_v59, 0  ;;  %v419_v36 = vand.u32 31, %v417_v25  ;;  %v388_v38 = vsel %vm303_vm2, %v387_v37, %v2640_v35  ;;  %v405_v39 = vand.u32 2147483647, %v2660_v2 }
 0x131   :  { %v381_v62 = vand.u32 2147483647, %v380_v52  ;;  %v268_v9 = vsel %vm1978_vm5, 0, %v1977_v59  ;;  %v283_v40 = vsub.s32 4, %v2662_v3  ;;  %vm2729_vm9 = vcmp.le.f32.partialorder %v197_v32, 0.7853982 }
 0x132   :  { %v269_v14 = vsub.s32 32, %v268_v9  ;;  %v273_v16 = vsub.s32 4294967266, %v268_v9  ;;  %v270_v22 = vshll.u32 %v2672_v18, %v268_v9  ;;  %v569_v18 = vadd.s32 %v568_v33, %v564_v54 }
 0x133   :  { %v384_v8 = vmul.f32 %v383_v48, %v381_v62  ;;  %v420_v43 = vsub.s32 32, %v419_v36  ;;  %v425_v56 = vshll.u32 %v2426_v57, %v419_v36  ;;  %v428_v44 = vshll.u32 %v2427_v61, %v419_v36 }
 0x134   :  { %v271_v23 = vshrl.u32 %v253_v50, %v269_v14  ;;  %v274_v53 = vadd.s32 127, %v273_v16  ;;  %v570_v41 = vadd.s32 536870912, %v569_v18  ;;  %v431_v35 = vshll.u32 %v2428_v63, %v419_v36 }
 0x135   :  { %v385_v31 = vxor.u32 2147483648, %v384_v8  ;;  %v426_v42 = vshrl.u32 %v2427_v61, %v420_v43  ;;  %v434_v46 = vshll.u32 %v2429_v1, %v419_v36  ;;  %v429_v48 = vshrl.u32 %v2428_v63, %v420_v43 }
 0x136   :  { %v272_v29 = vor.u32 %v271_v23, %v270_v22  ;;  %v275_v30 = vshll.u32 %v274_v53, 23  ;;  %v2719_v52 = vshrl.u32 %v570_v41, 30  ;;  %v432_v59 = vshrl.u32 %v2429_v1, %v420_v43 }
 0x137   :  { %v386_v13 = vsel %vm303_vm2, %v385_v31, %v384_v8  ;;  %v435_v60 = vshrl.u32 %v2430_v11, %v420_v43  ;;  %vm199_vm10 = vcmp.lt.s32.totalorder %v2555_v27, 0  ;;  %v412_v62 = vand.u32 8388607, %v405_v39 }
 0x138   :  { %v389_v26 = vsel %vm2697_vm6, %v2551_v24, %v386_v13  ;;  %v276_v28 = vor.u32 4788187, %v275_v30  ;;  %v279_v47 = vcvt.s32.f32 %v272_v29  ;;  %v572_v61 = vshll.u32 %v2719_v52, 30 }
 0x139   :  { %2294 = vcosq.f32 %v389_v26  ;;  %v390_v63 = vsel %vm2697_vm6, 0, %v388_v38  ;;  %v422_v1 = vshll.u32 %v2425_v55, %v419_v36  ;;  %v423_v11 = vshrl.u32 %v2426_v57, %v420_v43 }
 0x13a   :  { %2296 = vsinq.f32 %v389_v26  ;;  %v277_v45 = vand.u32 2147483647, %v276_v28  ;;  %v284_v32 = vsel %vm199_vm10, %v283_v40, %v2662_v3  ;;  %v2742_v5 = vsub.s32 %v569_v18, %v572_v61 }
 0x13b   :  { %v418_v50 = vshrl.u32 %v417_v25, 5  ;;  %v427_v6 = vor.u32 %v426_v42, %v425_v56  ;;  %v430_v8 = vor.u32 %v429_v48, %v428_v44  ;;  %v433_v9 = vor.u32 %v432_v59, %v431_v35 }
 0x13c   :  { %v280_v58 = vmul.f32 %v279_v47, %v277_v45  ;;  %v436_v10 = vor.u32 %v435_v60, %v434_v46  ;;  %v394_v14 = vadd.s32 3, %v390_v63  ;;  %v575_v17 = vsub.s32 0, %v2742_v5 }
 0x13d   :  { %v413_v19 = vor.u32 8388608, %v412_v62  ;;  %v2748_v20 = vand.u32 3, %v390_v63  ;;  %v286_v57 = vsel %vm2729_vm9, 0, %v284_v32  ;;  %v424_v3 = vor.u32 %v423_v11, %v422_v1 }
 0x13e   :  { %v281_v0 = vxor.u32 2147483648, %v280_v58  ;;  %v1988_v31 = vmin.u32 %v575_v17, %v2742_v5  ;;  %vm437_vm11 = vcmp.lt.s32.totalorder %v418_v50, 1  ;;  %vm440_vm12 = vcmp.lt.s32.totalorder %v418_v50, 4 }
 0x13f   :  { %vm439_vm13 = vcmp.lt.s32.totalorder %v418_v50, 3  ;;  %v446_v37 = vsel %vm440_vm12, %v433_v9, 920167782  ;;  %v449_v21 = vsel %vm437_vm11, %v427_v6, %v430_v8  ;;  %v450_v22 = vsel %vm440_vm12, %v436_v10, 1326507024 }
 0x140   :  { %v282_v7 = vsel %vm199_vm10, %v281_v0, %v280_v58  ;;  %v577_v53 = vclz %v1988_v31  ;;  %v421_v13 = vshrl.u32 %v2425_v55, %v420_v43  ;;  %vm438_vm14 = vcmp.lt.s32.totalorder %v418_v50, 2 }
 0x141   :  { %v285_v16 = vsel %vm2729_vm9, %v2555_v27, %v282_v7  ;;  %v451_v54 = vsel %vm439_vm13, %v433_v9, %v450_v22  ;;  %v445_v26 = vsel %vm437_vm11, %v424_v3, %v427_v6  ;;  %v447_v29 = vsel %vm439_vm13, %v430_v8, %v446_v37 }
 0x142   :  { %2298 = vcosq.f32 %v285_v16  ;;  %v452_v30 = vsel %vm438_vm14, %v449_v21, %v451_v54  ;;  %v453_v33 = vshll.u32 %v413_v19, 8  ;;  %v395_v18 = vand.u32 3, %v394_v14  ;;  %v2198_v54 = vld [vmem:[#allocation7 + $0x70] ss:$8 sps:$4 sm:$0xff]  }
 0x143   :  { %2300 = vsinq.f32 %v285_v16  ;;  %v290_v36 = vadd.s32 3, %v286_v57  ;;  %v1989_v38 = vadd.s32 4294967294, %v577_v53  ;;  %v442_v28 = vsel %vm440_vm12, %v430_v8, 2102212464 }
 0x144   :  { %vm812_vm15 = vcmp.lt.s32.totalorder %v2748_v20, 2  ;;  %v2763_v40 = vmul.u32.u64.low %v453_v33, %v452_v30  ;;  %v2764_v55 = vmul.u32.u64.high %v453_v33, %v452_v30, %v2763_v40  ;;  %v708_v41 = vand.u32 3, %v286_v57 }
 0x145   :  { %vm1990_vm0 = vcmp.lt.s32.totalorder %v1989_v38, 0  ;;  %v441_v43 = vsel %vm437_vm11, %v421_v13, %v424_v3  ;;  %v448_v45 = vsel %vm438_vm14, %v445_v26, %v447_v29  ;;  %v443_v42 = vsel %vm439_vm13, %v427_v6, %v442_v28 }
 0x146   :  { %v2295_v23 = vpop.eup %2294  ;;  %v2768_v44 = vsel %vm1990_vm0, 0, %v1989_v38  ;;  %vm393_vm1 = vweird.f32 %v2551_v24  ;;  %vm396_vm2 = vcmp.lt.s32.totalorder %v395_v18, 2  ;;  %vm813_vm3 = vcmp.eq.s32.totalorder %v2748_v20, 0  ;;  %v2203_v24 = vld [vmem:[#allocation7 + $0x64] ss:$8 sps:$4 sm:$0xff]  }
 0x147   :  { %v2297_v25 = vpop.eup %2296  ;;  %v401_v56 = vxor.u32 2147483648, %v2295_v23  ;;  %vm816_vm4 = vcmp.eq.s32.totalorder %v2748_v20, 2  ;;  %v291_v35 = vand.u32 3, %v290_v36  ;;  %vm397_vm5 = vcmp.eq.s32.totalorder %v395_v18, 0  ;;  %v2206_v38 = vld [vmem:[#allocation7 + $0x54] ss:$8 sps:$4 sm:$0xff]  }
 0x148   :  { %v398_v47 = vxor.u32 2147483648, %v2297_v25  ;;  %vm400_vm6 = vcmp.eq.s32.totalorder %v395_v18, 2  ;;  %v2775_v46 = vmul.u32.u64.low %v453_v33, %v448_v45  ;;  %v2776_v58 = vmul.u32.u64.high %v453_v33, %v448_v45, %v2775_v46 }
 0x149   :  { %vm709_vm8 = vcmp.lt.s32.totalorder %v708_v41, 2  ;;  %vm710_vm9 = vcmp.eq.s32.totalorder %v708_v41, 0  ;;  %v585_v48 = vsub.s32 4294967266, %v2768_v44  ;;  %v444_v59 = vsel %vm438_vm14, %v441_v43, %v443_v42 }
 0x14a   :  { %vm1106_vm10 = vcmask 785408   ;;  %v399_v60 = vsel %vm397_vm5, %v2295_v23, %v398_v47  ;;  %v402_v51 = vsel %vm400_vm6, %v401_v56, %v2297_v25  ;;  %v815_v61 = vsel %vm813_vm3, %v2295_v23, %v398_v47 }
 0x14b   :  { %v818_v62 = vsel %vm816_vm4, %v401_v56, %v2297_v25  ;;  %vm292_vm11 = vcmp.lt.s32.totalorder %v291_v35, 2  ;;  %vm293_vm12 = vcmp.eq.s32.totalorder %v291_v35, 0  ;;  %vm713_vm13 = vcmp.eq.s32.totalorder %v708_v41, 2  ;;  %v2204_v41 = vld [vmem:[#allocation7 + $0x50] ss:$8 sps:$4 sm:$0xff]  }
 0x14c   :  { %vm462_vm0 = vc.u32 %v2764_v55, %v2775_v46  ;;  %vm296_vm7 = vcmp.eq.s32.totalorder %v291_v35, 2  ;;  %v460_v11 = vmul.u32 %v453_v33, %v444_v59  ;;  %v463_v32 = vadd.s32 1, %v2776_v58  ;;  %v2201_v33 = vld [vmem:[#allocation7 + $0x60] ss:$8 sps:$4 sm:$0xff]  }
 0x14d   :  { %v403_v50 = vsel %vm396_vm2, %v399_v60, %v402_v51  ;;  %v819_v6 = vsel %vm812_vm15, %v815_v61, %v818_v62  ;;  %v586_v8 = vadd.s32 127, %v585_v48  ;;  %v565_v14 = vadd.s32 %v2684_v4, %v2692_v12  ;;  %v2210_v48 = vld [vmem:[#allocation7 + $0x30] ss:$8 sps:$4 sm:$0xff]   ;;  %v2215_v61 = vld [vmem:[#allocation7 + $0x24] ss:$8 sps:$4 sm:$0xff]  }
 0x14e   :  { %v464_v16 = vsel %vm462_vm0, %v463_v32, %v2776_v58  ;;  %v581_v57 = vsub.s32 32, %v2768_v44  ;;  %v404_v20 = vsel %vm393_vm1, nan, %v403_v50  ;;  %v820_v31 = vsel %vm393_vm1, nan, %v819_v6  ;;  %v2218_v50 = vld [vmem:[#allocation7 + $0x14] ss:$8 sps:$4 sm:$0xff]  }
 0x14f   :  { %v2299_v63 = vpop.eup %2298  ;;  %v465_v3 = vadd.s32 %v464_v16, %v460_v11  ;;  %vm2879_vm14 = vweird.f32 %v2555_v27  ;;  %v587_v22 = vshll.u32 %v586_v8, 23  ;;  %v582_v29 = vshll.u32 %v2742_v5, %v2768_v44  ;;  %v2209_v5 = vld [vmem:[#allocation7 + $0x44] ss:$8 sps:$4 sm:$0xff]   ;;  %v2207_v44 = vld [vmem:[#allocation7 + $0x40] ss:$8 sps:$4 sm:$0xff]  }
 0x150   :  { %v2301_v0 = vpop.eup %2300  ;;  %v297_v1 = vxor.u32 2147483648, %v2299_v63  ;;  %vm2880_vm15 = vmmov %vm2879_vm14  ;;  %v583_v25 = vshrl.u32 %v565_v14, %v581_v57  ;;  %v461_v59 = vadd.s32 %v2775_v46, %v2764_v55  ;;  %vm511_vm2 = vcmp.lt.s32.totalorder %v2563_v34, 0  ;;  %v2213_v11 = vld [vmem:[#allocation7 + $0x20] ss:$8 sps:$4 sm:$0xff]   ;;  %v2216_v8 = vld [vmem:[#allocation7 + $0x10] ss:$8 sps:$4 sm:$0xff]  }
 0x151   :  { %v294_v7 = vxor.u32 2147483648, %v2301_v0  ;;  %v466_v23 = vadd.s32 536870912, %v465_v3  ;;  %v588_v30 = vor.u32 4788187, %v587_v22  ;;  %vm2819_vm3 = vcmp.le.f32.partialorder %v509_v49, 0.7853982 }
 0x152   :  { %v298_v9 = vsel %vm296_vm7, %v297_v1, %v2301_v0  ;;  %v715_v10 = vsel %vm713_vm13, %v297_v1, %v2301_v0  ;;  %v584_v18 = vor.u32 %v583_v25, %v582_v29  ;;  %v2221_v14 = vld [vmem:[#allocation7 + $0x4] ss:$8 sps:$4 sm:$0xff]   ;;  %v595_v49 = vsub.s32 4, %v2719_v52  ;;  %v2224_v57 = vld [vmem:[#allocation7 + $0xf4] ss:$8 sps:$4 sm:$0xff]  }
 0x153   :  { %v295_v17 = vsel %vm293_vm12, %v2299_v63, %v294_v7  ;;  %v712_v19 = vsel %vm710_vm9, %v2299_v63, %v294_v7  ;;  %v2803_v26 = vshrl.u32 %v466_v23, 30  ;;  %v589_v28 = vand.u32 2147483647, %v588_v30  ;;  %v2225_v23 = vld [vmem:[#allocation7 + $0xe0] ss:$8 sps:$4 sm:$0xff]  }
 0x154   :  { %v299_v37 = vsel %vm292_vm11, %v295_v17, %v298_v9  ;;  %v716_v21 = vsel %vm709_vm8, %v712_v19, %v715_v10  ;;  %v591_v43 = vcvt.s32.f32 %v584_v18  ;;  %v2219_v17 = vld [vmem:[#allocation7] ss:$8 sps:$4 sm:$0xff]   ;;  %vm407_vm4 = vcmp.lt.s32.totalorder %v2660_v2, 0  ;;  %v2236_v32 = vld [vmem:[#allocation7 + $0xb4] ss:$8 sps:$4 sm:$0xff]  }
 0x155   :  { %v300_v4 = vsel %vm2879_vm14, nan, %v299_v37  ;;  %v717_v12 = vsel %vm2880_vm15, nan, %v716_v21  ;;  %v468_v27 = vshll.u32 %v2803_v26, 30  ;;  %vm406_vm5 = vcmp.le.f32.partialorder %v405_v39, 0.7853982 }
 0x156   :  { %v613_v53 = vpack.c.bf16 %v404_v20, %v300_v4  ;;  %v1027_v13 = vpack.c.bf16 %v820_v31, %v717_v12  ;;  %v592_v47 = vmul.f32 %v591_v43, %v589_v28  ;;  %v596_v20 = vsel %vm511_vm2, %v595_v49, %v2719_v52  ;;  %v2222_v21 = vld [vmem:[#allocation7 + $0xf0] ss:$8 sps:$4 sm:$0xff]   ;;  %v2227_v4 = vld [vmem:[#allocation7 + $0xe4] ss:$8 sps:$4 sm:$0xff]   ;;  %v2230_v39 = vld [vmem:[#allocation7 + $0xd4] ss:$8 sps:$4 sm:$0xff]  }
 0x157   :  { %v469_v36 = vsub.s32 %v465_v3, %v468_v27  ;;  %v491_v3 = vsub.s32 4, %v2803_v26  ;;  %v598_v12 = vsel %vm2819_vm3, 0, %v596_v20  ;;  %v2233_v27 = vld [vmem:[#allocation7 + $0xc4] ss:$8 sps:$4 sm:$0xff]   ;;  %v2252_v49 = vld [vmem:[#allocation8 + $0x50] ss:$8 sps:$4 sm:$0xff]  }
 0x158   :  { %2019 = vmatmul.mubr.msk.bf16.vlgmr.msra.gmra.mxu1 %vm1106_vm10, %v613_v53  ;;  %2040 = vmatmul.mubr.msk.bf16.vlgmr.msra.gmra.mxu0 %vm1106_vm10, %v1027_v13  ;;  %v593_v35 = vxor.u32 2147483648, %v592_v47  ;;  %v602_v52 = vadd.s32 3, %v598_v12  ;;  %v1017_v30 = vand.u32 3, %v598_v12  ;;  %v2261_v20 = vld [vmem:[#allocation8 + $0x20] ss:$8 sps:$4 sm:$0xff]  }
 0x159   :  { %1155 = vmatprep.mubr.bf16.mxu1 %v2424_v15  ;;  %1367 = vmatprep.mubr.bf16.mxu0 %v2424_v15  ;;  %v471_v40 = vsub.s32 0, %v469_v36  ;;  %v2212_v15 = vld [vmem:[#allocation7 + $0x34] ss:$8 sps:$4 sm:$0xff]   ;;  %v492_v22 = vsel %vm407_vm4, %v491_v3, %v2803_v26  ;;  %v2263_v3 = vld [vmem:[#allocation8 + $0x24] ss:$8 sps:$4 sm:$0xff]  }
 0x15a   :  { %1623 = vmatpush1.bf16.msra.mxu1 %v2198_v54  ;;  %v594_v62 = vsel %vm511_vm2, %v593_v35, %v592_v47  ;;  %v494_v53 = vsel %vm406_vm5, 0, %v492_v22  ;;  %v603_v29 = vand.u32 3, %v602_v52  ;;  %vm1019_vm8 = vcmp.eq.s32.totalorder %v1017_v30, 0  ;;  %v2272_v12 = vld [vmem:[#allocation8 + $0xf4] ss:$8 sps:$4 sm:$0xff]   ;;  %v1228_v22 = vpop.f32.mrf.mxu0 }
 0x15b   :  { %1624 = vmatprep.subr.bf16.mxu1 %v2203_v24  ;;  %v1984_v45 = vmin.u32 %v471_v40, %v469_v36  ;;  %v597_v6 = vsel %vm2819_vm3, %v2563_v34, %v594_v62  ;;  %v498_v25 = vadd.s32 3, %v494_v53  ;;  %v2228_v24 = vld [vmem:[#allocation7 + $0xd0] ss:$8 sps:$4 sm:$0xff]   ;;  %vm1022_vm9 = vcmp.eq.s32.totalorder %v1017_v30, 2  ;;  %v2275_v52 = vld [vmem:[#allocation8 + $0xe4] ss:$8 sps:$4 sm:$0xff]  }
 0x15c   :  { %2302 = vcosq.f32 %v597_v6  ;;  %vm605_vm6 = vcmp.eq.s32.totalorder %v603_v29, 0  ;;  %vm608_vm7 = vcmp.eq.s32.totalorder %v603_v29, 2  ;;  %vm604_vm11 = vcmp.lt.s32.totalorder %v603_v29, 2 }
 0x15d   :  { %v473_v56 = vclz %v1984_v45  ;;  %2304 = vsinq.f32 %v597_v6  ;;  %v499_v26 = vand.u32 3, %v498_v25  ;;  %vm1018_vm13 = vcmp.lt.s32.totalorder %v1017_v30, 2  ;;  %v2243_v6 = vld [vmem:[#allocation7 + $0x80] ss:$8 sps:$4 sm:$0xff]   ;;  %v2276_v25 = vld [vmem:[#allocation8 + $0xd0] ss:$8 sps:$4 sm:$0xff]  }
 0x15e   :  { %1625 = vmatpush1.bf16.msra.mxu1 %v2201_v33  ;;  %vm601_vm3 = vweird.f32 %v2563_v34  ;;  %v2239_v34 = vld [vmem:[#allocation7 + $0xa4] ss:$8 sps:$4 sm:$0xff]  }
 0x15f   :  { %1626 = vmatprep.subr.bf16.mxu1 %v2206_v38  ;;  %v1985_v42 = vadd.s32 4294967294, %v473_v56  ;;  %v2231_v38 = vld [vmem:[#allocation7 + $0xc0] ss:$8 sps:$4 sm:$0xff]   ;;  %vm501_vm0 = vcmp.eq.s32.totalorder %v499_v26, 0  ;;  %vm504_vm14 = vcmp.eq.s32.totalorder %v499_v26, 2 }
 0x161   :  { %vm1986_vm1 = vcmp.lt.s32.totalorder %v1985_v42, 0 }
 0x162   :  { %1627 = vmatpush1.bf16.msra.mxu1 %v2204_v41  ;;  %v476_v58 = vsel %vm1986_vm1, 0, %v1985_v42  ;;  %vm500_vm1 = vcmp.lt.s32.totalorder %v499_v26, 2 }
 0x163   :  { %1628 = vmatprep.subr.bf16.mxu1 %v2209_v5  ;;  %v477_v60 = vsub.s32 32, %v476_v58  ;;  %v481_v51 = vsub.s32 4294967266, %v476_v58  ;;  %v478_v63 = vshll.u32 %v469_v36, %v476_v58  ;;  %v914_v36 = vand.u32 3, %v494_v53  ;;  %v1230_v53 = vpop.f32.mrf.mxu0 }
 0x165   :  { %v479_v0 = vshrl.u32 %v461_v59, %v477_v60  ;;  %v482_v1 = vadd.s32 127, %v481_v51  ;;  %vm916_vm12 = vcmp.eq.s32.totalorder %v914_v36, 0  ;;  %vm919_vm15 = vcmp.eq.s32.totalorder %v914_v36, 2 }
 0x166   :  { %1629 = vmatpush1.bf16.msra.mxu1 %v2207_v44  ;;  %vm915_vm2 = vcmp.lt.s32.totalorder %v914_v36, 2  ;;  %v2282_v36 = vld [vmem:[#allocation8 + $0xb0] ss:$8 sps:$4 sm:$0xff]  }
 0x167   :  { %1630 = vmatprep.subr.bf16.mxu1 %v2212_v15  ;;  %v480_v55 = vor.u32 %v479_v0, %v478_v63  ;;  %v483_v46 = vshll.u32 %v482_v1, 23 }
 0x169   :  { %v484_v7 = vor.u32 4788187, %v483_v46  ;;  %v487_v10 = vcvt.s32.f32 %v480_v55  ;;  %v2303_v13 = vpop.eup %2302  ;;  %v2237_v55 = vld [vmem:[#allocation7 + $0xa0] ss:$8 sps:$4 sm:$0xff]   ;;  %v2240_v46 = vld [vmem:[#allocation7 + $0x90] ss:$8 sps:$4 sm:$0xff]  }
 0x16a   :  { %1631 = vmatpush1.bf16.msra.mxu1 %v2210_v48  ;;  %v2305_v54 = vpop.eup %2304  ;;  %v609_v18 = vxor.u32 2147483648, %v2303_v13 }
 0x16b   :  { %1632 = vmatprep.subr.bf16.mxu1 %v2215_v61  ;;  %v485_v9 = vand.u32 2147483647, %v484_v7  ;;  %v606_v33 = vxor.u32 2147483648, %v2305_v54  ;;  %v2246_v7 = vld [vmem:[#allocation8 + $0x70] ss:$8 sps:$4 sm:$0xff]  }
 0x16c   :  { %v610_v41 = vsel %vm608_vm7, %v609_v18, %v2305_v54  ;;  %v1024_v45 = vsel %vm1022_vm9, %v609_v18, %v2305_v54  ;;  %v1232_v54 = vpop.f32.mrf.mxu0 }
 0x16d   :  { %v488_v16 = vmul.f32 %v487_v10, %v485_v9  ;;  %v607_v40 = vsel %vm605_vm6, %v2303_v13, %v606_v33  ;;  %v1021_v43 = vsel %vm1019_vm8, %v2303_v13, %v606_v33  ;;  %v2251_v9 = vld [vmem:[#allocation8 + $0x64] ss:$8 sps:$4 sm:$0xff]   ;;  %v2249_v10 = vld [vmem:[#allocation8 + $0x60] ss:$8 sps:$4 sm:$0xff]   ;;  %v2278_v13 = vld [vmem:[#allocation8 + $0xd4] ss:$8 sps:$4 sm:$0xff]  }
 0x16e   :  { %1633 = vmatpush1.bf16.msra.mxu1 %v2213_v11  ;;  %v611_v42 = vsel %vm604_vm11, %v607_v40, %v610_v41  ;;  %v1025_v35 = vsel %vm1018_vm13, %v1021_v43, %v1024_v45  ;;  %v2234_v11 = vld [vmem:[#allocation7 + $0xb0] ss:$8 sps:$4 sm:$0xff]   ;;  %v1234_v29 = vpop.f32.mrf.mxu0  ;;  %v2284_v33 = vld [vmem:[#allocation8 + $0xb4] ss:$8 sps:$4 sm:$0xff]  }
 0x16f   :  { %1634 = vmatprep.subr.bf16.mxu1 %v2218_v50  ;;  %v489_v19 = vxor.u32 2147483648, %v488_v16  ;;  %v612_v61 = vsel %vm601_vm3, nan, %v611_v42  ;;  %v1026_v63 = vsel %vm601_vm3, nan, %v1025_v35  ;;  %v2245_v50 = vld [vmem:[#allocation7 + $0x84] ss:$8 sps:$4 sm:$0xff]  }
 0x170   :  { %v1238_v30 = vpop.f32.mrf.mxu0  ;;  %v1386_v42 = vld [vmem:[%s2869_s5] sm:$0x3] }
 0x171   :  { %v490_v31 = vsel %vm407_vm4, %v489_v19, %v488_v16  ;;  %vm497_vm4 = vweird.f32 %v2660_v2  ;;  %v2257_v16 = vld [vmem:[#allocation8 + $0x44] ss:$8 sps:$4 sm:$0xff]   ;;  %v2260_v19 = vld [vmem:[#allocation8 + $0x34] ss:$8 sps:$4 sm:$0xff]  }
 0x172   :  { %1635 = vmatpush1.bf16.msra.mxu1 %v2216_v8  ;;  %v493_v37 = vsel %vm406_vm5, %v2660_v2, %v490_v31  ;;  %v2242_v2 = vld [vmem:[#allocation7 + $0x94] ss:$8 sps:$4 sm:$0xff]   ;;  %v1240_v18 = vpop.f32.mrf.mxu0 }
 0x173   :  { %1636 = vmatprep.subr.bf16.mxu1 %v2221_v14  ;;  %2306 = vcosq.f32 %v493_v37  ;;  %v2248_v8 = vld [vmem:[#allocation8 + $0x74] ss:$8 sps:$4 sm:$0xff]  }
 0x174   :  { %2308 = vsinq.f32 %v493_v37  ;;  %1891 = vmatprep.subr.bf16.mxu0 %v2248_v8  ;;  %v2254_v14 = vld [vmem:[#allocation8 + $0x54] ss:$8 sps:$4 sm:$0xff]   ;;  %v2264_v37 = vld [vmem:[#allocation8 + $0x10] ss:$8 sps:$4 sm:$0xff]   ;;  %v1242_v26 = vpop.f32.mrf.mxu0 }
 0x175   :  { %1892 = vmatpush1.bf16.msra.mxu0 %v2246_v7  ;;  %v2266_v31 = vld [vmem:[#allocation8 + $0x14] ss:$8 sps:$4 sm:$0xff]  }
 0x176   :  { %1637 = vmatpush1.bf16.msra.mxu1 %v2219_v17  ;;  %1893 = vmatprep.subr.bf16.mxu0 %v2251_v9  ;;  %v2255_v17 = vld [vmem:[#allocation8 + $0x40] ss:$8 sps:$4 sm:$0xff]  }
 0x177   :  { %1638 = vmatprep.subr.bf16.mxu1 %v2224_v57  ;;  %v2258_v57 = vld [vmem:[#allocation8 + $0x30] ss:$8 sps:$4 sm:$0xff]  }
 0x179   :  { %1894 = vmatpush1.bf16.msra.mxu0 %v2249_v10 }
 0x17a   :  { %1639 = vmatpush2.bf16.msra.mxu1 %v2222_v21  ;;  %1895 = vmatprep.subr.bf16.mxu0 %v2254_v14  ;;  %v2269_v21 = vld [vmem:[#allocation8 + $0x4] ss:$8 sps:$4 sm:$0xff]  }
 0x17b   :  { %1640 = vmatprep.subr.bf16.mxu1 %v2227_v4  ;;  %v2267_v4 = vld [vmem:[#allocation8] ss:$8 sps:$4 sm:$0xff]  }
 0x17d   :  { %1896 = vmatpush1.bf16.msra.mxu0 %v2252_v49 }
 0x17e   :  { %1641 = vmatpush2.bf16.msra.mxu1 %v2225_v23  ;;  %1897 = vmatprep.subr.bf16.mxu0 %v2257_v16  ;;  %v2270_v23 = vld [vmem:[#allocation8 + $0xf0] ss:$8 sps:$4 sm:$0xff]  }
 0x17f   :  { %1642 = vmatprep.subr.bf16.mxu1 %v2230_v39  ;;  %v2273_v39 = vld [vmem:[#allocation8 + $0xe0] ss:$8 sps:$4 sm:$0xff]  }
 0x180   :  { %v2307_v28 = vpop.eup %2306 }
 0x181   :  { %v2309_v5 = vpop.eup %2308  ;;  %v505_v47 = vxor.u32 2147483648, %v2307_v28  ;;  %1898 = vmatpush1.bf16.msra.mxu0 %v2255_v17 }
 0x182   :  { %1643 = vmatpush2.bf16.msra.mxu1 %v2228_v24  ;;  %v502_v56 = vxor.u32 2147483648, %v2309_v5  ;;  %1899 = vmatprep.subr.bf16.mxu0 %v2260_v19  ;;  %v2281_v24 = vld [vmem:[#allocation8 + $0xc4] ss:$8 sps:$4 sm:$0xff]  }
 0x183   :  { %1644 = vmatprep.subr.bf16.mxu1 %v2233_v27  ;;  %v506_v44 = vsel %vm504_vm14, %v505_v47, %v2309_v5  ;;  %v921_v15 = vsel %vm919_vm15, %v505_v47, %v2309_v5  ;;  %v2279_v27 = vld [vmem:[#allocation8 + $0xc0] ss:$8 sps:$4 sm:$0xff]  }
 0x184   :  { %v503_v58 = vsel %vm501_vm0, %v2307_v28, %v502_v56  ;;  %v918_v48 = vsel %vm916_vm12, %v2307_v28, %v502_v56  ;;  %v1244_v28 = vpop.f32.mrf.mxu0 }
 0x185   :  { %v507_v59 = vsel %vm500_vm1, %v503_v58, %v506_v44  ;;  %v922_v60 = vsel %vm915_vm2, %v918_v48, %v921_v15  ;;  %1900 = vmatpush1.bf16.msra.mxu0 %v2258_v57 }
 0x186   :  { %1645 = vmatpush2.bf16.msra.mxu1 %v2231_v38  ;;  %v508_v51 = vsel %vm497_vm4, nan, %v507_v59  ;;  %v923_v62 = vsel %vm497_vm4, nan, %v922_v60  ;;  %1901 = vmatprep.subr.bf16.mxu0 %v2263_v3  ;;  %v1388_v38 = vlaneseq }
 0x187   :  { %v614_v0 = vpack.c.bf16 %v612_v61, %v508_v51  ;;  %v1028_v1 = vpack.c.bf16 %v1026_v63, %v923_v62  ;;  %1646 = vmatprep.subr.bf16.mxu1 %v2236_v32 }
 0x188   :  { %v1389_v40 = vshrl.u32 %v1388_v38, 7  ;;  %v2293_v38 = vld [vmem:[#allocation8 + $0x84] ss:$8 sps:$4 sm:$0xff]  }
 0x189   :  { %2020 = vmatmul.mubr.msk.bf16.gmra.mxu1 %vm1106_vm10, %v614_v0  ;;  %2041 = vmatmul.mubr.msk.bf16.gmra.mxu0 %vm1106_vm10, %v1028_v1 }
 0x18a   :  { %1647 = vmatpush2.bf16.msra.mxu1 %v2234_v11  ;;  %1902 = vmatpush1.bf16.msra.mxu0 %v2261_v20  ;;  %v2842_v45 = vsub.s32 1, %v1389_v40  ;;  %v2844_v47 = vsub.s32 0, %v1389_v40  ;;  %v1450_v40 = vld [vmem:[%s2871_s7] sm:$0x3] }
 0x18b   :  { %1648 = vmatprep.subr.bf16.mxu1 %v2239_v34  ;;  %1903 = vmatprep.subr.bf16.mxu0 %v2266_v31 }
 0x18c   :  { %v1395_v59 = vrot.slane %v1386_v42, %v2842_v45  ;;  %v1391_v61 = vrot.slane %v1386_v42, %v2844_v47 }
 0x18e   :  { %1649 = vmatpush2.bf16.msra.mxu1 %v2237_v55  ;;  %1904 = vmatpush1.bf16.msra.mxu0 %v2264_v37 }
 0x18f   :  { %1650 = vmatprep.subr.bf16.mxu1 %v2242_v2  ;;  %1905 = vmatprep.subr.bf16.mxu0 %v2269_v21 }
 0x192   :  { %1651 = vmatpush2.bf16.msra.mxu1 %v2240_v46  ;;  %1906 = vmatpush1.bf16.msra.mxu0 %v2267_v4 }
 0x193   :  { %1652 = vmatprep.subr.bf16.mxu1 %v2245_v50  ;;  %1907 = vmatprep.subr.bf16.mxu0 %v2272_v12 }
 0x196   :  { %1653 = vmatpush2.bf16.msra.mxu1 %v2243_v6  ;;  %1908 = vmatpush2.bf16.msra.mxu0 %v2270_v23 }
 0x197   :  { %1909 = vmatprep.subr.bf16.mxu0 %v2275_v52 }
 0x19a   :  { %1910 = vmatpush2.bf16.msra.mxu0 %v2273_v39 }
 0x19b   :  { %1911 = vmatprep.subr.bf16.mxu0 %v2278_v13 }
 0x19e   :  { %1912 = vmatpush2.bf16.msra.mxu0 %v2276_v25 }
 0x19f   :  { %1913 = vmatprep.subr.bf16.mxu0 %v2281_v24 }
 0x1a2   :  { %1914 = vmatpush2.bf16.msra.mxu0 %v2279_v27 }
 0x1a3   :  { %1915 = vmatprep.subr.bf16.mxu0 %v2284_v33  ;;  %v2285_v33 = vld [vmem:[#allocation8 + $0xa0] ss:$8 sps:$4 sm:$0xff]  }
 0x1a6   :  { %1916 = vmatpush2.bf16.msra.mxu0 %v2282_v36  ;;  %v2288_v36 = vld [vmem:[#allocation8 + $0x90] ss:$8 sps:$4 sm:$0xff]  }
 0x218   :  { %v1147_v41 = vpop.f32.mrf.mxu1  ;;  %v1359_v43 = vpop.f32.mrf.mxu0 }
 0x219   :  { %v1229_v5 = vadd.f32 %v1228_v22, %v1147_v41 }
 0x21a   :  { %v1149_v56 = vpop.f32.mrf.mxu1  ;;  %v1361_v44 = vpop.f32.mrf.mxu0 }
 0x21b   :  { %v1231_v15 = vadd.f32 %v1230_v53, %v1149_v56  ;;  %v1378_v51 = vadd.f32 %v1359_v43, %v1229_v5  ;;  %v1459_v43 = vrot.slane %v1450_v40, %v2842_v45  ;;  %v1455_v5 = vrot.slane %v1450_v40, %v2844_v47 }
 0x21c   :  { %v1151_v35 = vpop.f32.mrf.mxu1  ;;  %v1363_v58 = vpop.f32.mrf.mxu0 }
 0x21d   :  { %v1379_v48 = vadd.f32 %v1361_v44, %v1231_v15  ;;  %v1233_v60 = vadd.f32 %v1232_v54, %v1151_v35  ;;  %v1398_v34 = vadd.f32 %v1391_v61, %v1378_v51 }
 0x21e   :  { %v1153_v62 = vpop.f32.mrf.mxu1  ;;  %v1365_v1 = vpop.f32.mrf.mxu0 }
 0x21f   :  { %v1380_v63 = vadd.f32 %v1363_v58, %v1233_v60  ;;  %v1235_v0 = vadd.f32 %v1234_v29, %v1153_v62  ;;  %v1399_v11 = vadd.f32 %v1395_v59, %v1379_v48  ;;  %v1406_v7 = vmax.f32 %v1398_v34, 0.0 }
 0x221   :  { %v1400_v32 = vadd.f32 %v1391_v61, %v1380_v63  ;;  %v1381_v55 = vadd.f32 %v1365_v1, %v1235_v0  ;;  %v1407_v50 = vmax.f32 %v1399_v11, 0.0 }
 0x223   :  { %v1401_v2 = vadd.f32 %v1395_v59, %v1381_v55  ;;  %v1408_v46 = vmax.f32 %v1400_v32, 0.0 }
 0x225   :  { %v1409_v6 = vmax.f32 %v1401_v2, 0.0  ;;  %v1414_v9 = vpack.c.bf16 %v1408_v46, %v1406_v7 }
 0x227   :  { %v1415_v8 = vpack.c.bf16 %v1409_v6, %v1407_v50 }
 0x229   :  { %1654 = vmatprep.mubr.bf16.mxu1 %v1415_v8 }
 0x22a   :  { %1655 = vmatmul.mubr.bf16.vlgmr.msra.gmra.mxu1 %v1414_v9 }
 0x249   :  { %v1157_v10 = vpop.f32.mrf.mxu1  ;;  %v1369_v14 = vpop.f32.mrf.mxu0 }
 0x24a   :  { %v1239_v49 = vadd.f32 %v1238_v30, %v1157_v10 }
 0x24b   :  { %v1159_v16 = vpop.f32.mrf.mxu1  ;;  %v1371_v17 = vpop.f32.mrf.mxu0 }
 0x24c   :  { %v1241_v19 = vadd.f32 %v1240_v18, %v1159_v16  ;;  %v1382_v37 = vadd.f32 %v1369_v14, %v1239_v49  ;;  %v2287_v18 = vld [vmem:[#allocation8 + $0xa4] ss:$8 sps:$4 sm:$0xff]   ;;  %v1719_v14 = vld [vmem:[%s2873_s9] sm:$0x3]  ;;  %s2431_s9 = smov [#allocation10]  }
 0x24d   :  { %v1161_v57 = vpop.f32.mrf.mxu1  ;;  %v1373_v3 = vpop.f32.mrf.mxu0  ;;  %1917 = vmatprep.subr.bf16.mxu0 %v2287_v18  ;;  %v1724_v49 = vrot.slane %v1719_v14, %v2844_v47  ;;  %v1728_v16 = vrot.slane %v1719_v14, %v2842_v45  ;;  %s1957_s3 = sshll.u32 %s2431_s9, 4  ;;  %s1958_s3 = int_to_ptr.vmem [resolvable:$true] %s1957_s3 }
 0x24e   :  { %v1383_v20 = vadd.f32 %v1371_v17, %v1241_v19  ;;  %v1243_v31 = vadd.f32 %v1242_v26, %v1161_v57  ;;  %v1402_v39 = vadd.f32 %v1391_v61, %v1382_v37  ;;  %1918 = vmatpush2.bf16.msra.mxu0 %v2285_v33  ;;  %v2290_v26 = vld [vmem:[#allocation8 + $0x94] ss:$8 sps:$4 sm:$0xff]   ;;  %s2390_s11 = scalar_lea.vmem %s1958_s3, 1024  ;;  %p2395_p7 = scmp.lt.s32.totalorder %s1958_s3, %s1958_s3 }
 0x24f   :  { %v1163_v21 = vpop.f32.mrf.mxu1  ;;  %v1375_v22 = vpop.f32.mrf.mxu0  ;;  %1919 = vmatprep.subr.bf16.mxu0 %v2290_v26  ;;  %p2391_p6 = scmp.ne.s32.totalorder %s1958_s3, %s2390_s11  ;;  %p2396_p8 = scmp.lt.s32.totalorder %s2390_s11, %s2390_s11 }
 0x250   :  { %v1384_v4 = vadd.f32 %v1373_v3, %v1243_v31  ;;  %v1245_v12 = vadd.f32 %v1244_v28, %v1163_v21  ;;  %v1403_v23 = vadd.f32 %v1395_v59, %v1383_v20  ;;  %v1410_v29 = vmax.f32 %v1402_v39, 0.0  ;;  %v2291_v28 = vld [vmem:[#allocation8 + $0x80] ss:$8 sps:$4 sm:$0xff]  }
 0x251   :  { %p2397_p9 = por %p2396_p8, %p2395_p7 }
 0x252   :  { %v1404_v52 = vadd.f32 %v1391_v61, %v1384_v4  ;;  %v1385_v53 = vadd.f32 %v1375_v22, %v1245_v12  ;;  %v1411_v25 = vmax.f32 %v1403_v23, 0.0  ;;  %1920 = vmatpush2.bf16.msra.mxu0 %v2288_v36 }
 0x253   :  { %1921 = vmatprep.subr.bf16.mxu0 %v2293_v38  ;;  %p2398_p10 = pnand %p2397_p9, %p2391_p6 }
 0x254   :  { %v1405_v13 = vadd.f32 %v1395_v59, %v1385_v53  ;;  %v1412_v54 = vmax.f32 %v1404_v52, 0.0 }
 0x256   :  { %v1413_v24 = vmax.f32 %v1405_v13, 0.0  ;;  %v1416_v27 = vpack.c.bf16 %v1412_v54, %v1410_v29  ;;  %1922 = vmatpush2.bf16.msra.mxu0 %v2291_v28 }
 0x258   :  { %v1417_v30 = vpack.c.bf16 %v1413_v24, %v1411_v25 }
 0x25a   :  { %1664 = vmatprep.mubr.bf16.mxu1 %v1417_v30 }
 0x25b   :  { %1665 = vmatmul.mubr.bf16.gmra.mxu1 %v1416_v27 }
 0x2ea   :  { %v1656_v41 = vpop.f32.mrf.mxu1 }
 0x2eb   :  { %v1657_v35 = vadd.f32 %v1656_v41, %v1455_v5 }
 0x2ec   :  { %v1658_v56 = vpop.f32.mrf.mxu1 }
 0x2ed   :  { %v1659_v42 = vadd.f32 %v1658_v56, %v1459_v43  ;;  %v1675_v61 = vmax.f32 %v1657_v35, 0.0 }
 0x2ee   :  { %v1660_v44 = vpop.f32.mrf.mxu1 }
 0x2ef   :  { %v1661_v15 = vadd.f32 %v1660_v44, %v1455_v5  ;;  %v1676_v60 = vmax.f32 %v1659_v42, 0.0 }
 0x2f0   :  { %v1662_v58 = vpop.f32.mrf.mxu1 }
 0x2f1   :  { %v1663_v48 = vadd.f32 %v1662_v58, %v1459_v43  ;;  %v1677_v59 = vmax.f32 %v1661_v15, 0.0 }
 0x2f3   :  { %v1678_v51 = vmax.f32 %v1663_v48, 0.0  ;;  %v1683_v63 = vpack.c.bf16 %v1677_v59, %v1675_v61 }
 0x2f5   :  { %v1684_v62 = vpack.c.bf16 %v1678_v51, %v1676_v60 }
 0x2f7   :  { %1923 = vmatprep.mubr.bf16.mxu0 %v1684_v62 }
 0x2f8   :  { %1924 = vmatmul.mubr.bf16.vlgmr.msra.gmra.mxu0 %v1683_v63 }
 0x31b   :  { %v1666_v0 = vpop.f32.mrf.mxu1 }
 0x31c   :  { %v1667_v34 = vadd.f32 %v1666_v0, %v1455_v5 }
 0x31d   :  { %v1668_v1 = vpop.f32.mrf.mxu1 }
 0x31e   :  { %v1669_v32 = vadd.f32 %v1668_v1, %v1459_v43  ;;  %v1679_v8 = vmax.f32 %v1667_v34, 0.0 }
 0x31f   :  { %v1670_v11 = vpop.f32.mrf.mxu1 }
 0x320   :  { %v1671_v55 = vadd.f32 %v1670_v11, %v1455_v5  ;;  %v1680_v6 = vmax.f32 %v1669_v32, 0.0 }
 0x321   :  { %v1672_v2 = vpop.f32.mrf.mxu1 }
 0x322   :  { %v1673_v46 = vadd.f32 %v1672_v2, %v1459_v43  ;;  %v1681_v50 = vmax.f32 %v1671_v55, 0.0 }
 0x324   :  { %v1682_v7 = vmax.f32 %v1673_v46, 0.0  ;;  %v1685_v10 = vpack.c.bf16 %v1681_v50, %v1679_v8 }
 0x326   :  { %v1686_v9 = vpack.c.bf16 %v1682_v7, %v1680_v6 }
 0x328   :  { %1933 = vmatprep.mubr.bf16.mxu0 %v1686_v9 }
 0x329   :  { %1934 = vmatmul.mubr.bf16.gmra.mxu0 %v1685_v10 }
 0x3b8   :  { %v1925_v17 = vpop.f32.mrf.mxu0 }
 0x3b9   :  { %v1926_v19 = vadd.f32 %v1925_v17, %v1724_v49 }
 0x3ba   :  { %v1927_v57 = vpop.f32.mrf.mxu0 }
 0x3bb   :  { %1944 = vst [vmem:[#allocation10] sm:$0xff] %v1926_v19  ;;  %v1928_v3 = vadd.f32 %v1927_v57, %v1728_v16 }
 0x3bc   :  { %v1929_v20 = vpop.f32.mrf.mxu0 }
 0x3bd   :  { %1945 = vst [vmem:[#allocation10 + $0x8] sm:$0xff] %v1928_v3  ;;  %v1930_v31 = vadd.f32 %v1929_v20, %v1724_v49 }
 0x3be   :  { %v1931_v37 = vpop.f32.mrf.mxu0 }
 0x3bf   :  { %1946 = vst [vmem:[#allocation10 + $0x10] sm:$0xff] %v1930_v31  ;;  %v1932_v21 = vadd.f32 %v1931_v37, %v1728_v16 }
 0x3c1   :  { %1947 = vst [vmem:[#allocation10 + $0x18] sm:$0xff] %v1932_v21 }
 0x3e9   :  { %v1935_v4 = vpop.f32.mrf.mxu0 }
 0x3ea   :  { %v1936_v12 = vadd.f32 %v1935_v4, %v1724_v49 }
 0x3eb   :  { %v1937_v22 = vpop.f32.mrf.mxu0 }
 0x3ec   :  { %1948 = vst [vmem:[#allocation10 + $0x20] sm:$0xff] %v1936_v12  ;;  %v1938_v23 = vadd.f32 %v1937_v22, %v1728_v16 }
 0x3ed   :  { %v1939_v47 = vpop.f32.mrf.mxu0 }
 0x3ee   :  { %1949 = vst [vmem:[#allocation10 + $0x28] sm:$0xff] %v1938_v23  ;;  %v1940_v45 = vadd.f32 %v1939_v47, %v1724_v49 }
 0x3ef   :  { %v1941_v52 = vpop.f32.mrf.mxu0 }
 0x3f0   :  { %1950 = vst [vmem:[#allocation10 + $0x30] sm:$0xff] %v1940_v45  ;;  %v1942_v53 = vadd.f32 %v1941_v52, %v1728_v16 }
 0x3f2   :  { %1951 = vst [vmem:[#allocation10 + $0x38] sm:$0xff] %v1942_v53 }
 0x3f3   :  { %2401 = shalt.err (!%p2398_p10)
}
 0x3f4   :  { %s2432_s12 = smov 256   ;;  %s2433_s6 = smov 16  }
 0x3f5   :  { %1963 = dma.vmem_to_hbm [thread:$0]  %s1958_s3, 1024, %s2874_s10, [#allocation4], %s2432_s12, %s2432_s12, %s2433_s6  }
 0x3f6   :  { %2416 = dma.done.wait [#allocation4], 1024  }
 0x3f7   :  { %2417 = vsyncadd [#allocation4], 4294966272 }
 0x3f8   :  { %1967 = vsyncpa [#allocation3], 1 }
 0x3f9   :  { %1968 = vsyncpa [#allocation6], 1 }
 0x3fa   :  { %1969 = vsyncpa [#allocation9], 1 }
 0x3fb   :  { %1970 = vsyncpa [#allocation4], 1 }

</bundles_post_ra>
